<compile_context>
chip_gen: v5e
topology: v5e:2x2
jax: 0.10.0
libtpu: 0.0.40
codegen_flags: <defaults>
</compile_context>

<pallas_src>
import jax
import jax.numpy as jnp
from jax.experimental import pallas as pl
from jax.experimental.pallas import tpu as pltpu


def _round_up(x, m):
    return -(-x // m) * m


def _ffwd_kernel(x_ref, w1_ref, b1_ref, w2_ref, b2_ref, o_ref):
    # x_ref:  (tm, C)  f32 row tile of flattened tokens (streamed)
    # w1_ref: (C, H)   bf16 first linear weight (VMEM resident)
    # b1_ref: (1, H)   f32
    # w2_ref: (H, C)   bf16 second linear weight (VMEM resident)
    # b2_ref: (1, C)   f32
    # o_ref:  (tm, C)  output tile
    x = x_ref[...].astype(jnp.bfloat16)
    # First linear + bias + ReLU, f32 accumulation; full (tm, H) slab lives in VMEM.
    h = jnp.dot(x, w1_ref[...], preferred_element_type=jnp.float32)
    h = jnp.maximum(h + b1_ref[...], 0.0).astype(jnp.bfloat16)
    # Second linear over the whole K=H in one dot; single store of the tile.
    o = jnp.dot(h, w2_ref[...], preferred_element_type=jnp.float32) + b2_ref[...]
    o_ref[...] = o.astype(o_ref.dtype)
    # Dropout: identity (inference / eval mode).


def prepare_ffwd_params(w1, b1, w2, b2):
    """One-time parameter prep (hoisted out of the per-call path).

    Returns bf16 weights and f32 row-vector biases; cache and reuse across calls
    so the weight cast is not re-done (and re-streamed through HBM) every step.
    """
    return (
        w1.astype(jnp.bfloat16),
        b1.astype(jnp.float32).reshape(1, -1),
        w2.astype(jnp.bfloat16),
        b2.astype(jnp.float32).reshape(1, -1),
    )


def _pick_row_tile(M, tm):
    if M > tm:
        return tm
    if M >= 512:
        # v7x has 2 TensorCores: give the 'parallel' M axis at least 2 tiles
        # whenever each tile still has >= 256 MXU rows.
        return _round_up(pl.cdiv(M, 2), 8)
    # Single full-extent tile (block dim == array dim is always legal).
    return M


def feed_forward(x, params, *, tm=512, out_dtype=None):
    """x: (B, T, C). params: output of prepare_ffwd_params."""
    w1, b1, w2, b2 = params
    B, T, C = x.shape
    H = w1.shape[1]  # 4 * C
    M = B * T
    out_dtype = x.dtype if out_dtype is None else out_dtype

    tm_eff = _pick_row_tile(M, tm)
    grid = (pl.cdiv(M, tm_eff),)

    x2d = x.reshape(M, C)  # free reshape; no padding copies in HBM

    out = pl.pallas_call(
        _ffwd_kernel,
        out_shape=jax.ShapeDtypeStruct((M, C), out_dtype),
        grid_spec=pltpu.PrefetchScalarGridSpec(
            num_scalar_prefetch=0,
            grid=grid,
            in_specs=[
                pl.BlockSpec((tm_eff, C), lambda i: (i, 0)),  # x tile (streamed)
                pl.BlockSpec((C, H), lambda i: (0, 0)),       # w1 (resident)
                pl.BlockSpec((1, H), lambda i: (0, 0)),       # b1
                pl.BlockSpec((H, C), lambda i: (0, 0)),       # w2 (resident)
                pl.BlockSpec((1, C), lambda i: (0, 0)),       # b2
            ],
            out_specs=pl.BlockSpec((tm_eff, C), lambda i: (i, 0)),
        ),
        compiler_params=pltpu.CompilerParams(
            dimension_semantics=("parallel",),   # M-axis shards across TCs (v7x)
            vmem_limit_bytes=32 * 1024 * 1024,   # safe budget on v5e/v6e/v7x
        ),
    )(x2d, w1, b1, w2, b2)

    return out.reshape(B, T, C)


def _init_params(key, n_embd):
    """Deterministic init mimicking nn.Linear default (uniform +/- 1/sqrt(fan_in))."""
    h = 4 * n_embd
    k1, k2, k3, k4 = jax.random.split(key, 4)
    bound1 = 1.0 / jnp.sqrt(n_embd)
    bound2 = 1.0 / jnp.sqrt(h)
    w1 = jax.random.uniform(k1, (n_embd, h), jnp.float32, -bound1, bound1)
    b1 = jax.random.uniform(k2, (h,), jnp.float32, -bound1, bound1)
    w2 = jax.random.uniform(k3, (h, n_embd), jnp.float32, -bound2, bound2)
    b2 = jax.random.uniform(k4, (n_embd,), jnp.float32, -bound2, bound2)
    return w1, b1, w2, b2


if __name__ == "__main__":
    # Small shapes consistent with the module's forward: (B, T, n_embd).
    n_embd = 320           # as in the source module
    B, T = 2, 8            # 16 tokens total (note: perf tuning needs M >= 256)
    key = jax.random.PRNGKey(0)
    kx, kp = jax.random.split(key)

    x = jax.random.normal(kx, (B, T, n_embd), dtype=jnp.float32)
    w1, b1, w2, b2 = _init_params(kp, n_embd)
    params = prepare_ffwd_params(w1, b1, w2, b2)   # hoisted one-time weight prep

    out = feed_forward(x, params)
    out = jax.block_until_ready(out)

    # Reference matching the kernel numerics: bf16 operands, f32 accumulation,
    # f32 bias add, ReLU in f32 (dropout is identity in eval mode).
    xb = x.reshape(-1, n_embd).astype(jnp.bfloat16)
    h_ref = jnp.maximum(
        jnp.dot(xb, w1.astype(jnp.bfloat16), preferred_element_type=jnp.float32) + b1,
        0.0)
    ref = jnp.dot(h_ref.astype(jnp.bfloat16), w2.astype(jnp.bfloat16),
                  preferred_element_type=jnp.float32) + b2
    ref = ref.reshape(B, T, n_embd)

    assert out.shape == (B, T, n_embd)
    assert jnp.allclose(out, ref, atol=1e-2, rtol=1e-2), float(jnp.max(jnp.abs(out - ref)))

    print("KERNEL_OK")
</pallas_src>

<mosaic_0001>
module attributes {stable_mosaic.version = 11 : i64} {
  func.func @_ffwd_kernel(%arg0: i32, %arg1: memref<16x320xf32, #tpu.memory_space<vmem>>, %arg2: memref<320x1280xbf16, #tpu.memory_space<vmem>>, %arg3: memref<1x1280xf32, #tpu.memory_space<vmem>>, %arg4: memref<1280x320xbf16, #tpu.memory_space<vmem>>, %arg5: memref<1x320xf32, #tpu.memory_space<vmem>>, %arg6: memref<16x320xf32, #tpu.memory_space<vmem>>) attributes {dimension_semantics = [#tpu.dimension_semantics<parallel>], iteration_bounds = array<i64: 1>, scalar_prefetch = 0 : i64, scratch_operands = 0 : i64, tpu.core_type = #tpu.core_type<tc>, window_params = [{transform_indices = @transform_0, window_bounds = array<i64: 16, 320>}, {pipeline_mode = #tpu.pipeline_mode<synchronous>, transform_indices = @transform_1, window_bounds = array<i64: 320, 1280>}, {pipeline_mode = #tpu.pipeline_mode<synchronous>, transform_indices = @transform_2, window_bounds = array<i64: 1, 1280>}, {pipeline_mode = #tpu.pipeline_mode<synchronous>, transform_indices = @transform_3, window_bounds = array<i64: 1280, 320>}, {pipeline_mode = #tpu.pipeline_mode<synchronous>, transform_indices = @transform_4, window_bounds = array<i64: 1, 320>}, {transform_indices = @transform_5, window_bounds = array<i64: 16, 320>}]} {
    %c0 = arith.constant 0 : index
    %c0_0 = arith.constant 0 : index
    %0 = vector.load %arg1[%c0, %c0_0] : memref<16x320xf32, #tpu.memory_space<vmem>>, vector<16x320xf32>
    %1 = arith.truncf %0 : vector<16x320xf32> to vector<16x320xbf16>
    %c0_1 = arith.constant 0 : index
    %c0_2 = arith.constant 0 : index
    %2 = vector.load %arg2[%c0_1, %c0_2] : memref<320x1280xbf16, #tpu.memory_space<vmem>>, vector<320x1280xbf16>
    %cst = arith.constant dense<0.000000e+00> : vector<16x1280xf32>
    %3 = tpu.matmul %1, %2, %cst {dimension_numbers = #tpu.dot_dimension_numbers<[1], [0], [0], [1], [0, 0, 1, 1], [], []>} : vector<16x320xbf16>, vector<320x1280xbf16>, vector<16x1280xf32> -> vector<16x1280xf32>
    %c0_3 = arith.constant 0 : index
    %c0_4 = arith.constant 0 : index
    %4 = vector.load %arg3[%c0_3, %c0_4] : memref<1x1280xf32, #tpu.memory_space<vmem>>, vector<1x1280xf32>
    %5 = vector.broadcast %4 : vector<1x1280xf32> to vector<16x1280xf32>
    %6 = arith.addf %3, %5 : vector<16x1280xf32>
    %cst_5 = arith.constant 0.000000e+00 : f32
    %7 = vector.broadcast %cst_5 : f32 to vector<16x1280xf32>
    %8 = arith.maximumf %6, %7 : vector<16x1280xf32>
    %9 = arith.truncf %8 : vector<16x1280xf32> to vector<16x1280xbf16>
    %c0_6 = arith.constant 0 : index
    %c0_7 = arith.constant 0 : index
    %10 = vector.load %arg4[%c0_6, %c0_7] : memref<1280x320xbf16, #tpu.memory_space<vmem>>, vector<1280x320xbf16>
    %cst_8 = arith.constant dense<0.000000e+00> : vector<16x320xf32>
    %11 = tpu.matmul %9, %10, %cst_8 {dimension_numbers = #tpu.dot_dimension_numbers<[1], [0], [0], [1], [0, 0, 1, 1], [], []>} : vector<16x1280xbf16>, vector<1280x320xbf16>, vector<16x320xf32> -> vector<16x320xf32>
    %c0_9 = arith.constant 0 : index
    %c0_10 = arith.constant 0 : index
    %12 = vector.load %arg5[%c0_9, %c0_10] : memref<1x320xf32, #tpu.memory_space<vmem>>, vector<1x320xf32>
    %13 = vector.broadcast %12 : vector<1x320xf32> to vector<16x320xf32>
    %14 = arith.addf %11, %13 : vector<16x320xf32>
    %c0_11 = arith.constant 0 : index
    %c0_12 = arith.constant 0 : index
    %15 = vector.load %arg6[%c0_11, %c0_12] : memref<16x320xf32, #tpu.memory_space<vmem>>, vector<16x320xf32>
    tpu.vector_store %arg6[%c0_11, %c0_12], %14 {strides = array<i32>} : memref<16x320xf32, #tpu.memory_space<vmem>>, vector<16x320xf32>,
    return
  }
  func.func @transform_0(%arg0: i32) -> (i32, i32) {
    %c0_i32 = arith.constant 0 : i32
    %c0_i32_0 = arith.constant 0 : i32
    return %arg0, %c0_i32 : i32, i32
  }
  func.func @transform_1(%arg0: i32) -> (i32, i32) {
    %c0_i32 = arith.constant 0 : i32
    %c0_i32_0 = arith.constant 0 : i32
    %c0_i32_1 = arith.constant 0 : i32
    return %c0_i32, %c0_i32_0 : i32, i32
  }
  func.func @transform_2(%arg0: i32) -> (i32, i32) {
    %c0_i32 = arith.constant 0 : i32
    %c0_i32_0 = arith.constant 0 : i32
    %c0_i32_1 = arith.constant 0 : i32
    return %c0_i32, %c0_i32_0 : i32, i32
  }
  func.func @transform_3(%arg0: i32) -> (i32, i32) {
    %c0_i32 = arith.constant 0 : i32
    %c0_i32_0 = arith.constant 0 : i32
    %c0_i32_1 = arith.constant 0 : i32
    return %c0_i32, %c0_i32_0 : i32, i32
  }
  func.func @transform_4(%arg0: i32) -> (i32, i32) {
    %c0_i32 = arith.constant 0 : i32
    %c0_i32_0 = arith.constant 0 : i32
    %c0_i32_1 = arith.constant 0 : i32
    return %c0_i32, %c0_i32_0 : i32, i32
  }
  func.func @transform_5(%arg0: i32) -> (i32, i32) {
    %c0_i32 = arith.constant 0 : i32
    %c0_i32_0 = arith.constant 0 : i32
    return %arg0, %c0_i32 : i32, i32
  }
}

</mosaic_0001>

<bundles_post_ra>
// kernel: tpu_custom_call.1
= control target key start
LH: loop header
LB: loop body
LE: loop exit
PB: predicated region body
PF: predicated region fallthrough
CT: control target
= control target key end

     0   :  { %vm1255_vm0 = vcmask 523264   ;;  %s8866_s0 = inlined_call_operand.vmem [shape: f32[16,320], index: 0, kind: input, shape index: {}]   ;;  %s8867_s1 = inlined_call_operand.vmem [shape: bf16[320,1280], index: 1, kind: input, shape index: {}]   ;;  %s8868_s2 = inlined_call_operand.vmem [shape: f32[1,1280], index: 2, kind: input, shape index: {}]   ;;  %s8869_s3 = inlined_call_operand.vmem [shape: bf16[1280,320], index: 3, kind: input, shape index: {}]   ;;  %s8870_s4 = inlined_call_operand.vmem [shape: f32[1,320], index: 4, kind: input, shape index: {}]   ;;  %s8871_s5 = inlined_call_operand.hbm [shape: f32[16,320], index: 5, kind: output, shape index: {}]  }
   0x1   :  { %v4043_v0 = vld [vmem:[%s8867_s1 + $0x230] sm:$0xf]  ;;  %v5606_v1 = vld [vmem:[%s8867_s1 + $0x254] sm:$0xf0]  ;;  %v5601_v9 = vld [vmem:[%s8867_s1 + $0x234] sm:$0xf] }
   0x2   :  { %v4363_v2 = vld [vmem:[%s8867_s1 + $0x4b0] sm:$0xf]  ;;  %v4044_v3 = vor.u32 %v5606_v1, %v4043_v0  ;;  %v5686_v4 = vld [vmem:[%s8867_s1 + $0x4d4] sm:$0xf0]  ;;  %v4045_v10 = vld [vmem:[%s8867_s1 + $0x258] sm:$0xf0] }
   0x3   :  { %v4523_v5 = vld [vmem:[%s8867_s1 + $0x5f0] sm:$0xf]  ;;  %v5726_v6 = vld [vmem:[%s8867_s1 + $0x614] sm:$0xf0]  ;;  %v4364_v7 = vor.u32 %v5686_v4, %v4363_v2  ;;  %v4003_v11 = vld [vmem:[%s8867_s1 + $0x1e0] sm:$0xf]  ;;  %v4048_v12 = vor.u32 %v5601_v9, %v4045_v10 }
   0x4   :  { %v4524_v8 = vor.u32 %v5726_v6, %v4523_v5  ;;  %1259 = vmatpush.bf16.msra.mxu0 %v4044_v3  ;;  %v5596_v13 = vld [vmem:[%s8867_s1 + $0x204] sm:$0xf0]  ;;  %v4323_v14 = vld [vmem:[%s8867_s1 + $0x460] sm:$0xf]  ;;  %v5591_v20 = vld [vmem:[%s8867_s1 + $0x1e4] sm:$0xf] }
   0x5   :  { %v5676_v15 = vld [vmem:[%s8867_s1 + $0x484] sm:$0xf0]  ;;  %1273 = vmatpush.bf16.msra.mxu1 %v4364_v7  ;;  %v4004_v16 = vor.u32 %v5596_v13, %v4003_v11  ;;  %v4483_v18 = vld [vmem:[%s8867_s1 + $0x5a0] sm:$0xf]  ;;  %1301 = vmatpush.bf16.msra.mxu3 %v4048_v12  ;;  %v4005_v22 = vld [vmem:[%s8867_s1 + $0x208] sm:$0xf0] }
   0x6   :  { %1291 = vmatpush.bf16.msra.mxu2 %v4524_v8  ;;  %v4324_v17 = vor.u32 %v5676_v15, %v4323_v14  ;;  %v5716_v19 = vld [vmem:[%s8867_s1 + $0x5c4] sm:$0xf0]  ;;  %v3963_v23 = vld [vmem:[%s8867_s1 + $0x190] sm:$0xf]  ;;  %v5586_v24 = vld [vmem:[%s8867_s1 + $0x1b4] sm:$0xf0]  ;;  %v4008_v25 = vor.u32 %v5591_v20, %v4005_v22 }
   0x7   :  { %v4484_v21 = vor.u32 %v5716_v19, %v4483_v18  ;;  %v4283_v26 = vld [vmem:[%s8867_s1 + $0x410] sm:$0xf]  ;;  %v5666_v27 = vld [vmem:[%s8867_s1 + $0x434] sm:$0xf0]  ;;  %v3964_v29 = vor.u32 %v5586_v24, %v3963_v23  ;;  %v5581_v31 = vld [vmem:[%s8867_s1 + $0x194] sm:$0xf] }
   0x8   :  { %v4443_v28 = vld [vmem:[%s8867_s1 + $0x550] sm:$0xf]  ;;  %1260 = vmatpush.bf16.msra.mxu0 %v4004_v16  ;;  %v5706_v30 = vld [vmem:[%s8867_s1 + $0x574] sm:$0xf0]  ;;  %v3965_v32 = vld [vmem:[%s8867_s1 + $0x1b8] sm:$0xf0]  ;;  %v4284_v33 = vor.u32 %v5666_v27, %v4283_v26 }
   0x9   :  { %1274 = vmatpush.bf16.msra.mxu1 %v4324_v17  ;;  %v4444_v34 = vor.u32 %v5706_v30, %v4443_v28  ;;  %v3923_v35 = vld [vmem:[%s8867_s1 + $0x140] sm:$0xf]  ;;  %v5576_v36 = vld [vmem:[%s8867_s1 + $0x164] sm:$0xf0]  ;;  %1302 = vmatpush.bf16.msra.mxu3 %v4008_v25  ;;  %v3968_v38 = vor.u32 %v5581_v31, %v3965_v32  ;;  %v5571_v42 = vld [vmem:[%s8867_s1 + $0x144] sm:$0xf] }
   0xa   :  { %1292 = vmatpush.bf16.msra.mxu2 %v4484_v21  ;;  %v4243_v37 = vld [vmem:[%s8867_s1 + $0x3c0] sm:$0xf]  ;;  %v5656_v39 = vld [vmem:[%s8867_s1 + $0x3e4] sm:$0xf0]  ;;  %v3925_v43 = vld [vmem:[%s8867_s1 + $0x168] sm:$0xf0]  ;;  %v3924_v45 = vor.u32 %v5576_v36, %v3923_v35 }
   0xb   :  { %v4403_v40 = vld [vmem:[%s8867_s1 + $0x500] sm:$0xf]  ;;  %v5696_v41 = vld [vmem:[%s8867_s1 + $0x524] sm:$0xf0]  ;;  %v5681_v44 = vld [vmem:[%s8867_s1 + $0x4b4] sm:$0xf]  ;;  %v4244_v47 = vor.u32 %v5656_v39, %v4243_v37  ;;  %v3928_v51 = vor.u32 %v5571_v42, %v3925_v43 }
   0xc   :  { %1261 = vmatpush.bf16.msra.mxu0 %v3964_v29  ;;  %v4365_v46 = vld [vmem:[%s8867_s1 + $0x4d8] sm:$0xf0]  ;;  %v4404_v48 = vor.u32 %v5696_v41, %v4403_v40  ;;  %v3883_v49 = vld [vmem:[%s8867_s1 + $0xf0] sm:$0xf]  ;;  %v5566_v50 = vld [vmem:[%s8867_s1 + $0x114] sm:$0xf0] }
   0xd   :  { %1275 = vmatpush.bf16.msra.mxu1 %v4284_v33  ;;  %1303 = vmatpush.bf16.msra.mxu3 %v3968_v38  ;;  %v4368_v52 = vor.u32 %v5681_v44, %v4365_v46  ;;  %v4203_v53 = vld [vmem:[%s8867_s1 + $0x370] sm:$0xf]  ;;  %v5646_v54 = vld [vmem:[%s8867_s1 + $0x394] sm:$0xf0]  ;;  %v5561_v55 = vld [vmem:[%s8867_s1 + $0xf4] sm:$0xf]  ;;  %v3884_v59 = vor.u32 %v5566_v50, %v3883_v49 }
   0xe   :  { %1293 = vmatpush.bf16.msra.mxu2 %v4444_v34  ;;  %v3885_v56 = vld [vmem:[%s8867_s1 + $0x118] sm:$0xf0]  ;;  %v5671_v57 = vld [vmem:[%s8867_s1 + $0x464] sm:$0xf]  ;;  %v4325_v58 = vld [vmem:[%s8867_s1 + $0x488] sm:$0xf0]  ;;  %v4204_v60 = vor.u32 %v5646_v54, %v4203_v53 }
   0xf   :  { %v3843_v61 = vld [vmem:[%s8867_s1 + $0xa0] sm:$0xf]  ;;  %v5556_v62 = vld [vmem:[%s8867_s1 + $0xc4] sm:$0xf0]  ;;  %v3888_v63 = vor.u32 %v5561_v55, %v3885_v56  ;;  %v4328_v0 = vor.u32 %v5671_v57, %v4325_v58  ;;  %v5551_v3 = vld [vmem:[%s8867_s1 + $0xa4] sm:$0xf] }
  0x10   :  { %1262 = vmatpush.bf16.msra.mxu0 %v3924_v45  ;;  %v4163_v1 = vld [vmem:[%s8867_s1 + $0x320] sm:$0xf]  ;;  %v5636_v2 = vld [vmem:[%s8867_s1 + $0x344] sm:$0xf0]  ;;  %v3845_v4 = vld [vmem:[%s8867_s1 + $0xc8] sm:$0xf0]  ;;  %v3844_v7 = vor.u32 %v5556_v62, %v3843_v61 }
  0x11   :  { %1276 = vmatpush.bf16.msra.mxu1 %v4244_v47  ;;  %1304 = vmatpush.bf16.msra.mxu3 %v3928_v51  ;;  %v5661_v5 = vld [vmem:[%s8867_s1 + $0x414] sm:$0xf]  ;;  %v4285_v6 = vld [vmem:[%s8867_s1 + $0x438] sm:$0xf0]  ;;  %v3803_v8 = vld [vmem:[%s8867_s1 + $0x50] sm:$0xf]  ;;  %v4164_v9 = vor.u32 %v5636_v2, %v4163_v1  ;;  %v3848_v13 = vor.u32 %v5551_v3, %v3845_v4 }
  0x12   :  { %1294 = vmatpush.bf16.msra.mxu2 %v4404_v48  ;;  %v5546_v10 = vld [vmem:[%s8867_s1 + $0x74] sm:$0xf0]  ;;  %v4123_v11 = vld [vmem:[%s8867_s1 + $0x2d0] sm:$0xf]  ;;  %v4288_v14 = vor.u32 %v5661_v5, %v4285_v6  ;;  %v5541_v16 = vld [vmem:[%s8867_s1 + $0x54] sm:$0xf] }
  0x13   :  { %v24_v12 = vld [vmem:[%s8866_s0 + $0x10] sm:$0xff]  ;;  %v5626_v15 = vld [vmem:[%s8867_s1 + $0x2f4] sm:$0xf0]  ;;  %v27_v17 = vld [vmem:[%s8866_s0 + $0x28] sm:$0xff]  ;;  %v3804_v22 = vor.u32 %v5546_v10, %v3803_v8 }
  0x14   :  { %1263 = vmatpush.bf16.msra.mxu0 %v3884_v59  ;;  %v3805_v18 = vld [vmem:[%s8867_s1 + $0x78] sm:$0xf0]  ;;  %v5651_v19 = vld [vmem:[%s8867_s1 + $0x3c4] sm:$0xf]  ;;  %v4245_v20 = vld [vmem:[%s8867_s1 + $0x3e8] sm:$0xf0]  ;;  %v6214_v21 = vpack.c.bf16 %v27_v17, %v24_v12  ;;  %v4124_v26 = vor.u32 %v5626_v15, %v4123_v11 }
  0x15   :  { %1277 = vmatpush.bf16.msra.mxu1 %v4204_v60  ;;  %1305 = vmatpush.bf16.msra.mxu3 %v3888_v63  ;;  %v3763_v23 = vld [vmem:[%s8867_s1] sm:$0xf]  ;;  %v5536_v24 = vld [vmem:[%s8867_s1 + $0x24] sm:$0xf0]  ;;  %v5531_v28 = vld [vmem:[%s8867_s1 + $0x4] sm:$0xf]  ;;  %v3808_v30 = vor.u32 %v5541_v16, %v3805_v18  ;;  %v4248_v31 = vor.u32 %v5651_v19, %v4245_v20 }
  0x16   :  { %1315 = vmatpush.bf16.msrb.mxu2 %v4368_v52  ;;  %v4083_v25 = vld [vmem:[%s8867_s1 + $0x280] sm:$0xf]  ;;  %v5616_v27 = vld [vmem:[%s8867_s1 + $0x2a4] sm:$0xf0]  ;;  %v3765_v29 = vld [vmem:[%s8867_s1 + $0x28] sm:$0xf0]  ;;  %v3764_v38 = vor.u32 %v5536_v24, %v3763_v23 }
  0x17   :  { %4561 = vmatmul.msk.bf16.vlgmr.msra.gmra.mxu2 %vm1255_vm0, %v6214_v21  ;;  %v5641_v32 = vld [vmem:[%s8867_s1 + $0x374] sm:$0xf]  ;;  %v4525_v34 = vld [vmem:[%s8867_s1 + $0x618] sm:$0xf0]  ;;  %v4051_v36 = vld [vmem:[%s8867_s1 + $0x238] sm:$0xf]  ;;  %v4084_v42 = vor.u32 %v5616_v27, %v4083_v25  ;;  %v3768_v47 = vor.u32 %v5531_v28, %v3765_v29 }
  0x18   :  { %1264 = vmatpush.bf16.msra.mxu0 %v3844_v7  ;;  %v5721_v33 = vld [vmem:[%s8867_s1 + $0x5f4] sm:$0xf]  ;;  %v4205_v35 = vld [vmem:[%s8867_s1 + $0x398] sm:$0xf0]  ;;  %v5607_v37 = vld [vmem:[%s8867_s1 + $0x25c] sm:$0xf0] }
  0x19   :  { %1278 = vmatpush.bf16.msra.mxu1 %v4164_v9  ;;  %1306 = vmatpush.bf16.msra.mxu3 %v3848_v13  ;;  %v4371_v39 = vld [vmem:[%s8867_s1 + $0x4b8] sm:$0xf]  ;;  %v5687_v40 = vld [vmem:[%s8867_s1 + $0x4dc] sm:$0xf0]  ;;  %v4528_v43 = vor.u32 %v5721_v33, %v4525_v34  ;;  %v23_v45 = vld [vmem:[%s8866_s0 + $0x8] sm:$0xff]  ;;  %v4208_v48 = vor.u32 %v5641_v32, %v4205_v35  ;;  %v4052_v51 = vor.u32 %v5607_v37, %v4051_v36 }
  0x1a   :  { %1316 = vmatpush.bf16.msrb.mxu2 %v4328_v0  ;;  %v22_v41 = vld [vmem:[%s8866_s0] sm:$0xff]  ;;  %v25_v44 = vld [vmem:[%s8866_s0 + $0x18] sm:$0xff]  ;;  %v4485_v50 = vld [vmem:[%s8867_s1 + $0x5c8] sm:$0xf0]  ;;  %v4372_v52 = vor.u32 %v5687_v40, %v4371_v39 }
  0x1b   :  { %v26_v46 = vld [vmem:[%s8866_s0 + $0x20] sm:$0xff]  ;;  %v4165_v54 = vld [vmem:[%s8867_s1 + $0x348] sm:$0xf0]  ;;  %v4011_v55 = vld [vmem:[%s8867_s1 + $0x1e8] sm:$0xf]  ;;  %v6296_v59 = vpack.c.bf16 %v25_v44, %v22_v41 }
  0x1c   :  { %1265 = vmatpush.bf16.msra.mxu0 %v3804_v22  ;;  %v5711_v49 = vld [vmem:[%s8867_s1 + $0x5a4] sm:$0xf]  ;;  %v5597_v56 = vld [vmem:[%s8867_s1 + $0x20c] sm:$0xf0]  ;;  %v4331_v57 = vld [vmem:[%s8867_s1 + $0x468] sm:$0xf]  ;;  %v6298_v60 = vpack.c.bf16 %v26_v46, %v23_v45 }
  0x1d   :  { %1279 = vmatpush.bf16.msra.mxu1 %v4124_v26  ;;  %1307 = vmatpush.bf16.msra.mxu3 %v3808_v30  ;;  %v5631_v53 = vld [vmem:[%s8867_s1 + $0x324] sm:$0xf]  ;;  %v5677_v58 = vld [vmem:[%s8867_s1 + $0x48c] sm:$0xf0]  ;;  %v4488_v61 = vor.u32 %v5711_v49, %v4485_v50  ;;  %v5701_v63 = vld [vmem:[%s8867_s1 + $0x554] sm:$0xf]  ;;  %v4012_v1 = vor.u32 %v5597_v56, %v4011_v55 }
  0x1e   :  { %1317 = vmatpush.bf16.msrb.mxu2 %v4288_v14  ;;  %v4168_v62 = vor.u32 %v5631_v53, %v4165_v54  ;;  %v4445_v0 = vld [vmem:[%s8867_s1 + $0x578] sm:$0xf0]  ;;  %v4332_v2 = vor.u32 %v5677_v58, %v4331_v57  ;;  %v5621_v3 = vld [vmem:[%s8867_s1 + $0x2d4] sm:$0xf]  ;;  %v3971_v5 = vld [vmem:[%s8867_s1 + $0x198] sm:$0xf] }
  0x1f   :  { %v4125_v4 = vld [vmem:[%s8867_s1 + $0x2f8] sm:$0xf0]  ;;  %v5587_v6 = vld [vmem:[%s8867_s1 + $0x1bc] sm:$0xf0]  ;;  %v4291_v7 = vld [vmem:[%s8867_s1 + $0x418] sm:$0xf]  ;;  %v4448_v9 = vor.u32 %v5701_v63, %v4445_v0 }
  0x20   :  { %1266 = vmatpush.bf16.msra.mxu0 %v3764_v38  ;;  %v5667_v8 = vld [vmem:[%s8867_s1 + $0x43c] sm:$0xf0]  ;;  %v5611_v10 = vld [vmem:[%s8867_s1 + $0x284] sm:$0xf]  ;;  %v4128_v11 = vor.u32 %v5621_v3, %v4125_v4  ;;  %v4085_v12 = vld [vmem:[%s8867_s1 + $0x2a8] sm:$0xf0]  ;;  %v3972_v15 = vor.u32 %v5587_v6, %v3971_v5 }
  0x21   :  { %1280 = vmatpush.bf16.msra.mxu1 %v4084_v42  ;;  %1308 = vmatpush.bf16.msra.mxu3 %v3768_v47  ;;  %v5691_v13 = vld [vmem:[%s8867_s1 + $0x504] sm:$0xf]  ;;  %v4405_v14 = vld [vmem:[%s8867_s1 + $0x528] sm:$0xf0]  ;;  %v4292_v16 = vor.u32 %v5667_v8, %v4291_v7  ;;  %v3931_v17 = vld [vmem:[%s8867_s1 + $0x148] sm:$0xf]  ;;  %v4088_v27 = vor.u32 %v5611_v10, %v4085_v12 }
  0x22   :  { %1318 = vmatpush.bf16.msrb.mxu2 %v4248_v31  ;;  %v4531_v18 = vld [vmem:[%s8867_s1 + $0x5f8] sm:$0xf]  ;;  %v5727_v19 = vld [vmem:[%s8867_s1 + $0x61c] sm:$0xf0]  ;;  %v5577_v20 = vld [vmem:[%s8867_s1 + $0x16c] sm:$0xf0]  ;;  %v4408_v24 = vor.u32 %v5691_v13, %v4405_v14 }
  0x23   :  { %1267 = vmatmul.bf16.vlgmr.msra.gmra.mxu0 %v6296_v59  ;;  %v4251_v22 = vld [vmem:[%s8867_s1 + $0x3c8] sm:$0xf]  ;;  %v5657_v23 = vld [vmem:[%s8867_s1 + $0x3ec] sm:$0xf0]  ;;  %v5602_v25 = vld [vmem:[%s8867_s1 + $0x23c] sm:$0xf]  ;;  %v4532_v28 = vor.u32 %v5727_v19, %v4531_v18  ;;  %v3932_v29 = vor.u32 %v5577_v20, %v3931_v17 }
  0x24   :  { %1333 = vmatpush.bf16.msrb.mxu0 %v4528_v43  ;;  %1281 = vmatmul.bf16.vlgmr.msra.gmra.mxu1 %v6298_v60  ;;  %v4053_v26 = vld [vmem:[%s8867_s1 + $0x260] sm:$0xf0]  ;;  %v4252_v30 = vor.u32 %v5657_v23, %v4251_v22  ;;  %v3891_v31 = vld [vmem:[%s8867_s1 + $0xf8] sm:$0xf]  ;;  %v4491_v32 = vld [vmem:[%s8867_s1 + $0x5a8] sm:$0xf] }
  0x25   :  { %1343 = vmatpush.bf16.msrb.mxu1 %v4052_v51  ;;  %1357 = vmatpush.bf16.msrb.mxu3 %v4372_v52  ;;  %v5717_v33 = vld [vmem:[%s8867_s1 + $0x5cc] sm:$0xf0]  ;;  %v4056_v34 = vor.u32 %v5602_v25, %v4053_v26  ;;  %v5567_v35 = vld [vmem:[%s8867_s1 + $0x11c] sm:$0xf0]  ;;  %v4211_v36 = vld [vmem:[%s8867_s1 + $0x378] sm:$0xf] }
  0x26   :  { %1319 = vmatpush.bf16.msrb.mxu2 %v4208_v48  ;;  %1309 = vmatmul.bf16.vlgmr.msra.gmra.mxu3 %v6296_v59  ;;  %v5647_v37 = vld [vmem:[%s8867_s1 + $0x39c] sm:$0xf0]  ;;  %v5592_v38 = vld [vmem:[%s8867_s1 + $0x1ec] sm:$0xf]  ;;  %v4013_v39 = vld [vmem:[%s8867_s1 + $0x210] sm:$0xf0]  ;;  %v4492_v40 = vor.u32 %v5717_v33, %v4491_v32  ;;  %v3892_v41 = vor.u32 %v5567_v35, %v3891_v31 }
  0x27   :  { %v4212_v42 = vor.u32 %v5647_v37, %v4211_v36  ;;  %v3851_v43 = vld [vmem:[%s8867_s1 + $0xa8] sm:$0xf]  ;;  %v4451_v44 = vld [vmem:[%s8867_s1 + $0x558] sm:$0xf]  ;;  %v5707_v45 = vld [vmem:[%s8867_s1 + $0x57c] sm:$0xf0]  ;;  %v4016_v46 = vor.u32 %v5592_v38, %v4013_v39 }
  0x28   :  { %1334 = vmatpush.bf16.msrb.mxu0 %v4488_v61  ;;  %v5557_v47 = vld [vmem:[%s8867_s1 + $0xcc] sm:$0xf0]  ;;  %v4171_v48 = vld [vmem:[%s8867_s1 + $0x328] sm:$0xf]  ;;  %v5582_v50 = vld [vmem:[%s8867_s1 + $0x19c] sm:$0xf]  ;;  %v4452_v52 = vor.u32 %v5707_v45, %v4451_v44 }
  0x29   :  { %1344 = vmatpush.bf16.msrb.mxu1 %v4012_v1  ;;  %1358 = vmatpush.bf16.msrb.mxu3 %v4332_v2  ;;  %v5637_v49 = vld [vmem:[%s8867_s1 + $0x34c] sm:$0xf0]  ;;  %v3973_v51 = vld [vmem:[%s8867_s1 + $0x1c0] sm:$0xf0]  ;;  %v3811_v53 = vld [vmem:[%s8867_s1 + $0x58] sm:$0xf]  ;;  %v3852_v54 = vor.u32 %v5557_v47, %v3851_v43 }
  0x2a   :  { %1320 = vmatpush.bf16.msrb.mxu2 %v4168_v62  ;;  %v4172_v55 = vor.u32 %v5637_v49, %v4171_v48  ;;  %v5547_v56 = vld [vmem:[%s8867_s1 + $0x7c] sm:$0xf0]  ;;  %v4411_v57 = vld [vmem:[%s8867_s1 + $0x508] sm:$0xf]  ;;  %v5697_v58 = vld [vmem:[%s8867_s1 + $0x52c] sm:$0xf0]  ;;  %v3976_v61 = vor.u32 %v5582_v50, %v3973_v51 }
  0x2b   :  { %v4131_v62 = vld [vmem:[%s8867_s1 + $0x2d8] sm:$0xf]  ;;  %v5627_v63 = vld [vmem:[%s8867_s1 + $0x2fc] sm:$0xf0]  ;;  %v5572_v0 = vld [vmem:[%s8867_s1 + $0x14c] sm:$0xf]  ;;  %v4412_v4 = vor.u32 %v5697_v58, %v4411_v57  ;;  %v3812_v5 = vor.u32 %v5547_v56, %v3811_v53 }
  0x2c   :  { %1335 = vmatpush.bf16.msrb.mxu0 %v4448_v9  ;;  %v3933_v1 = vld [vmem:[%s8867_s1 + $0x170] sm:$0xf0]  ;;  %v5682_v2 = vld [vmem:[%s8867_s1 + $0x4bc] sm:$0xf]  ;;  %v4373_v3 = vld [vmem:[%s8867_s1 + $0x4e0] sm:$0xf0]  ;;  %v4132_v6 = vor.u32 %v5627_v63, %v4131_v62 }
  0x2d   :  { %1345 = vmatpush.bf16.msrb.mxu1 %v3972_v15  ;;  %1359 = vmatpush.bf16.msrb.mxu3 %v4292_v16  ;;  %v3771_v7 = vld [vmem:[%s8867_s1 + $0x8] sm:$0xf]  ;;  %v5537_v8 = vld [vmem:[%s8867_s1 + $0x2c] sm:$0xf0]  ;;  %v3936_v10 = vor.u32 %v5572_v0, %v3933_v1  ;;  %v5562_v13 = vld [vmem:[%s8867_s1 + $0xfc] sm:$0xf] }
  0x2e   :  { %1321 = vmatpush.bf16.msrb.mxu2 %v4128_v11  ;;  %v4091_v9 = vld [vmem:[%s8867_s1 + $0x288] sm:$0xf]  ;;  %v4376_v11 = vor.u32 %v5682_v2, %v4373_v3  ;;  %v5617_v12 = vld [vmem:[%s8867_s1 + $0x2ac] sm:$0xf0]  ;;  %v3893_v14 = vld [vmem:[%s8867_s1 + $0x120] sm:$0xf0]  ;;  %v3772_v22 = vor.u32 %v5537_v8, %v3771_v7 }
  0x2f   :  { %v5722_v15 = vld [vmem:[%s8867_s1 + $0x5fc] sm:$0xf]  ;;  %v4533_v16 = vld [vmem:[%s8867_s1 + $0x620] sm:$0xf0]  ;;  %v4059_v17 = vld [vmem:[%s8867_s1 + $0x240] sm:$0xf]  ;;  %v4092_v23 = vor.u32 %v5617_v12, %v4091_v9 }
  0x30   :  { %1336 = vmatpush.bf16.msrb.mxu0 %v4408_v24  ;;  %v5608_v18 = vld [vmem:[%s8867_s1 + $0x264] sm:$0xf0]  ;;  %v5672_v19 = vld [vmem:[%s8867_s1 + $0x46c] sm:$0xf]  ;;  %v4333_v20 = vld [vmem:[%s8867_s1 + $0x490] sm:$0xf0]  ;;  %v3896_v24 = vor.u32 %v5562_v13, %v3893_v14  ;;  %v4536_v25 = vor.u32 %v5722_v15, %v4533_v16 }
  0x31   :  { %1346 = vmatpush.bf16.msrb.mxu1 %v3932_v29  ;;  %1360 = vmatpush.bf16.msrb.mxu3 %v4252_v30  ;;  %v5552_v26 = vld [vmem:[%s8867_s1 + $0xac] sm:$0xf]  ;;  %v4336_v29 = vor.u32 %v5672_v19, %v4333_v20  ;;  %v4493_v31 = vld [vmem:[%s8867_s1 + $0x5d0] sm:$0xf0]  ;;  %v4019_v32 = vld [vmem:[%s8867_s1 + $0x1f0] sm:$0xf] }
  0x32   :  { %1322 = vmatpush.bf16.msrb.mxu2 %v4088_v27  ;;  %v3853_v27 = vld [vmem:[%s8867_s1 + $0xd0] sm:$0xf0]  ;;  %v5712_v30 = vld [vmem:[%s8867_s1 + $0x5ac] sm:$0xf]  ;;  %v5598_v33 = vld [vmem:[%s8867_s1 + $0x214] sm:$0xf0] }
  0x33   :  { %4562 = vmatmul.msk.bf16.vlgmr.msrb.gmra.mxu0 %vm1255_vm0, %v6214_v21  ;;  %v4293_v35 = vld [vmem:[%s8867_s1 + $0x440] sm:$0xf0]  ;;  %v3856_v36 = vor.u32 %v5552_v26, %v3853_v27  ;;  %v4496_v37 = vor.u32 %v5712_v30, %v4493_v31  ;;  %v5542_v38 = vld [vmem:[%s8867_s1 + $0x5c] sm:$0xf]  ;;  %v3979_v44 = vld [vmem:[%s8867_s1 + $0x1a0] sm:$0xf] }
  0x34   :  { %1375 = vmatpush.bf16.msra.mxu0 %v4532_v28  ;;  %v4060_v28 = vor.u32 %v5608_v18, %v4059_v17  ;;  %v3813_v39 = vld [vmem:[%s8867_s1 + $0x80] sm:$0xf0]  ;;  %v5588_v45 = vld [vmem:[%s8867_s1 + $0x1c4] sm:$0xf0]  ;;  %v4253_v47 = vld [vmem:[%s8867_s1 + $0x3f0] sm:$0xf0] }
  0x35   :  { %1323 = vmatmul.bf16.vlgmr.msrb.gmra.mxu2 %v6298_v60  ;;  %1347 = vmatpush.bf16.msrb.mxu1 %v3892_v41  ;;  %v4453_v43 = vld [vmem:[%s8867_s1 + $0x580] sm:$0xf0]  ;;  %v3816_v48 = vor.u32 %v5542_v38, %v3813_v39  ;;  %v5532_v50 = vld [vmem:[%s8867_s1 + $0xc] sm:$0xf]  ;;  %v3773_v51 = vld [vmem:[%s8867_s1 + $0x30] sm:$0xf0]  ;;  %v3980_v53 = vor.u32 %v5588_v45, %v3979_v44 }
  0x36   :  { %1385 = vmatpush.bf16.msra.mxu2 %v4056_v34  ;;  %1361 = vmatpush.bf16.msrb.mxu3 %v4212_v42  ;;  %v5662_v34 = vld [vmem:[%s8867_s1 + $0x41c] sm:$0xf]  ;;  %v3939_v56 = vld [vmem:[%s8867_s1 + $0x150] sm:$0xf]  ;;  %v5578_v57 = vld [vmem:[%s8867_s1 + $0x174] sm:$0xf0]  ;;  %v3776_v2 = vor.u32 %v5532_v50, %v3773_v51 }
  0x37   :  { %v4296_v41 = vor.u32 %v5662_v34, %v4293_v35  ;;  %v5702_v42 = vld [vmem:[%s8867_s1 + $0x55c] sm:$0xf]  ;;  %v4379_v62 = vld [vmem:[%s8867_s1 + $0x4c0] sm:$0xf]  ;;  %v5688_v63 = vld [vmem:[%s8867_s1 + $0x4e4] sm:$0xf0] }
  0x38   :  { %1376 = vmatpush.bf16.msra.mxu0 %v4492_v40  ;;  %v4020_v40 = vor.u32 %v5598_v33, %v4019_v32  ;;  %v4456_v49 = vor.u32 %v5702_v42, %v4453_v43  ;;  %v5642_v58 = vld [vmem:[%s8867_s1 + $0x37c] sm:$0xf]  ;;  %v4539_v0 = vld [vmem:[%s8867_s1 + $0x600] sm:$0xf]  ;;  %v5728_v1 = vld [vmem:[%s8867_s1 + $0x624] sm:$0xf0]  ;;  %v4380_v8 = vor.u32 %v5688_v63, %v4379_v62 }
  0x39   :  { %1348 = vmatpush.bf16.msrb.mxu1 %v3852_v54  ;;  %v5568_v7 = vld [vmem:[%s8867_s1 + $0x124] sm:$0xf0]  ;;  %v4540_v9 = vor.u32 %v5728_v1, %v4539_v0  ;;  %v4339_v12 = vld [vmem:[%s8867_s1 + $0x470] sm:$0xf]  ;;  %v5678_v13 = vld [vmem:[%s8867_s1 + $0x494] sm:$0xf0] }
  0x3a   :  { %1386 = vmatpush.bf16.msra.mxu2 %v4016_v46  ;;  %1362 = vmatpush.bf16.msrb.mxu3 %v4172_v55  ;;  %v5652_v46 = vld [vmem:[%s8867_s1 + $0x3cc] sm:$0xf]  ;;  %v4413_v55 = vld [vmem:[%s8867_s1 + $0x530] sm:$0xf0]  ;;  %v4499_v14 = vld [vmem:[%s8867_s1 + $0x5b0] sm:$0xf]  ;;  %v4340_v20 = vor.u32 %v5678_v13, %v4339_v12 }
  0x3b   :  { %v4256_v54 = vor.u32 %v5652_v46, %v4253_v47  ;;  %v5718_v15 = vld [vmem:[%s8867_s1 + $0x5d4] sm:$0xf0]  ;;  %v3859_v18 = vld [vmem:[%s8867_s1 + $0xb0] sm:$0xf]  ;;  %v5668_v26 = vld [vmem:[%s8867_s1 + $0x444] sm:$0xf0] }
  0x3c   :  { %1377 = vmatpush.bf16.msra.mxu0 %v4452_v52  ;;  %v5692_v52 = vld [vmem:[%s8867_s1 + $0x50c] sm:$0xf]  ;;  %v5558_v19 = vld [vmem:[%s8867_s1 + $0xd4] sm:$0xf0]  ;;  %v4459_v27 = vld [vmem:[%s8867_s1 + $0x560] sm:$0xf] }
  0x3d   :  { %1349 = vmatpush.bf16.msrb.mxu1 %v3812_v5  ;;  %v4416_v3 = vor.u32 %v5692_v52, %v4413_v55  ;;  %v3819_v31 = vld [vmem:[%s8867_s1 + $0x60] sm:$0xf]  ;;  %v5548_v32 = vld [vmem:[%s8867_s1 + $0x84] sm:$0xf0]  ;;  %v5612_v33 = vld [vmem:[%s8867_s1 + $0x28c] sm:$0xf] }
  0x3e   :  { %1387 = vmatpush.bf16.msra.mxu2 %v3976_v61  ;;  %1363 = vmatpush.bf16.msrb.mxu3 %v4132_v6  ;;  %v4213_v61 = vld [vmem:[%s8867_s1 + $0x3a0] sm:$0xf0]  ;;  %v3899_v6 = vld [vmem:[%s8867_s1 + $0x100] sm:$0xf]  ;;  %v5658_v38 = vld [vmem:[%s8867_s1 + $0x3f4] sm:$0xf0]  ;;  %v3820_v45 = vor.u32 %v5548_v32, %v3819_v31 }
  0x3f   :  { %v4216_v5 = vor.u32 %v5642_v58, %v4213_v61  ;;  %v3900_v16 = vor.u32 %v5568_v7, %v3899_v6  ;;  %v4419_v39 = vld [vmem:[%s8867_s1 + $0x510] sm:$0xf]  ;;  %v4061_v42 = vld [vmem:[%s8867_s1 + $0x268] sm:$0xf0]  ;;  %v5683_v43 = vld [vmem:[%s8867_s1 + $0x4c4] sm:$0xf] }
  0x40   :  { %1378 = vmatpush.bf16.msra.mxu0 %v4412_v4  ;;  %v3940_v4 = vor.u32 %v5578_v57, %v3939_v56  ;;  %v4381_v44 = vld [vmem:[%s8867_s1 + $0x4e8] sm:$0xf0]  ;;  %v3779_v47 = vld [vmem:[%s8867_s1 + $0x10] sm:$0xf]  ;;  %v5538_v50 = vld [vmem:[%s8867_s1 + $0x34] sm:$0xf0] }
  0x41   :  { %1350 = vmatpush.bf16.msrb.mxu1 %v3772_v22  ;;  %v4500_v22 = vor.u32 %v5718_v15, %v4499_v14  ;;  %v4219_v51 = vld [vmem:[%s8867_s1 + $0x380] sm:$0xf]  ;;  %v5648_v52 = vld [vmem:[%s8867_s1 + $0x3a4] sm:$0xf0]  ;;  %v5723_v55 = vld [vmem:[%s8867_s1 + $0x604] sm:$0xf]  ;;  %v3780_v63 = vor.u32 %v5538_v50, %v3779_v47 }
  0x42   :  { %1388 = vmatpush.bf16.msra.mxu2 %v3936_v10  ;;  %1364 = vmatpush.bf16.msrb.mxu3 %v4092_v23  ;;  %v5632_v10 = vld [vmem:[%s8867_s1 + $0x32c] sm:$0xf]  ;;  %v5622_v23 = vld [vmem:[%s8867_s1 + $0x2dc] sm:$0xf]  ;;  %v5593_v57 = vld [vmem:[%s8867_s1 + $0x1f4] sm:$0xf]  ;;  %v4220_v0 = vor.u32 %v5648_v52, %v4219_v51 }
  0x43   :  { %4563 = vmatmul.msk.bf16.vlgmr.msra.gmra.mxu0 %vm1255_vm0, %v6214_v21  ;;  %v4541_v56 = vld [vmem:[%s8867_s1 + $0x628] sm:$0xf0]  ;;  %v4021_v58 = vld [vmem:[%s8867_s1 + $0x218] sm:$0xf0]  ;;  %v5673_v61 = vld [vmem:[%s8867_s1 + $0x474] sm:$0xf] }
  0x44   :  { %1399 = vmatpush.bf16.msrb.mxu0 %v4376_v11  ;;  %1351 = vmatmul.bf16.vlgmr.msrb.gmra.mxu1 %v6296_v59  ;;  %v4173_v11 = vld [vmem:[%s8867_s1 + $0x350] sm:$0xf0]  ;;  %v4341_v62 = vld [vmem:[%s8867_s1 + $0x498] sm:$0xf0]  ;;  %v4544_v1 = vor.u32 %v5723_v55, %v4541_v56 }
  0x45   :  { %1417 = vmatpush.bf16.msra.mxu1 %v4536_v25  ;;  %1365 = vmatmul.bf16.vlgmr.msrb.gmra.mxu3 %v6298_v60  ;;  %v4176_v17 = vor.u32 %v5632_v10, %v4173_v11  ;;  %v4299_v25 = vld [vmem:[%s8867_s1 + $0x420] sm:$0xf]  ;;  %v4344_v6 = vor.u32 %v5673_v61, %v4341_v62  ;;  %v4501_v7 = vld [vmem:[%s8867_s1 + $0x5d8] sm:$0xf0]  ;;  %v5663_v10 = vld [vmem:[%s8867_s1 + $0x424] sm:$0xf] }
  0x46   :  { %1389 = vmatpush.bf16.msra.mxu2 %v3896_v24  ;;  %1427 = vmatpush.bf16.msra.mxu3 %v4060_v28  ;;  %v4133_v24 = vld [vmem:[%s8867_s1 + $0x300] sm:$0xf0]  ;;  %v5708_v28 = vld [vmem:[%s8867_s1 + $0x584] sm:$0xf0]  ;;  %v4300_v34 = vor.u32 %v5668_v26, %v4299_v25  ;;  %v4301_v11 = vld [vmem:[%s8867_s1 + $0x448] sm:$0xf0] }
  0x47   :  { %v4136_v30 = vor.u32 %v5622_v23, %v4133_v24  ;;  %v4460_v35 = vor.u32 %v5708_v28, %v4459_v27 }
  0x48   :  { %1400 = vmatpush.bf16.msrb.mxu0 %v4336_v29  ;;  %v3860_v29 = vor.u32 %v5558_v19, %v3859_v18 }
  0x49   :  { %1418 = vmatpush.bf16.msra.mxu1 %v4496_v37  ;;  %v4259_v37 = vld [vmem:[%s8867_s1 + $0x3d0] sm:$0xf] }
  0x4a   :  { %1390 = vmatpush.bf16.msra.mxu2 %v3856_v36  ;;  %1428 = vmatpush.bf16.msra.mxu3 %v4020_v40  ;;  %v4093_v36 = vld [vmem:[%s8867_s1 + $0x2b0] sm:$0xf0]  ;;  %v5698_v40 = vld [vmem:[%s8867_s1 + $0x534] sm:$0xf0] }
  0x4b   :  { %v4096_v46 = vor.u32 %v5612_v33, %v4093_v36 }
  0x4c   :  { %1401 = vmatpush.bf16.msrb.mxu0 %v4296_v41  ;;  %v5603_v41 = vld [vmem:[%s8867_s1 + $0x244] sm:$0xf] }
  0x4d   :  { %1419 = vmatpush.bf16.msra.mxu1 %v4456_v49  ;;  %v4420_v49 = vor.u32 %v5698_v40, %v4419_v39 }
  0x4e   :  { %1391 = vmatpush.bf16.msra.mxu2 %v3816_v48  ;;  %1429 = vmatpush.bf16.msra.mxu3 %v3980_v53  ;;  %v4260_v48 = vor.u32 %v5658_v38, %v4259_v37  ;;  %v4064_v53 = vor.u32 %v5603_v41, %v4061_v42 }
  0x50   :  { %1402 = vmatpush.bf16.msrb.mxu0 %v4256_v54  ;;  %v4384_v54 = vor.u32 %v5683_v43, %v4381_v44 }
  0x51   :  { %1420 = vmatpush.bf16.msra.mxu1 %v4416_v3  ;;  %v5638_v3 = vld [vmem:[%s8867_s1 + $0x354] sm:$0xf0] }
  0x52   :  { %1392 = vmatpush.bf16.msra.mxu2 %v3776_v2  ;;  %1430 = vmatpush.bf16.msra.mxu3 %v3940_v4  ;;  %v4179_v2 = vld [vmem:[%s8867_s1 + $0x330] sm:$0xf]  ;;  %v5713_v4 = vld [vmem:[%s8867_s1 + $0x5b4] sm:$0xf] }
  0x54   :  { %1403 = vmatpush.bf16.msrb.mxu0 %v4216_v5  ;;  %4564 = vmatmul.msk.bf16.vlgmr.msra.gmra.mxu1 %vm1255_vm0, %v6214_v21  ;;  %v4024_v5 = vor.u32 %v5593_v57, %v4021_v58 }
  0x55   :  { %1441 = vmatpush.bf16.msrb.mxu1 %v4380_v8  ;;  %1393 = vmatmul.bf16.vlgmr.msra.gmra.mxu2 %v6296_v59  ;;  %v5583_v8 = vld [vmem:[%s8867_s1 + $0x1a4] sm:$0xf] }
  0x56   :  { %1459 = vmatpush.bf16.msrb.mxu2 %v4540_v9  ;;  %1431 = vmatpush.bf16.msra.mxu3 %v3900_v16  ;;  %v3981_v9 = vld [vmem:[%s8867_s1 + $0x1c8] sm:$0xf0] }
  0x58   :  { %1404 = vmatpush.bf16.msrb.mxu0 %v4176_v17 }
  0x59   :  { %1442 = vmatpush.bf16.msrb.mxu1 %v4340_v20 }
  0x5a   :  { %1460 = vmatpush.bf16.msrb.mxu2 %v4500_v22  ;;  %1432 = vmatpush.bf16.msra.mxu3 %v3860_v29 }
  0x5c   :  { %1405 = vmatpush.bf16.msrb.mxu0 %v4136_v30 }
  0x5d   :  { %1443 = vmatpush.bf16.msrb.mxu1 %v4300_v34 }
  0x5e   :  { %1461 = vmatpush.bf16.msrb.mxu2 %v4460_v35  ;;  %1433 = vmatpush.bf16.msra.mxu3 %v3820_v45 }
  0x60   :  { %1406 = vmatpush.bf16.msrb.mxu0 %v4096_v46 }
  0x61   :  { %1444 = vmatpush.bf16.msrb.mxu1 %v4260_v48 }
  0x62   :  { %1462 = vmatpush.bf16.msrb.mxu2 %v4420_v49 }
  0x63   :  { %1407 = vmatmul.bf16.vlgmr.msrb.gmra.mxu0 %v6298_v60 }
  0x64   :  { %1469 = vmatpush.bf16.msra.mxu0 %v4064_v53 }
  0x66   :  { %1483 = vmatpush.bf16.msra.mxu2 %v4384_v54 }
  0x67   :  { %10 = vsyncpa [#allocation3], 0  ;;  %1434 = vmatpush.bf16.msra.mxu3 %v3780_v63  ;;  %1445 = vmatpush.bf16.msrb.mxu1 %v4220_v0  ;;  %v4180_v12 = vor.u32 %v5638_v3, %v4179_v2  ;;  %v4504_v13 = vor.u32 %v5713_v4, %v4501_v7  ;;  %v4139_v14 = vld [vmem:[%s8867_s1 + $0x2e0] sm:$0xf]  ;;  %v5628_v15 = vld [vmem:[%s8867_s1 + $0x304] sm:$0xf0]  ;;  %v3984_v16 = vor.u32 %v5583_v8, %v3981_v9 }
  0x68   :  { %1470 = vmatpush.bf16.msra.mxu0 %v4024_v5  ;;  %v4304_v17 = vor.u32 %v5663_v10, %v4301_v11  ;;  %v5703_v18 = vld [vmem:[%s8867_s1 + $0x564] sm:$0xf]  ;;  %v4461_v19 = vld [vmem:[%s8867_s1 + $0x588] sm:$0xf0]  ;;  %v5573_v20 = vld [vmem:[%s8867_s1 + $0x154] sm:$0xf]  ;;  %4565 = vmatmul.msk.bf16.vlgmr.msrb.gmra.mxu2 %vm1255_vm0, %v6214_v21  ;;  %v4140_v25 = vor.u32 %v5628_v15, %v4139_v14 }
  0x69   :  { %v3941_v22 = vld [vmem:[%s8867_s1 + $0x178] sm:$0xf0]  ;;  %v5653_v23 = vld [vmem:[%s8867_s1 + $0x3d4] sm:$0xf]  ;;  %v4464_v26 = vor.u32 %v5703_v18, %v4461_v19  ;;  %v4099_v27 = vld [vmem:[%s8867_s1 + $0x290] sm:$0xf] }
  0x6a   :  { %1484 = vmatpush.bf16.msra.mxu2 %v4344_v6  ;;  %1435 = vmatmul.bf16.vlgmr.msra.gmra.mxu3 %v6296_v59  ;;  %v4261_v24 = vld [vmem:[%s8867_s1 + $0x3f8] sm:$0xf0]  ;;  %v5618_v28 = vld [vmem:[%s8867_s1 + $0x2b4] sm:$0xf0]  ;;  %v5693_v29 = vld [vmem:[%s8867_s1 + $0x514] sm:$0xf]  ;;  %v3944_v30 = vor.u32 %v5573_v20, %v3941_v22 }
  0x6b   :  { %1501 = vmatpush.bf16.msrb.mxu3 %v4544_v1  ;;  %1446 = vmatpush.bf16.msrb.mxu1 %v4180_v12  ;;  %v4264_v31 = vor.u32 %v5653_v23, %v4261_v24  ;;  %v4421_v32 = vld [vmem:[%s8867_s1 + $0x538] sm:$0xf0]  ;;  %v5563_v33 = vld [vmem:[%s8867_s1 + $0x104] sm:$0xf]  ;;  %v3901_v34 = vld [vmem:[%s8867_s1 + $0x128] sm:$0xf0]  ;;  %v4100_v41 = vor.u32 %v5618_v28, %v4099_v27 }
  0x6c   :  { %1471 = vmatpush.bf16.msra.mxu0 %v3984_v16  ;;  %v5643_v35 = vld [vmem:[%s8867_s1 + $0x384] sm:$0xf]  ;;  %v4221_v36 = vld [vmem:[%s8867_s1 + $0x3a8] sm:$0xf0]  ;;  %v4067_v37 = vld [vmem:[%s8867_s1 + $0x248] sm:$0xf]  ;;  %v4424_v42 = vor.u32 %v5693_v29, %v4421_v32  ;;  %v3904_v43 = vor.u32 %v5563_v33, %v3901_v34 }
  0x6d   :  { %v5609_v38 = vld [vmem:[%s8867_s1 + $0x26c] sm:$0xf0]  ;;  %v4387_v39 = vld [vmem:[%s8867_s1 + $0x4c8] sm:$0xf]  ;;  %v4224_v44 = vor.u32 %v5643_v35, %v4221_v36  ;;  %v5553_v45 = vld [vmem:[%s8867_s1 + $0xb4] sm:$0xf] }
  0x6e   :  { %1485 = vmatpush.bf16.msra.mxu2 %v4304_v17  ;;  %v5689_v40 = vld [vmem:[%s8867_s1 + $0x4ec] sm:$0xf0]  ;;  %v3861_v46 = vld [vmem:[%s8867_s1 + $0xd8] sm:$0xf0]  ;;  %v4068_v47 = vor.u32 %v5609_v38, %v4067_v37  ;;  %v5633_v49 = vld [vmem:[%s8867_s1 + $0x334] sm:$0xf] }
  0x6f   :  { %1502 = vmatpush.bf16.msrb.mxu3 %v4504_v13  ;;  %1447 = vmatpush.bf16.msrb.mxu1 %v4140_v25  ;;  %v4388_v48 = vor.u32 %v5689_v40, %v4387_v39  ;;  %v4181_v50 = vld [vmem:[%s8867_s1 + $0x358] sm:$0xf0]  ;;  %v4027_v51 = vld [vmem:[%s8867_s1 + $0x1f8] sm:$0xf]  ;;  %v5599_v52 = vld [vmem:[%s8867_s1 + $0x21c] sm:$0xf0]  ;;  %v3864_v55 = vor.u32 %v5553_v45, %v3861_v46 }
  0x70   :  { %1472 = vmatpush.bf16.msra.mxu0 %v3944_v30  ;;  %v4347_v53 = vld [vmem:[%s8867_s1 + $0x478] sm:$0xf]  ;;  %v5679_v54 = vld [vmem:[%s8867_s1 + $0x49c] sm:$0xf0]  ;;  %v4184_v56 = vor.u32 %v5633_v49, %v4181_v50  ;;  %v5543_v57 = vld [vmem:[%s8867_s1 + $0x64] sm:$0xf]  ;;  %v4028_v61 = vor.u32 %v5599_v52, %v4027_v51 }
  0x71   :  { %v3821_v58 = vld [vmem:[%s8867_s1 + $0x88] sm:$0xf0]  ;;  %v4348_v62 = vor.u32 %v5679_v54, %v4347_v53  ;;  %v5623_v63 = vld [vmem:[%s8867_s1 + $0x2e4] sm:$0xf]  ;;  %v3987_v1 = vld [vmem:[%s8867_s1 + $0x1a8] sm:$0xf] }
  0x72   :  { %1486 = vmatpush.bf16.msra.mxu2 %v4264_v31  ;;  %v4141_v0 = vld [vmem:[%s8867_s1 + $0x308] sm:$0xf0]  ;;  %v5589_v2 = vld [vmem:[%s8867_s1 + $0x1cc] sm:$0xf0]  ;;  %v4307_v3 = vld [vmem:[%s8867_s1 + $0x428] sm:$0xf]  ;;  %v3824_v5 = vor.u32 %v5543_v57, %v3821_v58 }
  0x73   :  { %1503 = vmatpush.bf16.msrb.mxu3 %v4464_v26  ;;  %1448 = vmatpush.bf16.msrb.mxu1 %v4100_v41  ;;  %v5669_v4 = vld [vmem:[%s8867_s1 + $0x44c] sm:$0xf0]  ;;  %v4144_v6 = vor.u32 %v5623_v63, %v4141_v0  ;;  %v5533_v7 = vld [vmem:[%s8867_s1 + $0x14] sm:$0xf]  ;;  %v3781_v8 = vld [vmem:[%s8867_s1 + $0x38] sm:$0xf0]  ;;  %v3988_v10 = vor.u32 %v5589_v2, %v3987_v1 }
  0x74   :  { %1473 = vmatpush.bf16.msra.mxu0 %v3904_v43  ;;  %v5613_v9 = vld [vmem:[%s8867_s1 + $0x294] sm:$0xf]  ;;  %v4308_v11 = vor.u32 %v5669_v4, %v4307_v3  ;;  %v4101_v12 = vld [vmem:[%s8867_s1 + $0x2b8] sm:$0xf0]  ;;  %v3947_v13 = vld [vmem:[%s8867_s1 + $0x158] sm:$0xf]  ;;  %v3784_v22 = vor.u32 %v5533_v7, %v3781_v8 }
  0x75   :  { %v5579_v14 = vld [vmem:[%s8867_s1 + $0x17c] sm:$0xf0]  ;;  %v4267_v15 = vld [vmem:[%s8867_s1 + $0x3d8] sm:$0xf]  ;;  %v4547_v17 = vld [vmem:[%s8867_s1 + $0x608] sm:$0xf]  ;;  %v4104_v23 = vor.u32 %v5613_v9, %v4101_v12 }
  0x76   :  { %1487 = vmatpush.bf16.msra.mxu2 %v4224_v44  ;;  %1449 = vmatmul.bf16.vlgmr.msrb.gmra.mxu1 %v6298_v60  ;;  %v5659_v16 = vld [vmem:[%s8867_s1 + $0x3fc] sm:$0xf0]  ;;  %v5729_v18 = vld [vmem:[%s8867_s1 + $0x62c] sm:$0xf0]  ;;  %v5604_v19 = vld [vmem:[%s8867_s1 + $0x24c] sm:$0xf]  ;;  %v3948_v24 = vor.u32 %v5579_v14, %v3947_v13 }
  0x77   :  { %1504 = vmatpush.bf16.msrb.mxu3 %v4424_v42  ;;  %1511 = vmatpush.bf16.msra.mxu1 %v4068_v47  ;;  %v4069_v20 = vld [vmem:[%s8867_s1 + $0x270] sm:$0xf0]  ;;  %v4268_v25 = vor.u32 %v5659_v16, %v4267_v15  ;;  %v3907_v26 = vld [vmem:[%s8867_s1 + $0x108] sm:$0xf]  ;;  %v5569_v27 = vld [vmem:[%s8867_s1 + $0x12c] sm:$0xf0]  ;;  %v4548_v28 = vor.u32 %v5729_v18, %v4547_v17 }
  0x78   :  { %1474 = vmatpush.bf16.msra.mxu0 %v3864_v55  ;;  %v4072_v29 = vor.u32 %v5604_v19, %v4069_v20  ;;  %v4227_v30 = vld [vmem:[%s8867_s1 + $0x388] sm:$0xf]  ;;  %v5649_v31 = vld [vmem:[%s8867_s1 + $0x3ac] sm:$0xf0]  ;;  %v4507_v32 = vld [vmem:[%s8867_s1 + $0x5b8] sm:$0xf]  ;;  %v3908_v36 = vor.u32 %v5569_v27, %v3907_v26 }
  0x79   :  { %v5719_v33 = vld [vmem:[%s8867_s1 + $0x5dc] sm:$0xf0]  ;;  %v5594_v34 = vld [vmem:[%s8867_s1 + $0x1fc] sm:$0xf]  ;;  %v4029_v35 = vld [vmem:[%s8867_s1 + $0x220] sm:$0xf0]  ;;  %v4228_v37 = vor.u32 %v5649_v31, %v4227_v30 }
  0x7a   :  { %1488 = vmatpush.bf16.msra.mxu2 %v4184_v56  ;;  %4566 = vmatmul.msk.bf16.vlgmr.msrb.gmra.mxu3 %vm1255_vm0, %v6214_v21  ;;  %v3867_v38 = vld [vmem:[%s8867_s1 + $0xb8] sm:$0xf]  ;;  %v5559_v39 = vld [vmem:[%s8867_s1 + $0xdc] sm:$0xf0]  ;;  %v4508_v40 = vor.u32 %v5719_v33, %v4507_v32  ;;  %v4032_v41 = vor.u32 %v5594_v34, %v4029_v35  ;;  %v4467_v44 = vld [vmem:[%s8867_s1 + $0x568] sm:$0xf] }
  0x7b   :  { %1525 = vmatpush.bf16.msra.mxu3 %v4388_v48  ;;  %1512 = vmatpush.bf16.msra.mxu1 %v4028_v61  ;;  %v4187_v42 = vld [vmem:[%s8867_s1 + $0x338] sm:$0xf]  ;;  %v5639_v43 = vld [vmem:[%s8867_s1 + $0x35c] sm:$0xf0]  ;;  %v5709_v45 = vld [vmem:[%s8867_s1 + $0x58c] sm:$0xf0]  ;;  %v3868_v48 = vor.u32 %v5559_v39, %v3867_v38 }
  0x7c   :  { %1475 = vmatpush.bf16.msra.mxu0 %v3824_v5  ;;  %v5584_v46 = vld [vmem:[%s8867_s1 + $0x1ac] sm:$0xf]  ;;  %v3989_v47 = vld [vmem:[%s8867_s1 + $0x1d0] sm:$0xf0]  ;;  %v4188_v49 = vor.u32 %v5639_v43, %v4187_v42  ;;  %v3827_v50 = vld [vmem:[%s8867_s1 + $0x68] sm:$0xf]  ;;  %v4468_v52 = vor.u32 %v5709_v45, %v4467_v44 }
  0x7d   :  { %v5549_v51 = vld [vmem:[%s8867_s1 + $0x8c] sm:$0xf0]  ;;  %v3992_v53 = vor.u32 %v5584_v46, %v3989_v47  ;;  %v4147_v54 = vld [vmem:[%s8867_s1 + $0x2e8] sm:$0xf]  ;;  %v4427_v56 = vld [vmem:[%s8867_s1 + $0x518] sm:$0xf] }
  0x7e   :  { %1489 = vmatpush.bf16.msra.mxu2 %v4144_v6  ;;  %v5629_v55 = vld [vmem:[%s8867_s1 + $0x30c] sm:$0xf0]  ;;  %v5699_v57 = vld [vmem:[%s8867_s1 + $0x53c] sm:$0xf0]  ;;  %v5574_v58 = vld [vmem:[%s8867_s1 + $0x15c] sm:$0xf]  ;;  %v3828_v0 = vor.u32 %v5549_v51, %v3827_v50 }
  0x7f   :  { %1526 = vmatpush.bf16.msra.mxu3 %v4348_v62  ;;  %1513 = vmatpush.bf16.msra.mxu1 %v3988_v10  ;;  %v3949_v61 = vld [vmem:[%s8867_s1 + $0x180] sm:$0xf0]  ;;  %v5684_v62 = vld [vmem:[%s8867_s1 + $0x4cc] sm:$0xf]  ;;  %v4389_v63 = vld [vmem:[%s8867_s1 + $0x4f0] sm:$0xf0]  ;;  %v4148_v1 = vor.u32 %v5629_v55, %v4147_v54  ;;  %v4428_v5 = vor.u32 %v5699_v57, %v4427_v56 }
  0x80   :  { %1476 = vmatpush.bf16.msra.mxu0 %v3784_v22  ;;  %v3787_v2 = vld [vmem:[%s8867_s1 + $0x18] sm:$0xf]  ;;  %v5539_v3 = vld [vmem:[%s8867_s1 + $0x3c] sm:$0xf0]  ;;  %v3952_v6 = vor.u32 %v5574_v58, %v3949_v61  ;;  %v5564_v8 = vld [vmem:[%s8867_s1 + $0x10c] sm:$0xf]  ;;  %v4392_v10 = vor.u32 %v5684_v62, %v4389_v63 }
  0x81   :  { %v4107_v4 = vld [vmem:[%s8867_s1 + $0x298] sm:$0xf]  ;;  %v5619_v7 = vld [vmem:[%s8867_s1 + $0x2bc] sm:$0xf0]  ;;  %v3909_v9 = vld [vmem:[%s8867_s1 + $0x130] sm:$0xf0]  ;;  %v3788_v17 = vor.u32 %v5539_v3, %v3787_v2 }
  0x82   :  { %1490 = vmatpush.bf16.msra.mxu2 %v4104_v23  ;;  %v4549_v12 = vld [vmem:[%s8867_s1 + $0x630] sm:$0xf0]  ;;  %v4075_v13 = vld [vmem:[%s8867_s1 + $0x250] sm:$0xf]  ;;  %v5610_v14 = vld [vmem:[%s8867_s1 + $0x274] sm:$0xf0]  ;;  %v4108_v18 = vor.u32 %v5619_v7, %v4107_v4  ;;  %v3912_v19 = vor.u32 %v5564_v8, %v3909_v9 }
  0x83   :  { %1527 = vmatpush.bf16.msra.mxu3 %v4308_v11  ;;  %1514 = vmatpush.bf16.msra.mxu1 %v3948_v24  ;;  %v5724_v11 = vld [vmem:[%s8867_s1 + $0x60c] sm:$0xf]  ;;  %v5674_v15 = vld [vmem:[%s8867_s1 + $0x47c] sm:$0xf]  ;;  %v4349_v16 = vld [vmem:[%s8867_s1 + $0x4a0] sm:$0xf0]  ;;  %v4076_v24 = vor.u32 %v5610_v14, %v4075_v13 }
  0x84   :  { %1543 = vmatpush.bf16.msrb.mxu0 %v4548_v28  ;;  %v4552_v20 = vor.u32 %v5724_v11, %v4549_v12  ;;  %v5554_v22 = vld [vmem:[%s8867_s1 + $0xbc] sm:$0xf]  ;;  %v3869_v23 = vld [vmem:[%s8867_s1 + $0xe0] sm:$0xf0]  ;;  %v4035_v28 = vld [vmem:[%s8867_s1 + $0x200] sm:$0xf] }
  0x85   :  { %1491 = vmatmul.bf16.vlgmr.msra.gmra.mxu2 %v6298_v60  ;;  %1477 = vmatmul.bf16.vlgmr.msra.gmra.mxu0 %v6296_v59  ;;  %v5714_v26 = vld [vmem:[%s8867_s1 + $0x5bc] sm:$0xf]  ;;  %v4509_v27 = vld [vmem:[%s8867_s1 + $0x5e0] sm:$0xf0]  ;;  %v5664_v30 = vld [vmem:[%s8867_s1 + $0x42c] sm:$0xf]  ;;  %v3872_v32 = vor.u32 %v5554_v22, %v3869_v23 }
  0x86   :  { %1553 = vmatpush.bf16.msrb.mxu2 %v4072_v29  ;;  %v5600_v29 = vld [vmem:[%s8867_s1 + $0x224] sm:$0xf0]  ;;  %v4309_v31 = vld [vmem:[%s8867_s1 + $0x450] sm:$0xf0]  ;;  %v4512_v33 = vor.u32 %v5714_v26, %v4509_v27  ;;  %v5544_v34 = vld [vmem:[%s8867_s1 + $0x6c] sm:$0xf] }
  0x87   :  { %1528 = vmatpush.bf16.msra.mxu3 %v4268_v25  ;;  %1515 = vmatpush.bf16.msra.mxu1 %v3908_v36  ;;  %v4352_v25 = vor.u32 %v5674_v15, %v4349_v16  ;;  %v3829_v35 = vld [vmem:[%s8867_s1 + $0x90] sm:$0xf0]  ;;  %v4036_v36 = vor.u32 %v5600_v29, %v4035_v28  ;;  %v5704_v38 = vld [vmem:[%s8867_s1 + $0x56c] sm:$0xf]  ;;  %v5654_v42 = vld [vmem:[%s8867_s1 + $0x3dc] sm:$0xf] }
  0x88   :  { %1544 = vmatpush.bf16.msrb.mxu0 %v4508_v40  ;;  %v4469_v39 = vld [vmem:[%s8867_s1 + $0x590] sm:$0xf0]  ;;  %v3995_v40 = vld [vmem:[%s8867_s1 + $0x1b0] sm:$0xf]  ;;  %v4269_v43 = vld [vmem:[%s8867_s1 + $0x400] sm:$0xf0]  ;;  %v3832_v44 = vor.u32 %v5544_v34, %v3829_v35 }
  0x89   :  { %v4472_v45 = vor.u32 %v5704_v38, %v4469_v39  ;;  %v5534_v46 = vld [vmem:[%s8867_s1 + $0x1c] sm:$0xf]  ;;  %v3789_v47 = vld [vmem:[%s8867_s1 + $0x40] sm:$0xf0]  ;;  %v4272_v50 = vor.u32 %v5654_v42, %v4269_v43  ;;  %v5644_v54 = vld [vmem:[%s8867_s1 + $0x38c] sm:$0xf] }
  0x8a   :  { %1554 = vmatpush.bf16.msrb.mxu2 %v4032_v41  ;;  %v5590_v41 = vld [vmem:[%s8867_s1 + $0x1d4] sm:$0xf0]  ;;  %v4429_v51 = vld [vmem:[%s8867_s1 + $0x540] sm:$0xf0]  ;;  %v4229_v55 = vld [vmem:[%s8867_s1 + $0x3b0] sm:$0xf0]  ;;  %v3792_v62 = vor.u32 %v5534_v46, %v3789_v47 }
  0x8b   :  { %1529 = vmatpush.bf16.msra.mxu3 %v4228_v37  ;;  %1516 = vmatpush.bf16.msra.mxu1 %v3868_v48  ;;  %v4312_v37 = vor.u32 %v5664_v30, %v4309_v31  ;;  %v5694_v48 = vld [vmem:[%s8867_s1 + $0x51c] sm:$0xf]  ;;  %v4395_v56 = vld [vmem:[%s8867_s1 + $0x4d0] sm:$0xf]  ;;  %v5690_v57 = vld [vmem:[%s8867_s1 + $0x4f4] sm:$0xf0] }
  0x8c   :  { %1545 = vmatpush.bf16.msrb.mxu0 %v4468_v52  ;;  %v3955_v52 = vld [vmem:[%s8867_s1 + $0x160] sm:$0xf]  ;;  %v4555_v58 = vld [vmem:[%s8867_s1 + $0x610] sm:$0xf]  ;;  %v5730_v61 = vld [vmem:[%s8867_s1 + $0x634] sm:$0xf0]  ;;  %v4432_v63 = vor.u32 %v5694_v48, %v4429_v51  ;;  %v4396_v4 = vor.u32 %v5690_v57, %v4395_v56 }
  0x8d   :  { %v3915_v2 = vld [vmem:[%s8867_s1 + $0x110] sm:$0xf]  ;;  %v5570_v3 = vld [vmem:[%s8867_s1 + $0x134] sm:$0xf0]  ;;  %v4189_v7 = vld [vmem:[%s8867_s1 + $0x360] sm:$0xf0] }
  0x8e   :  { %1555 = vmatpush.bf16.msrb.mxu2 %v3992_v53  ;;  %v5580_v53 = vld [vmem:[%s8867_s1 + $0x184] sm:$0xf0]  ;;  %v4355_v8 = vld [vmem:[%s8867_s1 + $0x480] sm:$0xf]  ;;  %v3916_v12 = vor.u32 %v5570_v3, %v3915_v2  ;;  %v5670_v22 = vld [vmem:[%s8867_s1 + $0x454] sm:$0xf0] }
  0x8f   :  { %1530 = vmatpush.bf16.msra.mxu3 %v4188_v49  ;;  %1517 = vmatpush.bf16.msra.mxu1 %v3828_v0  ;;  %v3996_v49 = vor.u32 %v5590_v41, %v3995_v40  ;;  %v3956_v0 = vor.u32 %v5580_v53, %v3955_v52  ;;  %v5680_v9 = vld [vmem:[%s8867_s1 + $0x4a4] sm:$0xf0]  ;;  %v3875_v14 = vld [vmem:[%s8867_s1 + $0xc0] sm:$0xf]  ;;  %v4475_v23 = vld [vmem:[%s8867_s1 + $0x570] sm:$0xf] }
  0x90   :  { %1546 = vmatpush.bf16.msrb.mxu0 %v4428_v5  ;;  %v4556_v5 = vor.u32 %v5730_v61, %v4555_v58  ;;  %v5720_v11 = vld [vmem:[%s8867_s1 + $0x5e4] sm:$0xf0]  ;;  %v4356_v16 = vor.u32 %v5680_v9, %v4355_v8  ;;  %v3835_v27 = vld [vmem:[%s8867_s1 + $0x70] sm:$0xf]  ;;  %v5550_v28 = vld [vmem:[%s8867_s1 + $0x94] sm:$0xf0] }
  0x91   :  { %v5560_v15 = vld [vmem:[%s8867_s1 + $0xe4] sm:$0xf0]  ;;  %v5614_v29 = vld [vmem:[%s8867_s1 + $0x29c] sm:$0xf]  ;;  %v4435_v35 = vld [vmem:[%s8867_s1 + $0x520] sm:$0xf]  ;;  %v3836_v41 = vor.u32 %v5550_v28, %v3835_v27 }
  0x92   :  { %1556 = vmatpush.bf16.msrb.mxu2 %v3952_v6  ;;  %v5634_v6 = vld [vmem:[%s8867_s1 + $0x33c] sm:$0xf]  ;;  %v5660_v34 = vld [vmem:[%s8867_s1 + $0x404] sm:$0xf0]  ;;  %v5685_v39 = vld [vmem:[%s8867_s1 + $0x4d4] sm:$0xf] }
  0x93   :  { %1531 = vmatpush.bf16.msra.mxu3 %v4148_v1  ;;  %1518 = vmatpush.bf16.msra.mxu1 %v3788_v17  ;;  %v4232_v1 = vor.u32 %v5644_v54, %v4229_v55  ;;  %v4192_v13 = vor.u32 %v5634_v6, %v4189_v7  ;;  %v4077_v38 = vld [vmem:[%s8867_s1 + $0x278] sm:$0xf0]  ;;  %v3795_v43 = vld [vmem:[%s8867_s1 + $0x20] sm:$0xf]  ;;  %v5540_v46 = vld [vmem:[%s8867_s1 + $0x44] sm:$0xf0] }
  0x94   :  { %1567 = vmatpush.bf16.msra.mxu0 %v4392_v10  ;;  %v4515_v10 = vld [vmem:[%s8867_s1 + $0x5c0] sm:$0xf]  ;;  %v4397_v40 = vld [vmem:[%s8867_s1 + $0x4f8] sm:$0xf0]  ;;  %v4235_v47 = vld [vmem:[%s8867_s1 + $0x390] sm:$0xf]  ;;  %v3796_v58 = vor.u32 %v5540_v46, %v3795_v43 }
  0x95   :  { %4567 = vmatmul.msk.bf16.vlgmr.msrb.gmra.mxu0 %vm1255_vm0, %v6214_v21  ;;  %v4516_v17 = vor.u32 %v5720_v11, %v4515_v10  ;;  %v5650_v48 = vld [vmem:[%s8867_s1 + $0x3b4] sm:$0xf0]  ;;  %v5725_v51 = vld [vmem:[%s8867_s1 + $0x614] sm:$0xf]  ;;  %v4557_v52 = vld [vmem:[%s8867_s1 + $0x638] sm:$0xf0] }
  0x96   :  { %1557 = vmatpush.bf16.msrb.mxu2 %v3912_v19  ;;  %1519 = vmatmul.bf16.vlgmr.msra.gmra.mxu1 %v6296_v59  ;;  %v4149_v19 = vld [vmem:[%s8867_s1 + $0x310] sm:$0xf0]  ;;  %v5595_v53 = vld [vmem:[%s8867_s1 + $0x204] sm:$0xf]  ;;  %v4037_v54 = vld [vmem:[%s8867_s1 + $0x228] sm:$0xf0]  ;;  %v4236_v61 = vor.u32 %v5650_v48, %v4235_v47 }
  0x97   :  { %1532 = vmatpush.bf16.msra.mxu3 %v4108_v18  ;;  %1585 = vmatpush.bf16.msrb.mxu1 %v4552_v20  ;;  %v5624_v18 = vld [vmem:[%s8867_s1 + $0x2ec] sm:$0xf]  ;;  %v4315_v20 = vld [vmem:[%s8867_s1 + $0x430] sm:$0xf]  ;;  %v5675_v55 = vld [vmem:[%s8867_s1 + $0x484] sm:$0xf] }
  0x98   :  { %1568 = vmatpush.bf16.msra.mxu0 %v4352_v25  ;;  %v3876_v25 = vor.u32 %v5560_v15, %v3875_v14  ;;  %v4152_v26 = vor.u32 %v5624_v18, %v4149_v19  ;;  %v4316_v30 = vor.u32 %v5670_v22, %v4315_v20  ;;  %v4357_v56 = vld [vmem:[%s8867_s1 + $0x4a8] sm:$0xf0]  ;;  %v5715_v3 = vld [vmem:[%s8867_s1 + $0x5c4] sm:$0xf]  ;;  %v3997_v7 = vld [vmem:[%s8867_s1 + $0x1d8] sm:$0xf0] }
  0x99   :  { %v4360_v2 = vor.u32 %v5675_v55, %v4357_v56  ;;  %v5665_v8 = vld [vmem:[%s8867_s1 + $0x434] sm:$0xf]  ;;  %v4317_v9 = vld [vmem:[%s8867_s1 + $0x458] sm:$0xf0]  ;;  %v5575_v18 = vld [vmem:[%s8867_s1 + $0x164] sm:$0xf] }
  0x9a   :  { %1533 = vmatmul.bf16.vlgmr.msra.gmra.mxu3 %v6298_v60  ;;  %1558 = vmatpush.bf16.msrb.mxu2 %v3872_v32  ;;  %v4109_v32 = vld [vmem:[%s8867_s1 + $0x2c0] sm:$0xf0]  ;;  %v7199_v6 = vpop.f32.mrf.mxu2  ;;  %v4320_v15 = vor.u32 %v5665_v8, %v4317_v9  ;;  %v3957_v19 = vld [vmem:[%s8867_s1 + $0x188] sm:$0xf0]  ;;  %v5620_v27 = vld [vmem:[%s8867_s1 + $0x2c4] sm:$0xf0] }
  0x9b   :  { %1595 = vmatpush.bf16.msrb.mxu3 %v4076_v24  ;;  %1586 = vmatpush.bf16.msrb.mxu1 %v4512_v33  ;;  %v5710_v24 = vld [vmem:[%s8867_s1 + $0x594] sm:$0xf0]  ;;  %v4275_v33 = vld [vmem:[%s8867_s1 + $0x3e0] sm:$0xf]  ;;  %v4112_v42 = vor.u32 %v5614_v29, %v4109_v32  ;;  %v5655_v20 = vld [vmem:[%s8867_s1 + $0x3e4] sm:$0xf]  ;;  %v3960_v29 = vor.u32 %v5575_v18, %v3957_v19 }
  0x9c   :  { %1569 = vmatpush.bf16.msra.mxu0 %v4312_v37  ;;  %v4476_v31 = vor.u32 %v5710_v24, %v4475_v23  ;;  %v5605_v37 = vld [vmem:[%s8867_s1 + $0x254] sm:$0xf]  ;;  %v4277_v22 = vld [vmem:[%s8867_s1 + $0x408] sm:$0xf0]  ;;  %v5695_v28 = vld [vmem:[%s8867_s1 + $0x524] sm:$0xf] }
  0x9d   :  { %v5565_v32 = vld [vmem:[%s8867_s1 + $0x114] sm:$0xf]  ;;  %v5555_v46 = vld [vmem:[%s8867_s1 + $0xc4] sm:$0xf]  ;;  %v3877_v47 = vld [vmem:[%s8867_s1 + $0xe8] sm:$0xf0] }
  0x9e   :  { %1559 = vmatpush.bf16.msrb.mxu2 %v3832_v44  ;;  %v4276_v44 = vor.u32 %v5660_v34, %v4275_v33  ;;  %v3917_v33 = vld [vmem:[%s8867_s1 + $0x138] sm:$0xf0]  ;;  %v5645_v34 = vld [vmem:[%s8867_s1 + $0x394] sm:$0xf]  ;;  %v4729_v8 = vld [vmem:[%s8869_s3 + $0x138] sm:$0xf] }
  0x9f   :  { %1596 = vmatpush.bf16.msrb.mxu3 %v4036_v36  ;;  %1587 = vmatpush.bf16.msrb.mxu1 %v4472_v45  ;;  %v5700_v36 = vld [vmem:[%s8867_s1 + $0x544] sm:$0xf0]  ;;  %v5774_v55 = vld [vmem:[%s8869_s3 + $0x158] sm:$0xf0]  ;;  %v5771_v9 = vld [vmem:[%s8869_s3 + $0x140] sm:$0xf0] }
  0xa0   :  { %1570 = vmatpush.bf16.msra.mxu0 %v4272_v50  ;;  %v4436_v45 = vor.u32 %v5700_v36, %v4435_v35  ;;  %v4400_v50 = vor.u32 %v5685_v39, %v4397_v40  ;;  %v7181_v57 = vpop.f32.mrf.mxu0  ;;  %v4237_v35 = vld [vmem:[%s8867_s1 + $0x3b8] sm:$0xf0]  ;;  %v4657_v36 = vld [vmem:[%s8869_s3 + $0xa8] sm:$0xf]  ;;  %v5777_v40 = vld [vmem:[%s8869_s3 + $0x170] sm:$0xf0]  ;;  %v4730_v19 = vor.u32 %v5771_v9, %v4729_v8 }
  0xa1   :  { %v4753_v39 = vld [vmem:[%s8869_s3 + $0x168] sm:$0xf]  ;;  %s6002_s12 = smov 384   ;;  %s6003_s13 = smov 24  }
  0xa2   :  { %1560 = vmatpush.bf16.msrb.mxu2 %v3792_v62  ;;  %v4560_v62 = vor.u32 %v5725_v51, %v4557_v52  ;;  %v4197_v51 = vld [vmem:[%s8867_s1 + $0x368] sm:$0xf0]  ;;  %v4645_v52 = vld [vmem:[%s8869_s3 + $0x90] sm:$0xf] }
  0xa3   :  { %1597 = vmatpush.bf16.msrb.mxu3 %v3996_v49  ;;  %1588 = vmatpush.bf16.msrb.mxu1 %v4432_v63  ;;  %v4080_v49 = vor.u32 %v5605_v37, %v4077_v38  ;;  %v4195_v63 = vld [vmem:[%s8867_s1 + $0x340] sm:$0xf]  ;;  %v7266_v37 = vpop.f32.mrf.mxu1  ;;  %v5753_v38 = vld [vmem:[%s8869_s3 + $0xb0] sm:$0xf0] }
  0xa4   :  { %1571 = vmatpush.bf16.msra.mxu0 %v4232_v1  ;;  %v4040_v1 = vor.u32 %v5595_v53, %v4037_v54  ;;  %v4658_v48 = vor.u32 %v5753_v38, %v4657_v36  ;;  %v5750_v53 = vld [vmem:[%s8869_s3 + $0x98] sm:$0xf0]  ;;  %v4741_v54 = vld [vmem:[%s8869_s3 + $0x150] sm:$0xf] }
  0xa5   :  { %1561 = vmatmul.bf16.vlgmr.msrb.gmra.mxu2 %v6296_v59 }
  0xa6   :  { %1627 = vmatpush.bf16.msra.mxu2 %v4556_v5  ;;  %4568 = vmatmul.msk.bf16.vlgmr.msrb.gmra.mxu1 %vm1255_vm0, %v6214_v21  ;;  %v5585_v5 = vld [vmem:[%s8867_s1 + $0x1b4] sm:$0xf] }
  0xa7   :  { %1598 = vmatpush.bf16.msrb.mxu3 %v3956_v0  ;;  %1609 = vmatpush.bf16.msra.mxu1 %v4396_v4  ;;  %v5640_v0 = vld [vmem:[%s8867_s1 + $0x364] sm:$0xf0]  ;;  %v4517_v4 = vld [vmem:[%s8867_s1 + $0x5e8] sm:$0xf0]  ;;  %v4000_v14 = vor.u32 %v5585_v5, %v3997_v7  ;;  %v4633_v5 = vld [vmem:[%s8869_s3 + $0x78] sm:$0xf] }
  0xa8   :  { %1572 = vmatpush.bf16.msra.mxu0 %v4192_v13  ;;  %v4196_v10 = vor.u32 %v5640_v0, %v4195_v63  ;;  %v4520_v11 = vor.u32 %v5715_v3, %v4517_v4  ;;  %v5630_v13 = vld [vmem:[%s8867_s1 + $0x314] sm:$0xf0]  ;;  %v7237_v23 = vpop.f32.mrf.mxu0  ;;  %v5545_v63 = vld [vmem:[%s8867_s1 + $0x74] sm:$0xf]  ;;  %v3837_v0 = vld [vmem:[%s8867_s1 + $0x98] sm:$0xf0] }
  0xa9   :  { %v7303_v56 = vpop.f32.mrf.mxu3  ;;  %v5625_v3 = vld [vmem:[%s8867_s1 + $0x2f4] sm:$0xf]  ;;  %v4157_v4 = vld [vmem:[%s8867_s1 + $0x318] sm:$0xf0]  ;;  %v5747_v7 = vld [vmem:[%s8869_s3 + $0x80] sm:$0xf0] }
  0xaa   :  { %1628 = vmatpush.bf16.msra.mxu2 %v4516_v17  ;;  %v4477_v17 = vld [vmem:[%s8867_s1 + $0x598] sm:$0xf0]  ;;  %v4634_v18 = vor.u32 %v5747_v7, %v4633_v5  ;;  %v5819_v5 = vld [vmem:[%s8869_s3 + $0x2c0] sm:$0xf0] }
  0xab   :  { %1599 = vmatpush.bf16.msrb.mxu3 %v3916_v12  ;;  %1610 = vmatpush.bf16.msra.mxu1 %v4356_v16  ;;  %v4155_v12 = vld [vmem:[%s8867_s1 + $0x2f0] sm:$0xf]  ;;  %v5705_v16 = vld [vmem:[%s8867_s1 + $0x574] sm:$0xf] }
  0xac   :  { %1573 = vmatpush.bf16.msra.mxu0 %v4152_v26  ;;  %v4156_v24 = vor.u32 %v5630_v13, %v4155_v12  ;;  %v4115_v26 = vld [vmem:[%s8867_s1 + $0x2a0] sm:$0xf]  ;;  %v3840_v12 = vor.u32 %v5545_v63, %v3837_v0  ;;  %v4160_v13 = vor.u32 %v5625_v3, %v4157_v4 }
  0xae   :  { %1629 = vmatpush.bf16.msra.mxu2 %v4476_v31  ;;  %v4437_v31 = vld [vmem:[%s8867_s1 + $0x548] sm:$0xf0] }
  0xaf   :  { %1600 = vmatpush.bf16.msrb.mxu3 %v3876_v25  ;;  %1611 = vmatpush.bf16.msra.mxu1 %v4316_v30  ;;  %v4480_v25 = vor.u32 %v5705_v16, %v4477_v17  ;;  %v4280_v30 = vor.u32 %v5655_v20, %v4277_v22  ;;  %v4440_v43 = vor.u32 %v5695_v28, %v4437_v31  ;;  %v5615_v16 = vld [vmem:[%s8867_s1 + $0x2a4] sm:$0xf]  ;;  %v4117_v20 = vld [vmem:[%s8867_s1 + $0x2c8] sm:$0xf0]  ;;  %v4621_v22 = vld [vmem:[%s8869_s3 + $0x60] sm:$0xf] }
  0xb0   :  { %1574 = vmatpush.bf16.msra.mxu0 %v4112_v42  ;;  %v4116_v42 = vor.u32 %v5620_v27, %v4115_v26  ;;  %v5768_v26 = vld [vmem:[%s8869_s3 + $0x128] sm:$0xf0]  ;;  %v4849_v27 = vld [vmem:[%s8869_s3 + $0x228] sm:$0xf]  ;;  %v5801_v28 = vld [vmem:[%s8869_s3 + $0x230] sm:$0xf0] }
  0xb2   :  { %1630 = vmatpush.bf16.msra.mxu2 %v4436_v45  ;;  %v4240_v45 = vor.u32 %v5645_v34, %v4237_v35  ;;  %v1312_v34 = vpop.f32.mrf.mxu3 }
  0xb3   :  { %1601 = vmatpush.bf16.msrb.mxu3 %v3836_v41  ;;  %1612 = vmatpush.bf16.msra.mxu1 %v4276_v44  ;;  %v7277_v41 = vpop.f32.mrf.mxu2  ;;  %v3920_v44 = vor.u32 %v5565_v32, %v3917_v33  ;;  %v4120_v33 = vor.u32 %v5615_v16, %v4117_v20  ;;  %v5792_v20 = vld [vmem:[%s8869_s3 + $0x1e8] sm:$0xf0] }
  0xb4   :  { %1637 = vmatpush.bf16.msrb.mxu0 %v4080_v49  ;;  %v4754_v49 = vor.u32 %v5777_v40, %v4753_v39  ;;  %v4609_v39 = vld [vmem:[%s8869_s3 + $0x48] sm:$0xf]  ;;  %v5741_v40 = vld [vmem:[%s8869_s3 + $0x50] sm:$0xf0] }
  0xb5   :  { %1575 = vmatmul.bf16.vlgmr.msra.gmra.mxu0 %v6298_v60  ;;  %4569 = vmatmul.msk.bf16.vlgmr.msra.gmra.mxu2 %vm1255_vm0, %v6214_v21 }
  0xb6   :  { %1651 = vmatpush.bf16.msrb.mxu2 %v4400_v50  ;;  %v5635_v50 = vld [vmem:[%s8867_s1 + $0x344] sm:$0xf] }
  0xb7   :  { %1602 = vmatpush.bf16.msrb.mxu3 %v3796_v58  ;;  %1613 = vmatpush.bf16.msra.mxu1 %v4236_v61  ;;  %v7305_v58 = vpop.f32.mrf.mxu0  ;;  %v3880_v61 = vor.u32 %v5555_v46, %v3877_v47  ;;  %v5798_v46 = vld [vmem:[%s8869_s3 + $0x218] sm:$0xf0] }
  0xb8   :  { %1638 = vmatpush.bf16.msrb.mxu0 %v4040_v1  ;;  %v4646_v1 = vor.u32 %v5750_v53, %v4645_v52 }
  0xba   :  { %1652 = vmatpush.bf16.msrb.mxu2 %v4360_v2  ;;  %1603 = vmatmul.bf16.vlgmr.msrb.gmra.mxu3 %v6296_v59  ;;  %v4742_v2 = vor.u32 %v5774_v55, %v4741_v54 }
  0xbb   :  { %1669 = vmatpush.bf16.msra.mxu3 %v4560_v62  ;;  %1614 = vmatpush.bf16.msra.mxu1 %v4196_v10  ;;  %v4200_v62 = vor.u32 %v5635_v50, %v4197_v51  ;;  %v7335_v10 = vld [vmem:[%s8868_s2] sm:$0xff]  ;;  %v7348_v17 = vpop.f32.mrf.mxu2  ;;  %v4610_v51 = vor.u32 %v5741_v40, %v4609_v39  ;;  %v5813_v39 = vld [vmem:[%s8869_s3 + $0x290] sm:$0xf0] }
  0xbc   :  { %1639 = vmatpush.bf16.msrb.mxu0 %v4000_v14  ;;  %v5535_v14 = vld [vmem:[%s8867_s1 + $0x24] sm:$0xf]  ;;  %v236_v31 = vperm.slane %v7335_v10, 1 }
  0xbe   :  { %1653 = vmatpush.bf16.msrb.mxu2 %v4320_v15  ;;  %v3797_v15 = vld [vmem:[%s8867_s1 + $0x48] sm:$0xf0]  ;;  %v1311_v63 = vadd.f32 %v7303_v56, %v236_v31  ;;  %v1313_v0 = vadd.f32 %v1312_v34, %v236_v31  ;;  %v4921_v56 = vld [vmem:[%s8869_s3 + $0x2b8] sm:$0xf]  ;;  %v4801_v34 = vld [vmem:[%s8869_s3 + $0x1c8] sm:$0xf] }
  0xbf   :  { %1670 = vmatpush.bf16.msra.mxu3 %v4520_v11  ;;  %1615 = vmatpush.bf16.msra.mxu1 %v4156_v24  ;;  %v7337_v11 = vpop.f32.mrf.mxu1  ;;  %v5744_v24 = vld [vmem:[%s8869_s3 + $0x68] sm:$0xf0]  ;;  %v3800_v32 = vor.u32 %v5535_v14, %v3797_v15  ;;  %v7381_v38 = vpop.f32.mrf.mxu0  ;;  %v5735_v14 = vld [vmem:[%s8869_s3 + $0x20] sm:$0xf0]  ;;  %s3749_s1 = sshll.u32 %s8871_s5, 4  ;;  %s3750_s1 = int_to_ptr.hbm [resolvable:$true] %s3749_s1 }
  0xc0   :  { %1640 = vmatpush.bf16.msrb.mxu0 %v3960_v29  ;;  %v5825_v29 = vld [vmem:[%s8869_s3 + $0x2f0] sm:$0xf0]  ;;  %v4622_v35 = vor.u32 %v5744_v24, %v4621_v22  ;;  %v4922_v22 = vor.u32 %v5819_v5, %v4921_v56  ;;  %v5816_v24 = vld [vmem:[%s8869_s3 + $0x2a8] sm:$0xf0] }
  0xc1   :  { %v5732_v31 = vld [vmem:[%s8869_s3 + $0x8] sm:$0xf0] }
  0xc2   :  { %1654 = vmatpush.bf16.msrb.mxu2 %v4280_v30  ;;  %v235_v30 = vperm.slane %v7335_v10, 0 }
  0xc3   :  { %1671 = vmatpush.bf16.msra.mxu3 %v4480_v25  ;;  %1616 = vmatpush.bf16.msra.mxu1 %v4116_v42  ;;  %v4717_v25 = vld [vmem:[%s8869_s3 + $0x120] sm:$0xf]  ;;  %v4705_v42 = vld [vmem:[%s8869_s3 + $0x108] sm:$0xf]  ;;  %v1326_v4 = vpop.f32.mrf.mxu2 }
  0xc4   :  { %1641 = vmatpush.bf16.msrb.mxu0 %v3920_v44  ;;  %v4718_v36 = vor.u32 %v5768_v26, %v4717_v25  ;;  %v5765_v44 = vld [vmem:[%s8869_s3 + $0x110] sm:$0xf0]  ;;  %v1269_v50 = vadd.f32 %v7181_v57, %v235_v30  ;;  %v1271_v53 = vadd.f32 %v7237_v23, %v235_v30  ;;  %v4693_v57 = vld [vmem:[%s8869_s3 + $0xf0] sm:$0xf]  ;;  %v5762_v23 = vld [vmem:[%s8869_s3 + $0xf8] sm:$0xf0]  ;;  %v1327_v16 = vadd.f32 %v1326_v4, %v1313_v0 }
  0xc5   :  { %v4706_v54 = vor.u32 %v5765_v44, %v4705_v42  ;;  %v4573_v30 = vld [vmem:[%s8869_s3] sm:$0xf]  ;;  %v5849_v44 = vld [vmem:[%s8869_s3 + $0x3b0] sm:$0xf0]  ;;  %v5137_v0 = vld [vmem:[%s8869_s3 + $0x468] sm:$0xf] }
  0xc6   :  { %1655 = vmatpush.bf16.msrb.mxu2 %v4240_v45  ;;  %1617 = vmatmul.bf16.vlgmr.msra.gmra.mxu1 %v6298_v60  ;;  %v4837_v45 = vld [vmem:[%s8869_s3 + $0x210] sm:$0xf]  ;;  %v1283_v7 = vadd.f32 %v7266_v37, %v1269_v50  ;;  %v1285_v9 = vadd.f32 %v7337_v11, %v1271_v53  ;;  %v4681_v37 = vld [vmem:[%s8869_s3 + $0xd8] sm:$0xf]  ;;  %v1325_v11 = vadd.f32 %v7348_v17, %v1311_v63  ;;  %v4909_v17 = vld [vmem:[%s8869_s3 + $0x2a0] sm:$0xf] }
  0xc7   :  { %1672 = vmatpush.bf16.msra.mxu3 %v4440_v43  ;;  %3317 = vmatpush.bf16.msrb.mxu1 %v4658_v48  ;;  %v4850_v43 = vor.u32 %v5801_v28, %v4849_v27  ;;  %v4933_v48 = vld [vmem:[%s8869_s3 + $0x2d0] sm:$0xf]  ;;  %v7408_v52 = vpop.f32.mrf.mxu1  ;;  %v4838_v55 = vor.u32 %v5798_v46, %v4837_v45  ;;  %v237_v28 = vperm.slane %v7335_v10, 2  ;;  %v4574_v42 = vor.u32 %v5732_v31, %v4573_v30  ;;  %v5810_v63 = vld [vmem:[%s8869_s3 + $0x278] sm:$0xf0] }
  0xc8   :  { %1642 = vmatpush.bf16.msrb.mxu0 %v3880_v61  ;;  %v4597_v61 = vld [vmem:[%s8869_s3 + $0x30] sm:$0xf]  ;;  %v1366_v15 = vpop.f32.mrf.mxu3  ;;  %v1297_v25 = vadd.f32 %v7199_v6, %v1283_v7  ;;  %v1299_v27 = vadd.f32 %v7277_v41, %v1285_v9  ;;  %v1341_v6 = vadd.f32 %v7381_v38, %v1327_v16  ;;  %v4669_v41 = vld [vmem:[%s8869_s3 + $0xc0] sm:$0xf]  ;;  %v4897_v38 = vld [vmem:[%s8869_s3 + $0x288] sm:$0xf] }
  0xc9   :  { %v1353_v46 = vadd.f32 %v7408_v52, %v237_v28  ;;  %v4885_v52 = vld [vmem:[%s8869_s3 + $0x270] sm:$0xf]  ;;  %v4777_v9 = vld [vmem:[%s8869_s3 + $0x198] sm:$0xf]  ;;  %v5870_v16 = vld [vmem:[%s8869_s3 + $0x458] sm:$0xf0] }
  0xca   :  { %1656 = vmatpush.bf16.msrb.mxu2 %v4200_v62  ;;  %4570 = vmatmul.msk.bf16.vlgmr.msra.gmra.mxu3 %vm1255_vm0, %v6214_v21  ;;  %v4945_v21 = vld [vmem:[%s8869_s3 + $0x2e8] sm:$0xf]  ;;  %v5738_v62 = vld [vmem:[%s8869_s3 + $0x38] sm:$0xf0]  ;;  %v1679_v40 = vmax.f32 %v1297_v25, 0.0  ;;  %v1689_v45 = vmax.f32 %v1299_v27, 0.0 }
  0xcb   :  { %3331 = vmatpush.bf16.msrb.mxu3 %v4754_v49  ;;  %3318 = vmatpush.bf16.msrb.mxu1 %v4646_v1  ;;  %v4946_v47 = vor.u32 %v5825_v29, %v4945_v21  ;;  %v5822_v49 = vld [vmem:[%s8869_s3 + $0x2d8] sm:$0xf0]  ;;  %v4825_v1 = vld [vmem:[%s8869_s3 + $0x1f8] sm:$0xf]  ;;  %v4598_v8 = vor.u32 %v5738_v62, %v4597_v61  ;;  %v4898_v61 = vor.u32 %v5813_v39, %v4897_v38  ;;  %v4765_v25 = vld [vmem:[%s8869_s3 + $0x180] sm:$0xf] }
  0xcc   :  { %1643 = vmatpush.bf16.msrb.mxu0 %v3840_v12  ;;  %v4934_v3 = vor.u32 %v5822_v49, %v4933_v48  ;;  %v4694_v12 = vor.u32 %v5762_v23, %v4693_v57  ;;  %v4789_v49 = vld [vmem:[%s8869_s3 + $0x1b0] sm:$0xf]  ;;  %v5873_v23 = vld [vmem:[%s8869_s3 + $0x470] sm:$0xf0]  ;;  %v7527_v4 = vpack.c.bf16 %v1689_v45, %v1679_v40  ;;  %v1367_v56 = vadd.f32 %v1366_v15, %v1353_v46  ;;  %v5807_v15 = vld [vmem:[%s8869_s3 + $0x260] sm:$0xf0] }
  0xcd   :  { %v5804_v31 = vld [vmem:[%s8869_s3 + $0x248] sm:$0xf0]  ;;  %v5329_v39 = vld [vmem:[%s8869_s3 + $0x5e8] sm:$0xf]  ;;  %v5921_v40 = vld [vmem:[%s8869_s3 + $0x5f0] sm:$0xf0] }
  0xce   :  { %1657 = vmatpush.bf16.msrb.mxu2 %v4160_v13 }
  0xcf   :  { %3332 = vmatpush.bf16.msrb.mxu3 %v4742_v2  ;;  %3319 = vmatpush.bf16.msrb.mxu1 %v4634_v18  ;;  %v5795_v2 = vld [vmem:[%s8869_s3 + $0x200] sm:$0xf0] }
  0xd0   :  { %1644 = vmatpush.bf16.msrb.mxu0 %v3800_v32  ;;  %v4826_v13 = vor.u32 %v5795_v2, %v4825_v1  ;;  %v5759_v18 = vld [vmem:[%s8869_s3 + $0xe0] sm:$0xf0]  ;;  %v1339_v32 = vadd.f32 %v7305_v58, %v1325_v11  ;;  %v5789_v58 = vld [vmem:[%s8869_s3 + $0x1d0] sm:$0xf0]  ;;  %v5029_v1 = vld [vmem:[%s8869_s3 + $0x390] sm:$0xf] }
  0xd1   :  { %v4682_v21 = vor.u32 %v5759_v18, %v4681_v37  ;;  %v4802_v53 = vor.u32 %v5789_v58, %v4801_v34  ;;  %v5846_v2 = vld [vmem:[%s8869_s3 + $0x398] sm:$0xf0]  ;;  %v5125_v11 = vld [vmem:[%s8869_s3 + $0x450] sm:$0xf]  ;;  %v5017_v18 = vld [vmem:[%s8869_s3 + $0x378] sm:$0xf] }
  0xd2   :  { %1658 = vmatpush.bf16.msrb.mxu2 %v4120_v33  ;;  %v5756_v33 = vld [vmem:[%s8869_s3 + $0xc8] sm:$0xf0]  ;;  %v1680_v50 = vmax.f32 %v1339_v32, 0.0  ;;  %v5030_v37 = vor.u32 %v5846_v2, %v5029_v1  ;;  %v5113_v32 = vld [vmem:[%s8869_s3 + $0x438] sm:$0xf] }
  0xd3   :  { %3333 = vmatpush.bf16.msrb.mxu3 %v4730_v19  ;;  %3320 = vmatpush.bf16.msrb.mxu1 %v4622_v35  ;;  %v4813_v19 = vld [vmem:[%s8869_s3 + $0x1e0] sm:$0xf]  ;;  %v1354_v35 = vpop.f32.mrf.mxu1  ;;  %v5840_v34 = vld [vmem:[%s8869_s3 + $0x368] sm:$0xf0]  ;;  %v5209_v1 = vld [vmem:[%s8869_s3 + $0x4f8] sm:$0xf] }
  0xd4   :  { %3345 = vmatpush.bf16.msra.mxu0 %v4850_v43  ;;  %v4814_v29 = vor.u32 %v5792_v20, %v4813_v19  ;;  %v5041_v43 = vld [vmem:[%s8869_s3 + $0x3a8] sm:$0xf]  ;;  %v1355_v48 = vadd.f32 %v1354_v35, %v237_v28  ;;  %v5843_v19 = vld [vmem:[%s8869_s3 + $0x380] sm:$0xf0]  ;;  %v5126_v20 = vor.u32 %v5870_v16, %v5125_v11  ;;  %v5780_v28 = vld [vmem:[%s8869_s3 + $0x188] sm:$0xf0] }
  0xd5   :  { %1645 = vmatmul.bf16.vlgmr.msrb.gmra.mxu0 %v6296_v59  ;;  %1659 = vmatmul.bf16.vlgmr.msrb.gmra.mxu2 %v6298_v60  ;;  %v7440_v59 = vpop.f32.mrf.mxu0  ;;  %v4585_v60 = vld [vmem:[%s8869_s3 + $0x18] sm:$0xf]  ;;  %v5042_v57 = vor.u32 %v5849_v44, %v5041_v43  ;;  %v5018_v30 = vor.u32 %v5843_v19, %v5017_v18  ;;  %v4766_v43 = vor.u32 %v5780_v28, %v4765_v25  ;;  %v5089_v2 = vld [vmem:[%s8869_s3 + $0x408] sm:$0xf]  ;;  %v5077_v18 = vld [vmem:[%s8869_s3 + $0x3f0] sm:$0xf] }
  0xd6   :  { %3359 = vmatpush.bf16.msra.mxu2 %v4946_v47  ;;  %v4586_v26 = vor.u32 %v5735_v14, %v4585_v60  ;;  %v4670_v47 = vor.u32 %v5756_v33, %v4669_v41  ;;  %v4873_v60 = vld [vmem:[%s8869_s3 + $0x258] sm:$0xf]  ;;  %v5897_v41 = vld [vmem:[%s8869_s3 + $0x530] sm:$0xf0]  ;;  %v5005_v33 = vld [vmem:[%s8869_s3 + $0x360] sm:$0xf] }
  0xd7   :  { %3334 = vmatpush.bf16.msrb.mxu3 %v4718_v36  ;;  %3321 = vmatpush.bf16.msrb.mxu1 %v4610_v51  ;;  %v4910_v36 = vor.u32 %v5816_v24, %v4909_v17  ;;  %v1690_v51 = vmax.f32 %v1341_v6, 0.0  ;;  %v238_v24 = vperm.slane %v7335_v10, 3  ;;  %v5867_v6 = vld [vmem:[%s8869_s3 + $0x440] sm:$0xf0]  ;;  %v5006_v46 = vor.u32 %v5840_v34, %v5005_v33  ;;  %v5858_v19 = vld [vmem:[%s8869_s3 + $0x3f8] sm:$0xf0] }
  0xd8   :  { %3346 = vmatpush.bf16.msra.mxu0 %v4838_v55  ;;  %v1368_v55 = vpop.f32.mrf.mxu3  ;;  %v1394_v14 = vpop.f32.mrf.mxu2  ;;  %v5114_v35 = vor.u32 %v5867_v6, %v5113_v32  ;;  %v5197_v25 = vld [vmem:[%s8869_s3 + $0x4e0] sm:$0xf]  ;;  %v4969_v28 = vld [vmem:[%s8869_s3 + $0x318] sm:$0xf] }
  0xd9   :  { %v1369_v5 = vadd.f32 %v1368_v55, %v1355_v48  ;;  %v7529_v7 = vpack.c.bf16 %v1690_v51, %v1680_v50  ;;  %v5101_v48 = vld [vmem:[%s8869_s3 + $0x420] sm:$0xf]  ;;  %v5894_v50 = vld [vmem:[%s8869_s3 + $0x518] sm:$0xf0]  ;;  %v4993_v51 = vld [vmem:[%s8869_s3 + $0x348] sm:$0xf] }
  0xda   :  { %3360 = vmatpush.bf16.msra.mxu2 %v4934_v3  ;;  %v5138_v3 = vor.u32 %v5873_v23, %v5137_v0 }
  0xdb   :  { %3335 = vmatpush.bf16.msrb.mxu3 %v4706_v54  ;;  %3322 = vmatpush.bf16.msrb.mxu1 %v4598_v8  ;;  %v5786_v54 = vld [vmem:[%s8869_s3 + $0x1b8] sm:$0xf0]  ;;  %v7562_v27 = vpop.f32.mrf.mxu1 }
  0xdc   :  { %3347 = vmatpush.bf16.msra.mxu0 %v4826_v13  ;;  %v4790_v8 = vor.u32 %v5786_v54, %v4789_v49  ;;  %v4886_v13 = vor.u32 %v5810_v63, %v4885_v52  ;;  %v5864_v49 = vld [vmem:[%s8869_s3 + $0x428] sm:$0xf0]  ;;  %v5330_v54 = vor.u32 %v5921_v40, %v5329_v39 }
  0xdd   :  { %v1382_v62 = vpop.f32.mrf.mxu0  ;;  %v5102_v55 = vor.u32 %v5864_v49, %v5101_v48  ;;  %v5425_v48 = vld [vmem:[%s8869_s3 + $0x6a8] sm:$0xf]  ;;  %v5945_v49 = vld [vmem:[%s8869_s3 + $0x6b0] sm:$0xf0] }
  0xde   :  { %3361 = vmatpush.bf16.msra.mxu2 %v4922_v22  ;;  %v1381_v22 = vadd.f32 %v7440_v59, %v1367_v56  ;;  %v1383_v17 = vadd.f32 %v1382_v62, %v1369_v5  ;;  %v5233_v59 = vld [vmem:[%s8869_s3 + $0x528] sm:$0xf]  ;;  %v5317_v62 = vld [vmem:[%s8869_s3 + $0x5d0] sm:$0xf] }
  0xdf   :  { %3336 = vmatpush.bf16.msrb.mxu3 %v4694_v12  ;;  %3323 = vmatpush.bf16.msrb.mxu1 %v4586_v26  ;;  %v5783_v12 = vld [vmem:[%s8869_s3 + $0x1a0] sm:$0xf0]  ;;  %v5234_v45 = vor.u32 %v5897_v41, %v5233_v59  ;;  %v5185_v41 = vld [vmem:[%s8869_s3 + $0x4c8] sm:$0xf] }
  0xe0   :  { %3348 = vmatpush.bf16.msra.mxu0 %v4814_v29  ;;  %v4778_v26 = vor.u32 %v5783_v12, %v4777_v9  ;;  %v4861_v29 = vld [vmem:[%s8869_s3 + $0x240] sm:$0xf]  ;;  %v1691_v58 = vmax.f32 %v1383_v17, 0.0  ;;  %v1396_v52 = vpop.f32.mrf.mxu2  ;;  %v4981_v9 = vld [vmem:[%s8869_s3 + $0x330] sm:$0xf] }
  0xe1   :  { %v4862_v44 = vor.u32 %v5804_v31, %v4861_v29  ;;  %v1397_v56 = vadd.f32 %v1396_v52, %v238_v24  ;;  %v5834_v12 = vld [vmem:[%s8869_s3 + $0x338] sm:$0xf0]  ;;  %v5078_v29 = vor.u32 %v5858_v19, %v5077_v18  ;;  %v5912_v31 = vld [vmem:[%s8869_s3 + $0x5a8] sm:$0xf0]  ;;  %v5939_v18 = vld [vmem:[%s8869_s3 + $0x680] sm:$0xf0] }
  0xe2   :  { %3362 = vmatpush.bf16.msra.mxu2 %v4910_v36  ;;  %v1681_v36 = vmax.f32 %v1381_v22, 0.0 }
  0xe3   :  { %3337 = vmatpush.bf16.msrb.mxu3 %v4682_v21  ;;  %3324 = vmatpush.bf16.msrb.mxu1 %v4574_v42  ;;  %v4874_v21 = vor.u32 %v5807_v15, %v4873_v60  ;;  %v1395_v42 = vadd.f32 %v1394_v14, %v238_v24  ;;  %v1424_v5 = vpop.f32.mrf.mxu1  ;;  %v5915_v15 = vld [vmem:[%s8869_s3 + $0x5c0] sm:$0xf0]  ;;  %v4982_v24 = vor.u32 %v5834_v12, %v4981_v9 }
  0xe4   :  { %3349 = vmatpush.bf16.msra.mxu0 %v4802_v53  ;;  %v5837_v53 = vld [vmem:[%s8869_s3 + $0x350] sm:$0xf0] }
  0xe5   :  { %v1408_v38 = vpop.f32.mrf.mxu0  ;;  %v4994_v23 = vor.u32 %v5837_v53, %v4993_v51 }
  0xe6   :  { %3363 = vmatpush.bf16.msra.mxu2 %v4898_v61  ;;  %3325 = vmatmul.bf16.vlgmr.msrb.gmra.mxu1 %v7527_v4  ;;  %v7615_v61 = vpack.c.bf16 %v1691_v58, %v1681_v36  ;;  %v1409_v63 = vadd.f32 %v1408_v38, %v1395_v42  ;;  %v5885_v36 = vld [vmem:[%s8869_s3 + $0x4d0] sm:$0xf0]  ;;  %v5065_v58 = vld [vmem:[%s8869_s3 + $0x3d8] sm:$0xf]  ;;  %v5855_v38 = vld [vmem:[%s8869_s3 + $0x3e0] sm:$0xf0] }
  0xe7   :  { %3338 = vmatpush.bf16.msrb.mxu3 %v4670_v47  ;;  %3373 = vmatpush.bf16.msra.mxu1 %v5042_v57  ;;  %v5221_v47 = vld [vmem:[%s8869_s3 + $0x510] sm:$0xf]  ;;  %v5918_v57 = vld [vmem:[%s8869_s3 + $0x5d8] sm:$0xf0]  ;;  %v4957_v42 = vld [vmem:[%s8869_s3 + $0x300] sm:$0xf]  ;;  %v5186_v51 = vor.u32 %v5885_v36, %v5185_v41 }
  0xe8   :  { %3350 = vmatpush.bf16.msra.mxu0 %v4790_v8  ;;  %v5222_v0 = vor.u32 %v5894_v50, %v5221_v47  ;;  %v5891_v8 = vld [vmem:[%s8869_s3 + $0x500] sm:$0xf0]  ;;  %v1423_v11 = vadd.f32 %v7562_v27, %v1409_v63  ;;  %v5888_v27 = vld [vmem:[%s8869_s3 + $0x4e8] sm:$0xf0]  ;;  %v5909_v47 = vld [vmem:[%s8869_s3 + $0x590] sm:$0xf0] }
  0xe9   :  { %v5210_v17 = vor.u32 %v5891_v8, %v5209_v1  ;;  %v5198_v34 = vor.u32 %v5888_v27, %v5197_v25  ;;  %v5882_v63 = vld [vmem:[%s8869_s3 + $0x4b8] sm:$0xf0]  ;;  %v5269_v1 = vld [vmem:[%s8869_s3 + $0x570] sm:$0xf]  ;;  %v5876_v25 = vld [vmem:[%s8869_s3 + $0x488] sm:$0xf0] }
  0xea   :  { %3339 = vmatmul.bf16.vlgmr.msrb.gmra.mxu3 %v7529_v7  ;;  %3364 = vmatpush.bf16.msra.mxu2 %v4886_v13  ;;  %v5318_v13 = vor.u32 %v5918_v57, %v5317_v62  ;;  %v1682_v32 = vmax.f32 %v1423_v11, 0.0  ;;  %v5173_v57 = vld [vmem:[%s8869_s3 + $0x4b0] sm:$0xf]  ;;  %v5903_v11 = vld [vmem:[%s8869_s3 + $0x560] sm:$0xf0] }
  0xeb   :  { %3387 = vmatpush.bf16.msra.mxu3 %v5138_v3  ;;  %3374 = vmatpush.bf16.msra.mxu1 %v5030_v37  ;;  %v5861_v3 = vld [vmem:[%s8869_s3 + $0x410] sm:$0xf0]  ;;  %v5305_v37 = vld [vmem:[%s8869_s3 + $0x5b8] sm:$0xf]  ;;  %v1464_v40 = vpop.f32.mrf.mxu2  ;;  %v5174_v9 = vor.u32 %v5882_v63, %v5173_v57  ;;  %v5752_v27 = vld [vmem:[%s8869_s3 + $0xac] sm:$0xf] }
  0xec   :  { %3351 = vmatpush.bf16.msra.mxu0 %v4778_v26  ;;  %v5090_v60 = vor.u32 %v5861_v3, %v5089_v2  ;;  %v5306_v59 = vor.u32 %v5915_v15, %v5305_v37  ;;  %v5906_v3 = vld [vmem:[%s8869_s3 + $0x578] sm:$0xf0]  ;;  %v5257_v15 = vld [vmem:[%s8869_s3 + $0x558] sm:$0xf]  ;;  %v5776_v41 = vld [vmem:[%s8869_s3 + $0x16c] sm:$0xf] }
  0xed   :  { %v1410_v14 = vpop.f32.mrf.mxu0  ;;  %v1436_v22 = vpop.f32.mrf.mxu3  ;;  %v5746_v63 = vld [vmem:[%s8869_s3 + $0x7c] sm:$0xf] }
  0xee   :  { %3365 = vmatpush.bf16.msra.mxu2 %v4874_v21  ;;  %v1411_v16 = vadd.f32 %v1410_v14, %v1397_v56  ;;  %v5831_v21 = vld [vmem:[%s8869_s3 + $0x320] sm:$0xf0]  ;;  %v5413_v56 = vld [vmem:[%s8869_s3 + $0x690] sm:$0xf]  ;;  %v5270_v14 = vor.u32 %v5906_v3, %v5269_v1  ;;  %v5930_v3 = vld [vmem:[%s8869_s3 + $0x638] sm:$0xf0] }
  0xef   :  { %3388 = vmatpush.bf16.msra.mxu3 %v5126_v20  ;;  %3375 = vmatpush.bf16.msra.mxu1 %v5018_v30  ;;  %v239_v20 = vperm.slane %v7335_v10, 4  ;;  %v5293_v30 = vld [vmem:[%s8869_s3 + $0x5a0] sm:$0xf] }
  0xf0   :  { %3352 = vmatpush.bf16.msra.mxu0 %v4766_v43  ;;  %v1425_v26 = vadd.f32 %v1424_v5, %v1411_v16  ;;  %v5828_v43 = vld [vmem:[%s8869_s3 + $0x308] sm:$0xf0]  ;;  %v5942_v5 = vld [vmem:[%s8869_s3 + $0x698] sm:$0xf0]  ;;  %v5401_v16 = vld [vmem:[%s8869_s3 + $0x678] sm:$0xf] }
  0xf1   :  { %v1437_v33 = vadd.f32 %v1436_v22, %v239_v20  ;;  %v4958_v53 = vor.u32 %v5828_v43, %v4957_v42  ;;  %v5414_v37 = vor.u32 %v5942_v5, %v5413_v56  ;;  %v5749_v43 = vld [vmem:[%s8869_s3 + $0x94] sm:$0xf]  ;;  %v5770_v56 = vld [vmem:[%s8869_s3 + $0x13c] sm:$0xf]  ;;  %v4731_v5 = vld [vmem:[%s8869_s3 + $0x144] sm:$0xf0] }
  0xf2   :  { %3366 = vmatpush.bf16.msra.mxu2 %v4862_v44  ;;  %v1692_v6 = vmax.f32 %v1425_v26, 0.0  ;;  %v5294_v44 = vor.u32 %v5912_v31, %v5293_v30  ;;  %v5245_v30 = vld [vmem:[%s8869_s3 + $0x540] sm:$0xf]  ;;  %v5900_v31 = vld [vmem:[%s8869_s3 + $0x548] sm:$0xf0] }
  0xf3   :  { %3389 = vmatpush.bf16.msra.mxu3 %v5114_v35  ;;  %3376 = vmatpush.bf16.msra.mxu1 %v5006_v46  ;;  %v4970_v35 = vor.u32 %v5831_v21, %v4969_v28  ;;  %v5281_v46 = vld [vmem:[%s8869_s3 + $0x588] sm:$0xf]  ;;  %v1450_v50 = vpop.f32.mrf.mxu1  ;;  %v4659_v28 = vld [vmem:[%s8869_s3 + $0xb4] sm:$0xf0]  ;;  %v5258_v21 = vor.u32 %v5903_v11, %v5257_v15  ;;  %v4623_v15 = vld [vmem:[%s8869_s3 + $0x6c] sm:$0xf0] }
  0xf4   :  { %3401 = vmatpush.bf16.msrb.mxu0 %v5234_v45  ;;  %v7686_v39 = vpack.c.bf16 %v1692_v6, %v1682_v32  ;;  %v5066_v45 = vor.u32 %v5855_v38, %v5065_v58  ;;  %v1451_v52 = vadd.f32 %v1450_v50, %v1437_v33  ;;  %v5389_v32 = vld [vmem:[%s8869_s3 + $0x660] sm:$0xf]  ;;  %v5936_v6 = vld [vmem:[%s8869_s3 + $0x668] sm:$0xf0]  ;;  %v4755_v33 = vld [vmem:[%s8869_s3 + $0x174] sm:$0xf0]  ;;  %v4662_v38 = vor.u32 %v5752_v27, %v4659_v28 }
  0xf5   :  { %3353 = vmatmul.bf16.vlgmr.msra.gmra.mxu0 %v7615_v61  ;;  %v1438_v62 = vpop.f32.mrf.mxu3  ;;  %v240_v58 = vperm.slane %v7335_v10, 5  ;;  %v5773_v50 = vld [vmem:[%s8869_s3 + $0x154] sm:$0xf]  ;;  %v241_v28 = vperm.slane %v7335_v10, 6  ;;  %v5951_v10 = vld [vmem:[%s8869_s3 + $0x6e0] sm:$0xf0] }
  0xf6   :  { %3415 = vmatpush.bf16.msrb.mxu2 %v5330_v54  ;;  %v5053_v54 = vld [vmem:[%s8869_s3 + $0x3c0] sm:$0xf]  ;;  %v1439_v8 = vadd.f32 %v1438_v62, %v239_v20  ;;  %v1465_v12 = vadd.f32 %v1464_v40, %v1451_v52  ;;  %v1466_v20 = vpop.f32.mrf.mxu2  ;;  %v5246_v40 = vor.u32 %v5900_v31, %v5245_v30  ;;  %v4611_v31 = vld [vmem:[%s8869_s3 + $0x54] sm:$0xf0] }
  0xf7   :  { %3390 = vmatpush.bf16.msra.mxu3 %v5102_v55  ;;  %3377 = vmatpush.bf16.msra.mxu1 %v4994_v23  ;;  %v5852_v55 = vld [vmem:[%s8869_s3 + $0x3c8] sm:$0xf0]  ;;  %v5426_v23 = vor.u32 %v5945_v49, %v5425_v48  ;;  %v5933_v49 = vld [vmem:[%s8869_s3 + $0x650] sm:$0xf0] }
  0xf8   :  { %3402 = vmatpush.bf16.msrb.mxu0 %v5222_v0  ;;  %3367 = vmatmul.bf16.vlgmr.msra.gmra.mxu2 %v7686_v39  ;;  %v5282_v0 = vor.u32 %v5909_v47, %v5281_v46  ;;  %v5054_v2 = vor.u32 %v5852_v55, %v5053_v54  ;;  %v1683_v26 = vmax.f32 %v1465_v12, 0.0  ;;  %v4758_v46 = vor.u32 %v5776_v41, %v4755_v33  ;;  %v5377_v47 = vld [vmem:[%s8869_s3 + $0x648] sm:$0xf]  ;;  %v5969_v54 = vld [vmem:[%s8869_s3 + $0x770] sm:$0xf0] }
  0xf9   :  { %v5966_v12 = vld [vmem:[%s8869_s3 + $0x758] sm:$0xf0]  ;;  %v5341_v41 = vld [vmem:[%s8869_s3 + $0x600] sm:$0xf]  ;;  %v5924_v33 = vld [vmem:[%s8869_s3 + $0x608] sm:$0xf0] }
  0xfa   :  { %3416 = vmatpush.bf16.msrb.mxu2 %v5318_v13  ;;  %v5161_v13 = vld [vmem:[%s8869_s3 + $0x498] sm:$0xf] }
  0xfb   :  { %3391 = vmatpush.bf16.msra.mxu3 %v5090_v60  ;;  %3378 = vmatpush.bf16.msra.mxu1 %v4982_v24  ;;  %v5879_v60 = vld [vmem:[%s8869_s3 + $0x4a0] sm:$0xf0]  ;;  %v1452_v19 = vpop.f32.mrf.mxu1  ;;  %v5149_v24 = vld [vmem:[%s8869_s3 + $0x480] sm:$0xf] }
  0xfc   :  { %3403 = vmatpush.bf16.msrb.mxu0 %v5210_v17  ;;  %v1453_v22 = vadd.f32 %v1452_v19, %v1439_v8  ;;  %v5162_v17 = vor.u32 %v5879_v60, %v5161_v13  ;;  %v5150_v36 = vor.u32 %v5876_v25, %v5149_v24  ;;  %v5497_v24 = vld [vmem:[%s8869_s3 + $0x738] sm:$0xf]  ;;  %v5963_v25 = vld [vmem:[%s8869_s3 + $0x740] sm:$0xf0] }
  0xfd   :  { %v1506_v48 = vpop.f32.mrf.mxu3 }
  0xfe   :  { %3417 = vmatpush.bf16.msrb.mxu2 %v5306_v59  ;;  %v5402_v59 = vor.u32 %v5939_v18, %v5401_v16  ;;  %v4734_v16 = vor.u32 %v5770_v56, %v4731_v5  ;;  %v5353_v18 = vld [vmem:[%s8869_s3 + $0x618] sm:$0xf] }
  0xff   :  { %3392 = vmatpush.bf16.msra.mxu3 %v5078_v29  ;;  %3379 = vmatpush.bf16.msra.mxu1 %v4970_v35  ;;  %v1467_v29 = vadd.f32 %v1466_v20, %v1453_v22  ;;  %v5927_v20 = vld [vmem:[%s8869_s3 + $0x620] sm:$0xf0] }
 0x100   :  { %3404 = vmatpush.bf16.msrb.mxu0 %v5198_v34  ;;  %v5767_v22 = vld [vmem:[%s8869_s3 + $0x124] sm:$0xf] }
 0x101   :  { %v1693_v34 = vmax.f32 %v1467_v29, 0.0  ;;  %v5498_v29 = vor.u32 %v5963_v25, %v5497_v24  ;;  %v5731_v24 = vld [vmem:[%s8869_s3 + $0x4] sm:$0xf]  ;;  %v4575_v25 = vld [vmem:[%s8869_s3 + $0xc] sm:$0xf0] }
 0x102   :  { %3418 = vmatpush.bf16.msrb.mxu2 %v5294_v44  ;;  %v1478_v35 = vpop.f32.mrf.mxu0  ;;  %v4647_v44 = vld [vmem:[%s8869_s3 + $0x9c] sm:$0xf0] }
 0x103   :  { %3393 = vmatpush.bf16.msra.mxu3 %v5066_v45  ;;  %3380 = vmatpush.bf16.msra.mxu1 %v4958_v53  ;;  %v7780_v42 = vpack.c.bf16 %v1693_v34, %v1683_v26  ;;  %v5390_v45 = vor.u32 %v5936_v6, %v5389_v32  ;;  %v5521_v53 = vld [vmem:[%s8869_s3 + $0x768] sm:$0xf]  ;;  %v1479_v55 = vadd.f32 %v1478_v35, %v240_v58  ;;  %v5764_v35 = vld [vmem:[%s8869_s3 + $0x10c] sm:$0xf] }
 0x104   :  { %3405 = vmatpush.bf16.msrb.mxu0 %v5186_v51  ;;  %v4743_v51 = vld [vmem:[%s8869_s3 + $0x15c] sm:$0xf0]  ;;  %v4650_v52 = vor.u32 %v5749_v43, %v4647_v44  ;;  %v5522_v62 = vor.u32 %v5969_v54, %v5521_v53  ;;  %v5354_v32 = vor.u32 %v5927_v20, %v5353_v18  ;;  %v5960_v43 = vld [vmem:[%s8869_s3 + $0x728] sm:$0xf0]  ;;  %v5761_v54 = vld [vmem:[%s8869_s3 + $0xf4] sm:$0xf] }
 0x105   :  { %v4746_v1 = vor.u32 %v5773_v50, %v4743_v51  ;;  %v1508_v27 = vpop.f32.mrf.mxu3  ;;  %v4599_v50 = vld [vmem:[%s8869_s3 + $0x3c] sm:$0xf0]  ;;  %v5342_v51 = vor.u32 %v5924_v33, %v5341_v41  ;;  %v5954_v18 = vld [vmem:[%s8869_s3 + $0x6f8] sm:$0xf0] }
 0x106   :  { %3419 = vmatpush.bf16.msrb.mxu2 %v5282_v0  ;;  %3381 = vmatmul.bf16.vlgmr.msra.gmra.mxu1 %v7780_v42  ;;  %v4635_v0 = vld [vmem:[%s8869_s3 + $0x84] sm:$0xf0] }
 0x107   :  { %3429 = vmatpush.bf16.msrb.mxu1 %v5426_v23  ;;  %3394 = vmatpush.bf16.msra.mxu3 %v5054_v2  ;;  %v5378_v23 = vor.u32 %v5933_v49, %v5377_v47  ;;  %v5365_v2 = vld [vmem:[%s8869_s3 + $0x630] sm:$0xf]  ;;  %v4638_v60 = vor.u32 %v5746_v63, %v4635_v0  ;;  %v5737_v49 = vld [vmem:[%s8869_s3 + $0x34] sm:$0xf]  ;;  %v4839_v63 = vld [vmem:[%s8869_s3 + $0x21c] sm:$0xf0] }
 0x108   :  { %3406 = vmatpush.bf16.msrb.mxu0 %v5174_v9  ;;  %v1492_v57 = vpop.f32.mrf.mxu2  ;;  %v5509_v9 = vld [vmem:[%s8869_s3 + $0x750] sm:$0xf]  ;;  %v5366_v11 = vor.u32 %v5930_v3, %v5365_v2  ;;  %v5473_v0 = vld [vmem:[%s8869_s3 + $0x708] sm:$0xf]  ;;  %v4602_v3 = vor.u32 %v5737_v49, %v4599_v50  ;;  %v5848_v50 = vld [vmem:[%s8869_s3 + $0x3ac] sm:$0xf] }
 0x109   :  { %v1493_v13 = vadd.f32 %v1492_v57, %v1479_v55  ;;  %v5797_v57 = vld [vmem:[%s8869_s3 + $0x214] sm:$0xf] }
 0x10a   :  { %3420 = vmatpush.bf16.msrb.mxu2 %v5270_v14  ;;  %v1480_v8 = vpop.f32.mrf.mxu0  ;;  %v5510_v14 = vor.u32 %v5966_v12, %v5509_v9  ;;  %v4587_v9 = vld [vmem:[%s8869_s3 + $0x24] sm:$0xf0] }
 0x10b   :  { %3430 = vmatpush.bf16.msrb.mxu1 %v5414_v37  ;;  %3443 = vmatpush.bf16.msrb.mxu3 %v5522_v62  ;;  %v5743_v37 = vld [vmem:[%s8869_s3 + $0x64] sm:$0xf]  ;;  %v1481_v19 = vadd.f32 %v1480_v8, %v240_v58  ;;  %v1507_v26 = vadd.f32 %v1506_v48, %v1493_v13  ;;  %v5800_v58 = vld [vmem:[%s8869_s3 + $0x22c] sm:$0xf]  ;;  %v4695_v62 = vld [vmem:[%s8869_s3 + $0xfc] sm:$0xf0] }
 0x10c   :  { %3407 = vmatpush.bf16.msrb.mxu0 %v5162_v17  ;;  %v4719_v17 = vld [vmem:[%s8869_s3 + $0x12c] sm:$0xf0]  ;;  %v5734_v8 = vld [vmem:[%s8869_s3 + $0x1c] sm:$0xf]  ;;  %v4698_v12 = vor.u32 %v5761_v54, %v4695_v62  ;;  %v4791_v62 = vld [vmem:[%s8869_s3 + $0x1bc] sm:$0xf0] }
 0x10d   :  { %v4722_v6 = vor.u32 %v5767_v22, %v4719_v17  ;;  %v1684_v44 = vmax.f32 %v1507_v26, 0.0  ;;  %v4590_v20 = vor.u32 %v5734_v8, %v4587_v9  ;;  %v5974_v9 = vld [vmem:[%s8868_s2] sm:$0xff] }
 0x10e   :  { %3421 = vmatpush.bf16.msrb.mxu2 %v5258_v21  ;;  %v4626_v21 = vor.u32 %v5743_v37, %v4623_v15  ;;  %v4683_v37 = vld [vmem:[%s8869_s3 + $0xe4] sm:$0xf0]  ;;  %v5794_v15 = vld [vmem:[%s8869_s3 + $0x1fc] sm:$0xf] }
 0x10f   :  { %3431 = vmatpush.bf16.msrb.mxu1 %v5402_v59  ;;  %3444 = vmatpush.bf16.msrb.mxu3 %v5510_v14  ;;  %v5740_v59 = vld [vmem:[%s8869_s3 + $0x4c] sm:$0xf]  ;;  %v5758_v14 = vld [vmem:[%s8869_s3 + $0xdc] sm:$0xf] }
 0x110   :  { %3408 = vmatpush.bf16.msrb.mxu0 %v5150_v36  ;;  %v1494_v30 = vpop.f32.mrf.mxu2  ;;  %v4707_v36 = vld [vmem:[%s8869_s3 + $0x114] sm:$0xf0]  ;;  %v4614_v47 = vor.u32 %v5740_v59, %v4611_v31  ;;  %v4686_v26 = vor.u32 %v5758_v14, %v4683_v37  ;;  %v4671_v59 = vld [vmem:[%s8869_s3 + $0xcc] sm:$0xf0]  ;;  %v4779_v14 = vld [vmem:[%s8869_s3 + $0x1a4] sm:$0xf0] }
 0x111   :  { %v1495_v34 = vadd.f32 %v1494_v30, %v1481_v19  ;;  %v4710_v53 = vor.u32 %v5764_v35, %v4707_v36  ;;  %v5791_v30 = vld [vmem:[%s8869_s3 + $0x1e4] sm:$0xf]  ;;  %v4815_v31 = vld [vmem:[%s8869_s3 + $0x1ec] sm:$0xf0] }
 0x112   :  { %3422 = vmatpush.bf16.msrb.mxu2 %v5246_v40  ;;  %v5485_v40 = vld [vmem:[%s8869_s3 + $0x720] sm:$0xf]  ;;  %v1548_v2 = vpop.f32.mrf.mxu0  ;;  %v4818_v35 = vor.u32 %v5791_v30, %v4815_v31 }
 0x113   :  { %3432 = vmatpush.bf16.msrb.mxu1 %v5390_v45  ;;  %3445 = vmatpush.bf16.msrb.mxu3 %v5498_v29  ;;  %v1509_v45 = vadd.f32 %v1508_v27, %v1495_v34  ;;  %v5486_v48 = vor.u32 %v5960_v43, %v5485_v40  ;;  %v4803_v40 = vld [vmem:[%s8869_s3 + $0x1d4] sm:$0xf0]  ;;  %v5437_v43 = vld [vmem:[%s8869_s3 + $0x6c0] sm:$0xf] }
 0x114   :  { %3457 = vmatpush.bf16.msra.mxu0 %v4662_v38  ;;  %v4851_v38 = vld [vmem:[%s8869_s3 + $0x234] sm:$0xf0] }
 0x115   :  { %v1694_v55 = vmax.f32 %v1509_v45, 0.0 }
 0x116   :  { %3471 = vmatpush.bf16.msra.mxu2 %v4758_v46  ;;  %v1520_v46 = vpop.f32.mrf.mxu1 }
 0x117   :  { %3433 = vmatpush.bf16.msrb.mxu1 %v5378_v23  ;;  %3446 = vmatpush.bf16.msrb.mxu3 %v5486_v48  ;;  %v5957_v23 = vld [vmem:[%s8869_s3 + $0x710] sm:$0xf0]  ;;  %v1521_v5 = vadd.f32 %v1520_v46, %v241_v28  ;;  %v5824_v46 = vld [vmem:[%s8869_s3 + $0x2ec] sm:$0xf] }
 0x118   :  { %3458 = vmatpush.bf16.msra.mxu0 %v4650_v52  ;;  %v4854_v52 = vor.u32 %v5800_v58, %v4851_v38  ;;  %v5474_v56 = vor.u32 %v5957_v23, %v5473_v0  ;;  %v5788_v58 = vld [vmem:[%s8869_s3 + $0x1cc] sm:$0xf]  ;;  %v5821_v0 = vld [vmem:[%s8869_s3 + $0x2d4] sm:$0xf]  ;;  %v4935_v23 = vld [vmem:[%s8869_s3 + $0x2dc] sm:$0xf0] }
 0x119   :  { %v4806_v54 = vor.u32 %v5788_v58, %v4803_v40 }
 0x11a   :  { %3472 = vmatpush.bf16.msra.mxu2 %v4746_v1  ;;  %v7910_v1 = vpack.c.bf16 %v1694_v55, %v1684_v44  ;;  %v1550_v34 = vpop.f32.mrf.mxu0  ;;  %v5948_v44 = vld [vmem:[%s8869_s3 + $0x6c8] sm:$0xf0] }
 0x11b   :  { %3434 = vmatpush.bf16.msrb.mxu1 %v5366_v11  ;;  %3447 = vmatpush.bf16.msrb.mxu3 %v5474_v56  ;;  %v4827_v11 = vld [vmem:[%s8869_s3 + $0x204] sm:$0xf0]  ;;  %v5438_v45 = vor.u32 %v5948_v44, %v5437_v43  ;;  %v5031_v56 = vld [vmem:[%s8869_s3 + $0x39c] sm:$0xf0] }
 0x11c   :  { %3459 = vmatpush.bf16.msra.mxu0 %v4638_v60  ;;  %3395 = vmatmul.bf16.vlgmr.msra.gmra.mxu3 %v7910_v1  ;;  %v4842_v60 = vor.u32 %v5797_v57, %v4839_v63  ;;  %v4830_v27 = vor.u32 %v5794_v15, %v4827_v11  ;;  %v5818_v15 = vld [vmem:[%s8869_s3 + $0x2bc] sm:$0xf]  ;;  %v4923_v11 = vld [vmem:[%s8869_s3 + $0x2c4] sm:$0xf0] }
 0x11d   :  { %v1534_v13 = vpop.f32.mrf.mxu3  ;;  %v8064_v44 = vld [vmem:[%s8868_s2 + $0x8] sm:$0x3] }
 0x11e   :  { %3473 = vmatpush.bf16.msra.mxu2 %v4734_v16  ;;  %v5461_v16 = vld [vmem:[%s8869_s3 + $0x6f0] sm:$0xf]  ;;  %v1522_v19 = vpop.f32.mrf.mxu1  ;;  %v1535_v17 = vadd.f32 %v1534_v13, %v1521_v5  ;;  %v4938_v5 = vor.u32 %v5821_v0, %v4935_v23  ;;  %v5830_v23 = vld [vmem:[%s8869_s3 + $0x31c] sm:$0xf] }
 0x11f   :  { %3435 = vmatpush.bf16.msrb.mxu1 %v5354_v32  ;;  %v5462_v22 = vor.u32 %v5954_v18, %v5461_v16  ;;  %v1523_v29 = vadd.f32 %v1522_v19, %v241_v28  ;;  %v4578_v32 = vor.u32 %v5731_v24, %v4575_v25  ;;  %v5842_v16 = vld [vmem:[%s8869_s3 + $0x37c] sm:$0xf]  ;;  %v5019_v18 = vld [vmem:[%s8869_s3 + $0x384] sm:$0xf0]  ;;  %v4926_v19 = vor.u32 %v5818_v15, %v4923_v11  ;;  %v5779_v24 = vld [vmem:[%s8869_s3 + $0x184] sm:$0xf] }
 0x120   :  { %3460 = vmatpush.bf16.msra.mxu0 %v4626_v21  ;;  %v5755_v21 = vld [vmem:[%s8869_s3 + $0xc4] sm:$0xf]  ;;  %v1549_v41 = vadd.f32 %v1548_v2, %v1535_v17  ;;  %v4767_v25 = vld [vmem:[%s8869_s3 + $0x18c] sm:$0xf0] }
 0x121   :  { %3448 = vmatpush.bf16.msrb.mxu3 %v5462_v22  ;;  %v4674_v33 = vor.u32 %v5755_v21, %v4671_v59  ;;  %v4911_v21 = vld [vmem:[%s8869_s3 + $0x2ac] sm:$0xf0]  ;;  %v5839_v59 = vld [vmem:[%s8869_s3 + $0x364] sm:$0xf] }
 0x122   :  { %3474 = vmatpush.bf16.msra.mxu2 %v4722_v6  ;;  %v5449_v6 = vld [vmem:[%s8869_s3 + $0x6d8] sm:$0xf]  ;;  %v1685_v48 = vmax.f32 %v1549_v41, 0.0 }
 0x123   :  { %3436 = vmatpush.bf16.msrb.mxu1 %v5342_v51  ;;  %v5450_v36 = vor.u32 %v5951_v10, %v5449_v6  ;;  %v5043_v51 = vld [vmem:[%s8869_s3 + $0x3b4] sm:$0xf0] }
 0x124   :  { %3461 = vmatpush.bf16.msra.mxu0 %v4614_v47  ;;  %v4947_v47 = vld [vmem:[%s8869_s3 + $0x2f4] sm:$0xf0]  ;;  %v5046_v63 = vor.u32 %v5848_v50, %v5043_v51  ;;  %v4983_v51 = vld [vmem:[%s8869_s3 + $0x33c] sm:$0xf0] }
 0x125   :  { %v1536_v28 = vpop.f32.mrf.mxu3  ;;  %3449 = vmatpush.bf16.msrb.mxu3 %v5450_v36  ;;  %v4899_v10 = vld [vmem:[%s8869_s3 + $0x294] sm:$0xf0] }
 0x126   :  { %3475 = vmatpush.bf16.msra.mxu2 %v4710_v53  ;;  %v1537_v38 = vadd.f32 %v1536_v28, %v1523_v29  ;;  %v4950_v53 = vor.u32 %v5824_v46, %v4947_v47  ;;  %v1590_v13 = vpop.f32.mrf.mxu1  ;;  %v5007_v29 = vld [vmem:[%s8869_s3 + $0x36c] sm:$0xf0]  ;;  %v4995_v36 = vld [vmem:[%s8869_s3 + $0x354] sm:$0xf0]  ;;  %v5833_v47 = vld [vmem:[%s8869_s3 + $0x334] sm:$0xf] }
 0x127   :  { %3485 = vmatpush.bf16.msra.mxu1 %v4854_v52  ;;  %v5785_v52 = vld [vmem:[%s8869_s3 + $0x1b4] sm:$0xf]  ;;  %v5010_v41 = vor.u32 %v5839_v59, %v5007_v29 }
 0x128   :  { %3462 = vmatpush.bf16.msra.mxu0 %v4602_v3  ;;  %v1551_v49 = vadd.f32 %v1550_v34, %v1537_v38  ;;  %v1562_v57 = vpop.f32.mrf.mxu2  ;;  %v5845_v3 = vld [vmem:[%s8869_s3 + $0x394] sm:$0xf]  ;;  %v4794_v8 = vor.u32 %v5785_v52, %v4791_v62 }
 0x129   :  { %3450 = vmatpush.bf16.msrb.mxu3 %v5438_v45  ;;  %v5034_v37 = vor.u32 %v5845_v3, %v5031_v56  ;;  %v4971_v3 = vld [vmem:[%s8869_s3 + $0x324] sm:$0xf0] }
 0x12a   :  { %3476 = vmatpush.bf16.msra.mxu2 %v4698_v12  ;;  %v1695_v55 = vmax.f32 %v1551_v49, 0.0  ;;  %v242_v12 = vperm.slane %v5974_v9, 7  ;;  %v4887_v49 = vld [vmem:[%s8869_s3 + $0x27c] sm:$0xf0]  ;;  %v5806_v9 = vld [vmem:[%s8869_s3 + $0x25c] sm:$0xf]  ;;  %v4974_v11 = vor.u32 %v5830_v23, %v4971_v3 }
 0x12b   :  { %3486 = vmatpush.bf16.msra.mxu1 %v4842_v60  ;;  %v5782_v60 = vld [vmem:[%s8869_s3 + $0x19c] sm:$0xf]  ;;  %v5935_v23 = vld [vmem:[%s8869_s3 + $0x664] sm:$0xf]  ;;  %v5391_v3 = vld [vmem:[%s8869_s3 + $0x66c] sm:$0xf0] }
 0x12c   :  { %3463 = vmatpush.bf16.msra.mxu0 %v4590_v20  ;;  %v8001_v2 = vpack.c.bf16 %v1695_v55, %v1685_v48  ;;  %v4782_v22 = vor.u32 %v5782_v60, %v4779_v14  ;;  %v1563_v17 = vadd.f32 %v1562_v57, %v242_v12  ;;  %v5809_v48 = vld [vmem:[%s8869_s3 + $0x274] sm:$0xf]  ;;  %v243_v57 = vperm.slane %v8064_v44, 0  ;;  %v5827_v14 = vld [vmem:[%s8869_s3 + $0x304] sm:$0xf] }
 0x12d   :  { %3499 = vmatpush.bf16.msra.mxu3 %v4950_v53  ;;  %v5872_v53 = vld [vmem:[%s8869_s3 + $0x46c] sm:$0xf]  ;;  %v4890_v55 = vor.u32 %v5809_v48, %v4887_v49  ;;  %v5403_v48 = vld [vmem:[%s8869_s3 + $0x684] sm:$0xf0] }
 0x12e   :  { %3477 = vmatpush.bf16.msra.mxu2 %v4686_v26  ;;  %3409 = vmatmul.bf16.vlgmr.msrb.gmra.mxu0 %v8001_v2  ;;  %v5022_v26 = vor.u32 %v5842_v16, %v5019_v18  ;;  %v1592_v34 = vpop.f32.mrf.mxu1  ;;  %v4959_v18 = vld [vmem:[%s8869_s3 + $0x30c] sm:$0xf0] }
 0x12f   :  { %3487 = vmatpush.bf16.msra.mxu1 %v4830_v27  ;;  %v5815_v27 = vld [vmem:[%s8869_s3 + $0x2a4] sm:$0xf] }
 0x130   :  { %3464 = vmatpush.bf16.msra.mxu0 %v4578_v32  ;;  %v4914_v30 = vor.u32 %v5815_v27, %v4911_v21  ;;  %v1564_v31 = vpop.f32.mrf.mxu2  ;;  %v4770_v32 = vor.u32 %v5779_v24, %v4767_v25  ;;  %v5115_v24 = vld [vmem:[%s8869_s3 + $0x444] sm:$0xf0]  ;;  %v5427_v27 = vld [vmem:[%s8869_s3 + $0x6b4] sm:$0xf0]  ;;  %v4962_v21 = vor.u32 %v5827_v14, %v4959_v18 }
 0x131   :  { %3500 = vmatpush.bf16.msra.mxu3 %v4938_v5  ;;  %v1565_v28 = vadd.f32 %v1564_v31, %v242_v12  ;;  %v5869_v5 = vld [vmem:[%s8869_s3 + $0x454] sm:$0xf]  ;;  %v4875_v12 = vld [vmem:[%s8869_s3 + $0x264] sm:$0xf0] }
 0x132   :  { %3478 = vmatpush.bf16.msra.mxu2 %v4674_v33  ;;  %v1576_v20 = vpop.f32.mrf.mxu0  ;;  %v5812_v33 = vld [vmem:[%s8869_s3 + $0x28c] sm:$0xf] }
 0x133   :  { %3488 = vmatpush.bf16.msra.mxu1 %v4818_v35  ;;  %v1577_v6 = vadd.f32 %v1576_v20, %v1563_v17  ;;  %v5836_v35 = vld [vmem:[%s8869_s3 + $0x34c] sm:$0xf]  ;;  %v4902_v58 = vor.u32 %v5812_v33, %v4899_v10  ;;  %v4863_v20 = vld [vmem:[%s8869_s3 + $0x24c] sm:$0xf0]  ;;  %v5866_v17 = vld [vmem:[%s8869_s3 + $0x43c] sm:$0xf] }
 0x134   :  { %3513 = vmatpush.bf16.msrb.mxu0 %v5046_v63  ;;  %v4998_v46 = vor.u32 %v5836_v35, %v4995_v36  ;;  %v4986_v63 = vor.u32 %v5833_v47, %v4983_v51  ;;  %v5415_v33 = vld [vmem:[%s8869_s3 + $0x69c] sm:$0xf0]  ;;  %v5938_v47 = vld [vmem:[%s8869_s3 + $0x67c] sm:$0xf] }
 0x135   :  { %3501 = vmatpush.bf16.msra.mxu3 %v4926_v19  ;;  %v1591_v40 = vadd.f32 %v1590_v13, %v1577_v6  ;;  %v5803_v19 = vld [vmem:[%s8869_s3 + $0x244] sm:$0xf]  ;;  %v5103_v6 = vld [vmem:[%s8869_s3 + $0x42c] sm:$0xf0] }
 0x136   :  { %v4866_v25 = vor.u32 %v5803_v19, %v4863_v20 }
 0x137   :  { %3489 = vmatpush.bf16.msra.mxu1 %v4806_v54  ;;  %v5139_v54 = vld [vmem:[%s8869_s3 + $0x474] sm:$0xf0]  ;;  %v1686_v52 = vmax.f32 %v1591_v40, 0.0 }
 0x138   :  { %3514 = vmatpush.bf16.msrb.mxu0 %v5034_v37  ;;  %v5142_v0 = vor.u32 %v5872_v53, %v5139_v54  ;;  %v1632_v13 = vpop.f32.mrf.mxu2  ;;  %v4878_v37 = vor.u32 %v5806_v9, %v4875_v12  ;;  %v5091_v40 = vld [vmem:[%s8869_s3 + $0x414] sm:$0xf0]  ;;  %v5394_v12 = vor.u32 %v5935_v23, %v5391_v3 }
 0x139   :  { %3502 = vmatpush.bf16.msra.mxu3 %v4914_v30  ;;  %v5118_v30 = vor.u32 %v5866_v17, %v5115_v24  ;;  %v5851_v17 = vld [vmem:[%s8869_s3 + $0x3c4] sm:$0xf]  ;;  %v5055_v24 = vld [vmem:[%s8869_s3 + $0x3cc] sm:$0xf0] }
 0x13a   :  { %v1578_v38 = vpop.f32.mrf.mxu0 }
 0x13b   :  { %3490 = vmatpush.bf16.msra.mxu1 %v4794_v8  ;;  %v1579_v43 = vadd.f32 %v1578_v38, %v1565_v28  ;;  %v5127_v8 = vld [vmem:[%s8869_s3 + $0x45c] sm:$0xf0]  ;;  %v5860_v38 = vld [vmem:[%s8869_s3 + $0x40c] sm:$0xf] }
 0x13c   :  { %3515 = vmatpush.bf16.msrb.mxu0 %v5022_v26  ;;  %v5130_v16 = vor.u32 %v5869_v5, %v5127_v8  ;;  %v5944_v26 = vld [vmem:[%s8869_s3 + $0x6ac] sm:$0xf]  ;;  %v5094_v53 = vor.u32 %v5860_v38, %v5091_v40  ;;  %v244_v5 = vperm.slane %v8064_v44, 1  ;;  %v5890_v44 = vld [vmem:[%s8869_s3 + $0x4fc] sm:$0xf] }
 0x13d   :  { %v1604_v45 = vpop.f32.mrf.mxu3  ;;  %v1593_v50 = vadd.f32 %v1592_v34, %v1579_v43  ;;  %3503 = vmatpush.bf16.msra.mxu3 %v4902_v58  ;;  %v5430_v31 = vor.u32 %v5944_v26, %v5427_v27  ;;  %v5896_v43 = vld [vmem:[%s8869_s3 + $0x52c] sm:$0xf]  ;;  %v5199_v27 = vld [vmem:[%s8869_s3 + $0x4ec] sm:$0xf0] }
 0x13e   :  { %3465 = vmatmul.bf16.vlgmr.msra.gmra.mxu0 %v7527_v4  ;;  %v1605_v15 = vadd.f32 %v1604_v45, %v243_v57 }
 0x13f   :  { %3491 = vmatpush.bf16.msra.mxu1 %v4782_v22  ;;  %v1696_v62 = vmax.f32 %v1593_v50, 0.0 }
 0x140   :  { %3516 = vmatpush.bf16.msrb.mxu0 %v5010_v41  ;;  %v5941_v41 = vld [vmem:[%s8869_s3 + $0x694] sm:$0xf]  ;;  %v1634_v36 = vpop.f32.mrf.mxu2 }
 0x141   :  { %v8092_v56 = vpack.c.bf16 %v1696_v62, %v1686_v52  ;;  %3504 = vmatpush.bf16.msra.mxu3 %v4890_v55  ;;  %v5418_v58 = vor.u32 %v5941_v41, %v5415_v33  ;;  %v5406_v55 = vor.u32 %v5938_v47, %v5403_v48  ;;  %v5857_v52 = vld [vmem:[%s8869_s3 + $0x3f4] sm:$0xf]  ;;  %v5079_v62 = vld [vmem:[%s8869_s3 + $0x3fc] sm:$0xf0]  ;;  %v5920_v47 = vld [vmem:[%s8869_s3 + $0x5ec] sm:$0xf] }
 0x142   :  { %v5082_v8 = vor.u32 %v5857_v52, %v5079_v62  ;;  %v5331_v48 = vld [vmem:[%s8869_s3 + $0x5f4] sm:$0xf0]  ;;  %v5343_v62 = vld [vmem:[%s8869_s3 + $0x60c] sm:$0xf0] }
 0x143   :  { %3492 = vmatpush.bf16.msra.mxu1 %v4770_v32  ;;  %v1618_v60 = vpop.f32.mrf.mxu1  ;;  %3423 = vmatmul.bf16.vlgmr.msrb.gmra.mxu2 %v8092_v56  ;;  %v5863_v32 = vld [vmem:[%s8869_s3 + $0x424] sm:$0xf] }
 0x144   :  { %3517 = vmatpush.bf16.msrb.mxu0 %v4998_v46  ;;  %3527 = vmatpush.bf16.msrb.mxu2 %v5142_v0  ;;  %v1619_v59 = vadd.f32 %v1618_v60, %v1605_v15  ;;  %v5106_v35 = vor.u32 %v5863_v32, %v5103_v6  ;;  %v5235_v46 = vld [vmem:[%s8869_s3 + $0x534] sm:$0xf0]  ;;  %v5223_v0 = vld [vmem:[%s8869_s3 + $0x51c] sm:$0xf0]  ;;  %v5067_v60 = vld [vmem:[%s8869_s3 + $0x3e4] sm:$0xf0]  ;;  %v5058_v32 = vor.u32 %v5851_v17, %v5055_v24 }
 0x145   :  { %v1606_v22 = vpop.f32.mrf.mxu3  ;;  %3505 = vmatpush.bf16.msra.mxu3 %v4878_v37  ;;  %v5238_v54 = vor.u32 %v5896_v43, %v5235_v46  ;;  %v5211_v15 = vld [vmem:[%s8869_s3 + $0x504] sm:$0xf0]  ;;  %v5965_v43 = vld [vmem:[%s8869_s3 + $0x754] sm:$0xf] }
 0x146   :  { %v1607_v29 = vadd.f32 %v1606_v22, %v243_v57  ;;  %v1633_v28 = vadd.f32 %v1632_v13, %v1619_v59  ;;  %v5893_v57 = vld [vmem:[%s8869_s3 + $0x514] sm:$0xf]  ;;  %v5854_v13 = vld [vmem:[%s8869_s3 + $0x3dc] sm:$0xf]  ;;  %v5214_v20 = vor.u32 %v5890_v44, %v5211_v15  ;;  %v5367_v59 = vld [vmem:[%s8869_s3 + $0x63c] sm:$0xf0] }
 0x147   :  { %v5226_v9 = vor.u32 %v5893_v57, %v5223_v0  ;;  %v5070_v19 = vor.u32 %v5854_v13, %v5067_v60  ;;  %v5962_v57 = vld [vmem:[%s8869_s3 + $0x73c] sm:$0xf]  ;;  %v5499_v0 = vld [vmem:[%s8869_s3 + $0x744] sm:$0xf0]  ;;  %v5917_v44 = vld [vmem:[%s8869_s3 + $0x5d4] sm:$0xf] }
 0x148   :  { %3518 = vmatpush.bf16.msrb.mxu0 %v4986_v63  ;;  %3528 = vmatpush.bf16.msrb.mxu2 %v5130_v16  ;;  %v1687_v49 = vmax.f32 %v1633_v28, 0.0  ;;  %v5379_v16 = vld [vmem:[%s8869_s3 + $0x654] sm:$0xf0] }
 0x149   :  { %3506 = vmatpush.bf16.msra.mxu3 %v4866_v25  ;;  %v5887_v25 = vld [vmem:[%s8869_s3 + $0x4e4] sm:$0xf] }
 0x14a   :  { %v5202_v41 = vor.u32 %v5887_v25, %v5199_v27  ;;  %v5914_v25 = vld [vmem:[%s8869_s3 + $0x5bc] sm:$0xf] }
 0x14b   :  { %v1620_v10 = vpop.f32.mrf.mxu1 }
 0x14c   :  { %3519 = vmatpush.bf16.msrb.mxu0 %v4974_v11  ;;  %v1621_v34 = vadd.f32 %v1620_v10, %v1607_v29  ;;  %3529 = vmatpush.bf16.msrb.mxu2 %v5118_v30  ;;  %v5932_v11 = vld [vmem:[%s8869_s3 + $0x64c] sm:$0xf] }
 0x14d   :  { %v1674_v14 = vpop.f32.mrf.mxu3  ;;  %v5382_v22 = vor.u32 %v5932_v11, %v5379_v16  ;;  %v5968_v30 = vld [vmem:[%s8869_s3 + $0x76c] sm:$0xf]  ;;  %v5878_v11 = vld [vmem:[%s8869_s3 + $0x49c] sm:$0xf]  ;;  %v5163_v16 = vld [vmem:[%s8869_s3 + $0x4a4] sm:$0xf0] }
 0x14e   :  { %v1635_v45 = vadd.f32 %v1634_v36, %v1621_v34  ;;  %v5884_v10 = vld [vmem:[%s8869_s3 + $0x4cc] sm:$0xf]  ;;  %v5926_v36 = vld [vmem:[%s8869_s3 + $0x61c] sm:$0xf]  ;;  %v5166_v24 = vor.u32 %v5878_v11, %v5163_v16  ;;  %v5745_v11 = vld [vmem:[%s8869_s3 + $0x70] sm:$0xf0] }
 0x14f   :  { %v4797_v16 = vld [vmem:[%s8869_s3 + $0x1b8] sm:$0xf] }
 0x150   :  { %3520 = vmatpush.bf16.msrb.mxu0 %v4962_v21  ;;  %v1697_v50 = vmax.f32 %v1635_v45, 0.0  ;;  %3530 = vmatpush.bf16.msrb.mxu2 %v5106_v35  ;;  %v5929_v21 = vld [vmem:[%s8869_s3 + $0x634] sm:$0xf]  ;;  %v5187_v35 = vld [vmem:[%s8869_s3 + $0x4d4] sm:$0xf0] }
 0x151   :  { %v5370_v33 = vor.u32 %v5929_v21, %v5367_v59  ;;  %v5511_v45 = vld [vmem:[%s8869_s3 + $0x75c] sm:$0xf0]  ;;  %v5875_v59 = vld [vmem:[%s8869_s3 + $0x484] sm:$0xf] }
 0x152   :  { %v1646_v51 = vpop.f32.mrf.mxu0  ;;  %v8171_v63 = vpack.c.bf16 %v1697_v50, %v1687_v49  ;;  %v5190_v50 = vor.u32 %v5884_v10, %v5187_v35  ;;  %v5514_v52 = vor.u32 %v5965_v43, %v5511_v45  ;;  %v5796_v10 = vld [vmem:[%s8869_s3 + $0x208] sm:$0xf0]  ;;  %v5295_v35 = vld [vmem:[%s8869_s3 + $0x5ac] sm:$0xf0]  ;;  %v5463_v43 = vld [vmem:[%s8869_s3 + $0x6fc] sm:$0xf0] }
 0x153   :  { %3521 = vmatmul.bf16.vlgmr.msrb.gmra.mxu0 %v7780_v42  ;;  %3479 = vmatmul.bf16.vlgmr.msra.gmra.mxu2 %v7529_v7  ;;  %v1647_v18 = vadd.f32 %v1646_v51, %v244_v5  ;;  %v4653_v45 = vld [vmem:[%s8869_s3 + $0x98] sm:$0xf] }
 0x154   :  { %3569 = vmatpush.bf16.msra.mxu0 %v5430_v31  ;;  %3437 = vmatmul.bf16.vlgmr.msrb.gmra.mxu1 %v8171_v63  ;;  %v5523_v31 = vld [vmem:[%s8869_s3 + $0x774] sm:$0xf0] }
 0x155   :  { %3531 = vmatpush.bf16.msrb.mxu2 %v5094_v53  ;;  %3541 = vmatpush.bf16.msrb.mxu1 %v5238_v54  ;;  %v5526_v34 = vor.u32 %v5968_v30, %v5523_v31  ;;  %v1676_v46 = vpop.f32.mrf.mxu3  ;;  %v5881_v53 = vld [vmem:[%s8869_s3 + $0x4b4] sm:$0xf]  ;;  %v5175_v54 = vld [vmem:[%s8869_s3 + $0x4bc] sm:$0xf0]  ;;  %v5956_v30 = vld [vmem:[%s8869_s3 + $0x70c] sm:$0xf] }
 0x156   :  { %v5178_v13 = vor.u32 %v5881_v53, %v5175_v54  ;;  %v5475_v31 = vld [vmem:[%s8869_s3 + $0x714] sm:$0xf0] }
 0x158   :  { %3570 = vmatpush.bf16.msra.mxu0 %v5418_v58  ;;  %v1660_v37 = vpop.f32.mrf.mxu2  ;;  %v5355_v58 = vld [vmem:[%s8869_s3 + $0x624] sm:$0xf0] }
 0x159   :  { %3532 = vmatpush.bf16.msrb.mxu2 %v5082_v8  ;;  %3542 = vmatpush.bf16.msrb.mxu1 %v5226_v9  ;;  %v1661_v29 = vadd.f32 %v1660_v37, %v1647_v18  ;;  %v5358_v51 = vor.u32 %v5926_v36, %v5355_v58  ;;  %v5802_v8 = vld [vmem:[%s8869_s3 + $0x238] sm:$0xf0]  ;;  %v5334_v9 = vor.u32 %v5920_v47, %v5331_v48  ;;  %v5959_v18 = vld [vmem:[%s8869_s3 + $0x724] sm:$0xf]  ;;  %v4821_v48 = vld [vmem:[%s8869_s3 + $0x1e8] sm:$0xf] }
 0x15a   :  { %v1648_v26 = vpop.f32.mrf.mxu0  ;;  %v5502_v37 = vor.u32 %v5962_v57, %v5499_v0  ;;  %v5478_v36 = vor.u32 %v5956_v30, %v5475_v31  ;;  %v4641_v57 = vld [vmem:[%s8869_s3 + $0x80] sm:$0xf]  ;;  %v5748_v0 = vld [vmem:[%s8869_s3 + $0x88] sm:$0xf0] }
 0x15b   :  { %v1649_v6 = vadd.f32 %v1648_v26, %v244_v5  ;;  %v1675_v38 = vadd.f32 %v1674_v14, %v1661_v29  ;;  %v4857_v5 = vld [vmem:[%s8869_s3 + $0x230] sm:$0xf]  ;;  %v5319_v14 = vld [vmem:[%s8869_s3 + $0x5dc] sm:$0xf0]  ;;  %v5307_v26 = vld [vmem:[%s8869_s3 + $0x5c4] sm:$0xf0] }
 0x15c   :  { %3571 = vmatpush.bf16.msra.mxu0 %v5406_v55  ;;  %v5923_v55 = vld [vmem:[%s8869_s3 + $0x604] sm:$0xf]  ;;  %v4858_v15 = vor.u32 %v5802_v8, %v4857_v5  ;;  %v5322_v17 = vor.u32 %v5917_v44, %v5319_v14  ;;  %v5151_v29 = vld [vmem:[%s8869_s3 + $0x48c] sm:$0xf0]  ;;  %v5790_v5 = vld [vmem:[%s8869_s3 + $0x1d8] sm:$0xf0] }
 0x15d   :  { %3533 = vmatpush.bf16.msrb.mxu2 %v5070_v19  ;;  %3543 = vmatpush.bf16.msrb.mxu1 %v5214_v20  ;;  %v1688_v23 = vmax.f32 %v1675_v38, 0.0  ;;  %v5346_v60 = vor.u32 %v5923_v55, %v5343_v62  ;;  %v5487_v19 = vld [vmem:[%s8869_s3 + $0x72c] sm:$0xf0]  ;;  %v4845_v20 = vld [vmem:[%s8869_s3 + $0x218] sm:$0xf] }
 0x15e   :  { %v5490_v27 = vor.u32 %v5959_v18, %v5487_v19  ;;  %v5953_v38 = vld [vmem:[%s8869_s3 + $0x6f4] sm:$0xf]  ;;  %v5950_v55 = vld [vmem:[%s8869_s3 + $0x6dc] sm:$0xf]  ;;  %v5451_v62 = vld [vmem:[%s8869_s3 + $0x6e4] sm:$0xf0] }
 0x15f   :  { %v5466_v53 = vor.u32 %v5953_v38, %v5463_v43  ;;  %v5905_v8 = vld [vmem:[%s8869_s3 + $0x574] sm:$0xf]  ;;  %v5947_v44 = vld [vmem:[%s8869_s3 + $0x6c4] sm:$0xf]  ;;  %v5439_v14 = vld [vmem:[%s8869_s3 + $0x6cc] sm:$0xf0] }
 0x160   :  { %3572 = vmatpush.bf16.msra.mxu0 %v5394_v12  ;;  %v1662_v28 = vpop.f32.mrf.mxu2  ;;  %v5787_v19 = vld [vmem:[%s8869_s3 + $0x1c0] sm:$0xf0]  ;;  %v4785_v30 = vld [vmem:[%s8869_s3 + $0x1a0] sm:$0xf]  ;;  %v4605_v38 = vld [vmem:[%s8869_s3 + $0x38] sm:$0xf] }
 0x161   :  { %v1663_v40 = vadd.f32 %v1662_v28, %v1649_v6  ;;  %3534 = vmatpush.bf16.msrb.mxu2 %v5058_v32  ;;  %3544 = vmatpush.bf16.msrb.mxu1 %v5202_v41  ;;  %v4665_v32 = vld [vmem:[%s8869_s3 + $0xb0] sm:$0xf]  ;;  %v5754_v6 = vld [vmem:[%s8869_s3 + $0xb8] sm:$0xf0]  ;;  %v5310_v41 = vor.u32 %v5914_v25, %v5307_v26  ;;  %v5154_v28 = vor.u32 %v5875_v59, %v5151_v29  ;;  %v4773_v43 = vld [vmem:[%s8869_s3 + $0x188] sm:$0xf] }
 0x162   :  { %v4666_v58 = vor.u32 %v5754_v6, %v4665_v32  ;;  %v5442_v25 = vor.u32 %v5947_v44, %v5439_v14  ;;  %v4617_v59 = vld [vmem:[%s8869_s3 + $0x50] sm:$0xf]  ;;  %v5742_v29 = vld [vmem:[%s8869_s3 + $0x58] sm:$0xf0]  ;;  %v5784_v32 = vld [vmem:[%s8869_s3 + $0x1a8] sm:$0xf0] }
 0x163   :  { %v1677_v49 = vadd.f32 %v1676_v46, %v1663_v40  ;;  %v5751_v46 = vld [vmem:[%s8869_s3 + $0xa0] sm:$0xf0]  ;;  %v4941_v6 = vld [vmem:[%s8869_s3 + $0x2d8] sm:$0xf]  ;;  %v4737_v44 = vld [vmem:[%s8869_s3 + $0x140] sm:$0xf] }
 0x164   :  { %3573 = vmatpush.bf16.msra.mxu0 %v5382_v22  ;;  %3535 = vmatmul.bf16.vlgmr.msrb.gmra.mxu2 %v7910_v1  ;;  %v5799_v22 = vld [vmem:[%s8869_s3 + $0x220] sm:$0xf0]  ;;  %v4654_v54 = vor.u32 %v5751_v46, %v4653_v45  ;;  %v5781_v46 = vld [vmem:[%s8869_s3 + $0x190] sm:$0xf0]  ;;  %v5772_v14 = vld [vmem:[%s8869_s3 + $0x148] sm:$0xf0] }
 0x165   :  { %3583 = vmatpush.bf16.msra.mxu2 %v5526_v34  ;;  %v1698_v3 = vmax.f32 %v1677_v49, 0.0  ;;  %3493 = vmatmul.bf16.vlgmr.msra.gmra.mxu1 %v7615_v61  ;;  %v4846_v21 = vor.u32 %v5799_v22, %v4845_v20  ;;  %v5911_v34 = vld [vmem:[%s8869_s3 + $0x5a4] sm:$0xf]  ;;  %v5793_v49 = vld [vmem:[%s8869_s3 + $0x1f0] sm:$0xf0] }
 0x166   :  { %3545 = vmatpush.bf16.msrb.mxu1 %v5190_v50  ;;  %v5298_v47 = vor.u32 %v5911_v34, %v5295_v35  ;;  %v5908_v50 = vld [vmem:[%s8869_s3 + $0x58c] sm:$0xf]  ;;  %v4953_v20 = vld [vmem:[%s8869_s3 + $0x2f0] sm:$0xf]  ;;  %v5826_v22 = vld [vmem:[%s8869_s3 + $0x2f8] sm:$0xf0] }
 0x167   :  { %v8277_v12 = vpack.c.bf16 %v1698_v3, %v1688_v23  ;;  %v4809_v3 = vld [vmem:[%s8869_s3 + $0x1d0] sm:$0xf]  ;;  %v5778_v35 = vld [vmem:[%s8869_s3 + $0x178] sm:$0xf0] }
 0x168   :  { %3574 = vmatpush.bf16.msra.mxu0 %v5370_v33  ;;  %v4833_v33 = vld [vmem:[%s8869_s3 + $0x200] sm:$0xf]  ;;  %v4761_v34 = vld [vmem:[%s8869_s3 + $0x170] sm:$0xf] }
 0x169   :  { %3584 = vmatpush.bf16.msra.mxu2 %v5514_v52  ;;  %3451 = vmatmul.bf16.vlgmr.msrb.gmra.mxu3 %v8277_v12  ;;  %v4834_v40 = vor.u32 %v5796_v10, %v4833_v33  ;;  %v4822_v52 = vor.u32 %v5793_v49, %v4821_v48  ;;  %v5899_v33 = vld [vmem:[%s8869_s3 + $0x544] sm:$0xf]  ;;  %v5247_v10 = vld [vmem:[%s8869_s3 + $0x54c] sm:$0xf0]  ;;  %v5820_v48 = vld [vmem:[%s8869_s3 + $0x2c8] sm:$0xf0]  ;;  %v4762_v49 = vor.u32 %v5778_v35, %v4761_v34 }
 0x16a   :  { %3555 = vmatpush.bf16.msrb.mxu3 %v5334_v9  ;;  %3546 = vmatpush.bf16.msrb.mxu1 %v5178_v13  ;;  %v5271_v9 = vld [vmem:[%s8869_s3 + $0x57c] sm:$0xf0]  ;;  %v5454_v13 = vor.u32 %v5950_v55, %v5451_v62  ;;  %v5250_v45 = vor.u32 %v5899_v33, %v5247_v10  ;;  %v5775_v55 = vld [vmem:[%s8869_s3 + $0x160] sm:$0xf0]  ;;  %v5205_v33 = vld [vmem:[%s8869_s3 + $0x4e8] sm:$0xf] }
 0x16b   :  { %v5274_v18 = vor.u32 %v5905_v8, %v5271_v9  ;;  %v5229_v9 = vld [vmem:[%s8869_s3 + $0x518] sm:$0xf]  ;;  %v5889_v10 = vld [vmem:[%s8869_s3 + $0x4f0] sm:$0xf0]  ;;  %v5766_v34 = vld [vmem:[%s8869_s3 + $0x118] sm:$0xf0] }
 0x16c   :  { %3575 = vmatpush.bf16.msra.mxu0 %v5358_v51  ;;  %v5283_v51 = vld [vmem:[%s8869_s3 + $0x594] sm:$0xf0] }
 0x16d   :  { %3585 = vmatpush.bf16.msra.mxu2 %v5502_v37  ;;  %v5286_v23 = vor.u32 %v5908_v50, %v5283_v51  ;;  %v4810_v37 = vor.u32 %v5790_v5, %v4809_v3  ;;  %v5241_v50 = vld [vmem:[%s8869_s3 + $0x530] sm:$0xf]  ;;  %v5898_v51 = vld [vmem:[%s8869_s3 + $0x538] sm:$0xf0]  ;;  %v4917_v3 = vld [vmem:[%s8869_s3 + $0x2a8] sm:$0xf] }
 0x16e   :  { %3556 = vmatpush.bf16.msrb.mxu3 %v5322_v17  ;;  %3547 = vmatpush.bf16.msrb.mxu1 %v5166_v24  ;;  %v5902_v17 = vld [vmem:[%s8869_s3 + $0x55c] sm:$0xf]  ;;  %v5259_v24 = vld [vmem:[%s8869_s3 + $0x564] sm:$0xf0]  ;;  %v5817_v5 = vld [vmem:[%s8869_s3 + $0x2b0] sm:$0xf0] }
 0x16f   :  { %v5262_v31 = vor.u32 %v5902_v17, %v5259_v24  ;;  %v4738_v17 = vor.u32 %v5772_v14, %v4737_v44  ;;  %v5217_v24 = vld [vmem:[%s8869_s3 + $0x500] sm:$0xf] }
 0x170   :  { %3576 = vmatpush.bf16.msra.mxu0 %v5346_v60  ;;  %v4642_v60 = vor.u32 %v5748_v0, %v4641_v57  ;;  %v4593_v57 = vld [vmem:[%s8869_s3 + $0x20] sm:$0xf]  ;;  %v5736_v0 = vld [vmem:[%s8869_s3 + $0x28] sm:$0xf0] }
 0x171   :  { %3586 = vmatpush.bf16.msra.mxu2 %v5490_v27  ;;  %v4798_v27 = vor.u32 %v5787_v19, %v4797_v16  ;;  %v4905_v16 = vld [vmem:[%s8869_s3 + $0x290] sm:$0xf]  ;;  %v5814_v19 = vld [vmem:[%s8869_s3 + $0x298] sm:$0xf0] }
 0x172   :  { %3557 = vmatpush.bf16.msrb.mxu3 %v5310_v41  ;;  %3548 = vmatpush.bf16.msrb.mxu1 %v5154_v28  ;;  %v5823_v41 = vld [vmem:[%s8869_s3 + $0x2e0] sm:$0xf0]  ;;  %v4618_v28 = vor.u32 %v5742_v29, %v4617_v59  ;;  %v4906_v59 = vor.u32 %v5814_v19, %v4905_v16  ;;  %v5325_v19 = vld [vmem:[%s8869_s3 + $0x5d8] sm:$0xf] }
 0x173   :  { %3577 = vmatmul.bf16.vlgmr.msra.gmra.mxu0 %v8171_v63 }
 0x174   :  { %3625 = vmatpush.bf16.msrb.mxu0 %v4858_v15  ;;  %v4629_v15 = vld [vmem:[%s8869_s3 + $0x68] sm:$0xf] }
 0x175   :  { %3587 = vmatpush.bf16.msra.mxu2 %v5478_v36  ;;  %3549 = vmatmul.bf16.vlgmr.msrb.gmra.mxu1 %v8001_v2  ;;  %v4630_v26 = vor.u32 %v5745_v11, %v4629_v15  ;;  %v4786_v36 = vor.u32 %v5784_v32, %v4785_v30  ;;  %v4581_v15 = vld [vmem:[%s8869_s3 + $0x8] sm:$0xf]  ;;  %v5733_v11 = vld [vmem:[%s8869_s3 + $0x10] sm:$0xf0]  ;;  %v4893_v30 = vld [vmem:[%s8869_s3 + $0x278] sm:$0xf] }
 0x176   :  { %3597 = vmatpush.bf16.msra.mxu1 %v4666_v58  ;;  %3558 = vmatpush.bf16.msrb.mxu3 %v5298_v47  ;;  %v4942_v58 = vor.u32 %v5823_v41, %v4941_v6  ;;  %v4929_v47 = vld [vmem:[%s8869_s3 + $0x2c0] sm:$0xf]  ;;  %v5037_v32 = vld [vmem:[%s8869_s3 + $0x398] sm:$0xf]  ;;  %v5847_v6 = vld [vmem:[%s8869_s3 + $0x3a0] sm:$0xf0] }
 0x177   :  { %v4930_v62 = vor.u32 %v5820_v48, %v4929_v47  ;;  %v5193_v47 = vld [vmem:[%s8869_s3 + $0x4d0] sm:$0xf]  ;;  %v5886_v48 = vld [vmem:[%s8869_s3 + $0x4d8] sm:$0xf0] }
 0x178   :  { %3626 = vmatpush.bf16.msrb.mxu0 %v4846_v21  ;;  %v4954_v21 = vor.u32 %v5826_v22, %v4953_v20  ;;  %v5049_v20 = vld [vmem:[%s8869_s3 + $0x3b0] sm:$0xf]  ;;  %v5850_v22 = vld [vmem:[%s8869_s3 + $0x3b8] sm:$0xf0] }
 0x179   :  { %3588 = vmatpush.bf16.msra.mxu2 %v5466_v53  ;;  %3507 = vmatmul.bf16.vlgmr.msra.gmra.mxu3 %v7686_v39  ;;  %v5050_v29 = vor.u32 %v5850_v22, %v5049_v20  ;;  %v5919_v20 = vld [vmem:[%s8869_s3 + $0x5e0] sm:$0xf0]  ;;  %v4677_v22 = vld [vmem:[%s8869_s3 + $0xc8] sm:$0xf] }
 0x17a   :  { %3598 = vmatpush.bf16.msra.mxu1 %v4654_v54  ;;  %3559 = vmatpush.bf16.msrb.mxu3 %v5286_v23  ;;  %v4749_v54 = vld [vmem:[%s8869_s3 + $0x158] sm:$0xf]  ;;  %v5242_v23 = vor.u32 %v5898_v51, %v5241_v50  ;;  %v5763_v50 = vld [vmem:[%s8869_s3 + $0x100] sm:$0xf0] }
 0x17b   :  { %v4750_v8 = vor.u32 %v5775_v55, %v4749_v54  ;;  %v5805_v54 = vld [vmem:[%s8869_s3 + $0x250] sm:$0xf0]  ;;  %v5194_v55 = vor.u32 %v5886_v48, %v5193_v47  ;;  %v4965_v47 = vld [vmem:[%s8869_s3 + $0x308] sm:$0xf] }
 0x17c   :  { %3627 = vmatpush.bf16.msrb.mxu0 %v4834_v40  ;;  %v5739_v40 = vld [vmem:[%s8869_s3 + $0x40] sm:$0xf0]  ;;  %v5829_v48 = vld [vmem:[%s8869_s3 + $0x310] sm:$0xf0] }
 0x17d   :  { %3589 = vmatpush.bf16.msra.mxu2 %v5454_v13  ;;  %v4606_v53 = vor.u32 %v5739_v40, %v4605_v38  ;;  %v5895_v13 = vld [vmem:[%s8869_s3 + $0x520] sm:$0xf0]  ;;  %v5206_v38 = vor.u32 %v5889_v10, %v5205_v33  ;;  %v5808_v40 = vld [vmem:[%s8869_s3 + $0x268] sm:$0xf0]  ;;  %v5133_v10 = vld [vmem:[%s8869_s3 + $0x458] sm:$0xf] }
 0x17e   :  { %3599 = vmatpush.bf16.msra.mxu1 %v4642_v60  ;;  %3560 = vmatpush.bf16.msrb.mxu3 %v5274_v18  ;;  %v4594_v60 = vor.u32 %v5736_v0, %v4593_v57  ;;  %v5230_v18 = vor.u32 %v5895_v13, %v5229_v9  ;;  %v5181_v57 = vld [vmem:[%s8869_s3 + $0x4b8] sm:$0xf]  ;;  %v5760_v9 = vld [vmem:[%s8869_s3 + $0xe8] sm:$0xf0] }
 0x180   :  { %3628 = vmatpush.bf16.msrb.mxu0 %v4822_v52  ;;  %v4774_v52 = vor.u32 %v5781_v46, %v4773_v43  ;;  %v5025_v43 = vld [vmem:[%s8869_s3 + $0x380] sm:$0xf] }
 0x181   :  { %3590 = vmatpush.bf16.msra.mxu2 %v5442_v25  ;;  %v5892_v25 = vld [vmem:[%s8869_s3 + $0x508] sm:$0xf0] }
 0x182   :  { %3600 = vmatpush.bf16.msra.mxu1 %v4630_v26  ;;  %3561 = vmatpush.bf16.msrb.mxu3 %v5262_v31  ;;  %v4582_v26 = vor.u32 %v5733_v11, %v4581_v15  ;;  %v5218_v31 = vor.u32 %v5892_v25, %v5217_v24  ;;  %v5838_v15 = vld [vmem:[%s8869_s3 + $0x358] sm:$0xf0]  ;;  %v5169_v11 = vld [vmem:[%s8869_s3 + $0x4a0] sm:$0xf]  ;;  %v5145_v25 = vld [vmem:[%s8869_s3 + $0x470] sm:$0xf] }
 0x184   :  { %3629 = vmatpush.bf16.msrb.mxu0 %v4810_v37  ;;  %3591 = vmatmul.bf16.vlgmr.msra.gmra.mxu2 %v8277_v12  ;;  %v4918_v37 = vor.u32 %v5817_v5, %v4917_v3  ;;  %v5337_v3 = vld [vmem:[%s8869_s3 + $0x5f0] sm:$0xf]  ;;  %v5922_v5 = vld [vmem:[%s8869_s3 + $0x5f8] sm:$0xf0] }
 0x185   :  { %3639 = vmatpush.bf16.msrb.mxu2 %v4954_v21  ;;  %v5769_v21 = vld [vmem:[%s8869_s3 + $0x130] sm:$0xf0]  ;;  %v5338_v14 = vor.u32 %v5922_v5, %v5337_v3  ;;  %v5277_v3 = vld [vmem:[%s8869_s3 + $0x578] sm:$0xf]  ;;  %v5907_v5 = vld [vmem:[%s8869_s3 + $0x580] sm:$0xf0] }
 0x186   :  { %3601 = vmatpush.bf16.msra.mxu1 %v4618_v28  ;;  %3562 = vmatpush.bf16.msrb.mxu3 %v5250_v45  ;;  %v4713_v28 = vld [vmem:[%s8869_s3 + $0x110] sm:$0xf]  ;;  %v5844_v45 = vld [vmem:[%s8869_s3 + $0x388] sm:$0xf0] }
 0x187   :  { %v4714_v46 = vor.u32 %v5766_v34, %v4713_v28  ;;  %v5026_v51 = vor.u32 %v5844_v45, %v5025_v43  ;;  %v5871_v28 = vld [vmem:[%s8869_s3 + $0x460] sm:$0xf0]  ;;  %v4977_v34 = vld [vmem:[%s8869_s3 + $0x320] sm:$0xf] }
 0x188   :  { %3630 = vmatpush.bf16.msrb.mxu0 %v4798_v27  ;;  %v4725_v27 = vld [vmem:[%s8869_s3 + $0x128] sm:$0xf]  ;;  %v5121_v45 = vld [vmem:[%s8869_s3 + $0x440] sm:$0xf] }
 0x189   :  { %3640 = vmatpush.bf16.msrb.mxu2 %v4942_v58  ;;  %3563 = vmatmul.bf16.vlgmr.msrb.gmra.mxu3 %v8092_v56  ;;  %v4726_v41 = vor.u32 %v5769_v21, %v4725_v27  ;;  %v4881_v58 = vld [vmem:[%s8869_s3 + $0x260] sm:$0xf]  ;;  %v5326_v21 = vor.u32 %v5919_v20, %v5325_v19  ;;  %v5397_v20 = vld [vmem:[%s8869_s3 + $0x668] sm:$0xf] }
 0x18a   :  { %3611 = vmatpush.bf16.msra.mxu3 %v4762_v49  ;;  %3602 = vmatpush.bf16.msra.mxu1 %v4606_v53  ;;  %v4701_v49 = vld [vmem:[%s8869_s3 + $0xf8] sm:$0xf]  ;;  %v4869_v53 = vld [vmem:[%s8869_s3 + $0x248] sm:$0xf] }
 0x18b   :  { %v4702_v0 = vor.u32 %v5763_v50, %v4701_v49  ;;  %v4870_v13 = vor.u32 %v5805_v54, %v4869_v53  ;;  %v5433_v50 = vld [vmem:[%s8869_s3 + $0x6b0] sm:$0xf]  ;;  %v5910_v53 = vld [vmem:[%s8869_s3 + $0x598] sm:$0xf0]  ;;  %v4966_v54 = vor.u32 %v5829_v48, %v4965_v47  ;;  %v5505_v47 = vld [vmem:[%s8869_s3 + $0x740] sm:$0xf] }
 0x18c   :  { %3631 = vmatpush.bf16.msrb.mxu0 %v4786_v36  ;;  %v5038_v36 = vor.u32 %v5847_v6, %v5037_v32  ;;  %v5313_v6 = vld [vmem:[%s8869_s3 + $0x5c0] sm:$0xf]  ;;  %v5964_v48 = vld [vmem:[%s8869_s3 + $0x748] sm:$0xf0] }
 0x18d   :  { %3641 = vmatpush.bf16.msrb.mxu2 %v4930_v62  ;;  %v5841_v62 = vld [vmem:[%s8869_s3 + $0x370] sm:$0xf0] }
 0x18e   :  { %3612 = vmatpush.bf16.msra.mxu3 %v4750_v8  ;;  %3603 = vmatpush.bf16.msra.mxu1 %v4594_v60  ;;  %v4689_v8 = vld [vmem:[%s8869_s3 + $0xe0] sm:$0xf] }
 0x18f   :  { %v4690_v16 = vor.u32 %v5760_v9, %v4689_v8  ;;  %v5097_v8 = vld [vmem:[%s8869_s3 + $0x410] sm:$0xf]  ;;  %v5862_v9 = vld [vmem:[%s8869_s3 + $0x418] sm:$0xf0] }
 0x190   :  { %3632 = vmatpush.bf16.msrb.mxu0 %v4774_v52  ;;  %v5013_v52 = vld [vmem:[%s8869_s3 + $0x368] sm:$0xf] }
 0x191   :  { %3642 = vmatpush.bf16.msrb.mxu2 %v4918_v37  ;;  %v5014_v60 = vor.u32 %v5841_v62, %v5013_v52  ;;  %v5001_v37 = vld [vmem:[%s8869_s3 + $0x350] sm:$0xf]  ;;  %v5865_v52 = vld [vmem:[%s8869_s3 + $0x430] sm:$0xf0] }
 0x192   :  { %3613 = vmatpush.bf16.msra.mxu3 %v4738_v17  ;;  %3604 = vmatpush.bf16.msra.mxu1 %v4582_v26  ;;  %v5757_v17 = vld [vmem:[%s8869_s3 + $0xd0] sm:$0xf0]  ;;  %v5002_v24 = vor.u32 %v5838_v15, %v5001_v37  ;;  %v5874_v26 = vld [vmem:[%s8869_s3 + $0x478] sm:$0xf0]  ;;  %v5098_v37 = vor.u32 %v5862_v9, %v5097_v8  ;;  %v5265_v15 = vld [vmem:[%s8869_s3 + $0x560] sm:$0xf] }
 0x193   :  { %3633 = vmatmul.bf16.vlgmr.msrb.gmra.mxu0 %v7615_v61  ;;  %v5811_v61 = vld [vmem:[%s8869_s3 + $0x280] sm:$0xf0]  ;;  %v5146_v32 = vor.u32 %v5874_v26, %v5145_v25  ;;  %v5901_v25 = vld [vmem:[%s8869_s3 + $0x550] sm:$0xf0]  ;;  %v5073_v26 = vld [vmem:[%s8869_s3 + $0x3e0] sm:$0xf] }
 0x194   :  { %3681 = vmatpush.bf16.msra.mxu0 %v5242_v23  ;;  %v4894_v35 = vor.u32 %v5811_v61, %v4893_v30  ;;  %v5883_v23 = vld [vmem:[%s8869_s3 + $0x4c0] sm:$0xf0]  ;;  %v4678_v30 = vor.u32 %v5757_v17, %v4677_v22  ;;  %v5877_v61 = vld [vmem:[%s8869_s3 + $0x490] sm:$0xf0] }
 0x195   :  { %3643 = vmatpush.bf16.msrb.mxu2 %v4906_v59  ;;  %3605 = vmatmul.bf16.vlgmr.msra.gmra.mxu1 %v7527_v4  ;;  %v4882_v4 = vor.u32 %v5808_v40, %v4881_v58  ;;  %v5182_v44 = vor.u32 %v5883_v23, %v5181_v57  ;;  %v4989_v59 = vld [vmem:[%s8869_s3 + $0x338] sm:$0xf]  ;;  %v5134_v58 = vor.u32 %v5871_v28, %v5133_v10  ;;  %v5913_v40 = vld [vmem:[%s8869_s3 + $0x5b0] sm:$0xf0]  ;;  %v5931_v28 = vld [vmem:[%s8869_s3 + $0x640] sm:$0xf0] }
 0x196   :  { %3653 = vmatpush.bf16.msrb.mxu1 %v5050_v29  ;;  %3614 = vmatpush.bf16.msra.mxu3 %v4726_v41  ;;  %v5835_v29 = vld [vmem:[%s8869_s3 + $0x340] sm:$0xf0]  ;;  %v5916_v41 = vld [vmem:[%s8869_s3 + $0x5c8] sm:$0xf0]  ;;  %v5937_v22 = vld [vmem:[%s8869_s3 + $0x670] sm:$0xf0] }
 0x197   :  { %v4990_v33 = vor.u32 %v5835_v29, %v4989_v59  ;;  %v5385_v29 = vld [vmem:[%s8869_s3 + $0x650] sm:$0xf]  ;;  %v5373_v10 = vld [vmem:[%s8869_s3 + $0x638] sm:$0xf] }
 0x198   :  { %3682 = vmatpush.bf16.msra.mxu0 %v5230_v18  ;;  %v5880_v18 = vld [vmem:[%s8869_s3 + $0x4a8] sm:$0xf0] }
 0x199   :  { %3644 = vmatpush.bf16.msrb.mxu2 %v4894_v35  ;;  %v5170_v27 = vor.u32 %v5880_v18, %v5169_v11  ;;  %v5832_v35 = vld [vmem:[%s8869_s3 + $0x328] sm:$0xf0]  ;;  %v5859_v18 = vld [vmem:[%s8869_s3 + $0x400] sm:$0xf0] }
 0x19a   :  { %3654 = vmatpush.bf16.msrb.mxu1 %v5038_v36  ;;  %3615 = vmatpush.bf16.msra.mxu3 %v4714_v46  ;;  %v5314_v36 = vor.u32 %v5916_v41, %v5313_v6  ;;  %v4978_v43 = vor.u32 %v5832_v35, %v4977_v34  ;;  %v5868_v46 = vld [vmem:[%s8869_s3 + $0x448] sm:$0xf0]  ;;  %v5529_v41 = vld [vmem:[%s8869_s3 + $0x770] sm:$0xf]  ;;  %v3326_v34 = vpop.f32.mrf.mxu1 }
 0x19b   :  { %v5904_v11 = vld [vmem:[%s8869_s3 + $0x568] sm:$0xf0] }
 0x19c   :  { %3683 = vmatpush.bf16.msra.mxu0 %v5218_v31  ;;  %v5157_v31 = vld [vmem:[%s8869_s3 + $0x488] sm:$0xf]  ;;  %v5266_v19 = vor.u32 %v5904_v11, %v5265_v15 }
 0x19d   :  { %3645 = vmatpush.bf16.msrb.mxu2 %v4882_v4  ;;  %v5946_v4 = vld [vmem:[%s8869_s3 + $0x6b8] sm:$0xf0]  ;;  %v5445_v11 = vld [vmem:[%s8869_s3 + $0x6c8] sm:$0xf] }
 0x19e   :  { %3655 = vmatpush.bf16.msrb.mxu1 %v5026_v51  ;;  %3616 = vmatpush.bf16.msra.mxu3 %v4702_v0  ;;  %v5289_v51 = vld [vmem:[%s8869_s3 + $0x590] sm:$0xf]  ;;  %v5434_v62 = vor.u32 %v5946_v4, %v5433_v50  ;;  %v5421_v0 = vld [vmem:[%s8869_s3 + $0x698] sm:$0xf]  ;;  %v5349_v50 = vld [vmem:[%s8869_s3 + $0x608] sm:$0xf] }
 0x19f   :  { %v5290_v57 = vor.u32 %v5910_v53, %v5289_v51  ;;  %v5925_v4 = vld [vmem:[%s8869_s3 + $0x610] sm:$0xf0]  ;;  %v5493_v53 = vld [vmem:[%s8869_s3 + $0x728] sm:$0xf] }
 0x1a0   :  { %3684 = vmatpush.bf16.msra.mxu0 %v5206_v38  ;;  %v5301_v38 = vld [vmem:[%s8869_s3 + $0x5a8] sm:$0xf]  ;;  %v5350_v51 = vor.u32 %v5925_v4, %v5349_v50 }
 0x1a1   :  { %3646 = vmatpush.bf16.msrb.mxu2 %v4870_v13  ;;  %v5302_v49 = vor.u32 %v5913_v40, %v5301_v38  ;;  %v5967_v38 = vld [vmem:[%s8869_s3 + $0x760] sm:$0xf0]  ;;  %v5361_v40 = vld [vmem:[%s8869_s3 + $0x620] sm:$0xf] }
 0x1a2   :  { %3656 = vmatpush.bf16.msrb.mxu1 %v5014_v60  ;;  %3617 = vmatpush.bf16.msra.mxu3 %v4690_v16  ;;  %v5278_v60 = vor.u32 %v5907_v5, %v5277_v3  ;;  %v5085_v16 = vld [vmem:[%s8869_s3 + $0x3f8] sm:$0xf]  ;;  %v5955_v5 = vld [vmem:[%s8869_s3 + $0x700] sm:$0xf0] }
 0x1a3   :  { %v5086_v17 = vor.u32 %v5859_v18, %v5085_v16  ;;  %v5469_v3 = vld [vmem:[%s8869_s3 + $0x6f8] sm:$0xf]  ;;  %v5949_v16 = vld [vmem:[%s8869_s3 + $0x6d0] sm:$0xf0] }
 0x1a4   :  { %3685 = vmatpush.bf16.msra.mxu0 %v5194_v55  ;;  %3647 = vmatmul.bf16.vlgmr.msrb.gmra.mxu2 %v7686_v39  ;;  %v5158_v39 = vor.u32 %v5877_v61, %v5157_v31  ;;  %v5109_v55 = vld [vmem:[%s8869_s3 + $0x428] sm:$0xf]  ;;  %v5470_v9 = vor.u32 %v5955_v5, %v5469_v3 }
 0x1a5   :  { %3695 = vmatpush.bf16.msra.mxu2 %v5338_v14  ;;  %v5110_v23 = vor.u32 %v5865_v52, %v5109_v55  ;;  %v5940_v14 = vld [vmem:[%s8869_s3 + $0x688] sm:$0xf0]  ;;  %v5061_v61 = vld [vmem:[%s8869_s3 + $0x3c8] sm:$0xf]  ;;  %v3340_v55 = vpop.f32.mrf.mxu3 }
 0x1a6   :  { %3657 = vmatpush.bf16.msrb.mxu1 %v5002_v24  ;;  %3618 = vmatpush.bf16.msra.mxu3 %v4678_v30  ;;  %v5253_v24 = vld [vmem:[%s8869_s3 + $0x548] sm:$0xf]  ;;  %v5934_v30 = vld [vmem:[%s8869_s3 + $0x658] sm:$0xf0] }
 0x1a7   :  { %v5254_v59 = vor.u32 %v5901_v25, %v5253_v24  ;;  %v5386_v6 = vor.u32 %v5934_v30, %v5385_v29 }
 0x1a8   :  { %3686 = vmatpush.bf16.msra.mxu0 %v5182_v44  ;;  %v5409_v44 = vld [vmem:[%s8869_s3 + $0x680] sm:$0xf] }
 0x1a9   :  { %3696 = vmatpush.bf16.msra.mxu2 %v5326_v21  ;;  %3619 = vmatmul.bf16.vlgmr.msra.gmra.mxu3 %v7529_v7  ;;  %v5122_v7 = vor.u32 %v5868_v46, %v5121_v45  ;;  %v5398_v21 = vor.u32 %v5937_v22, %v5397_v20 }
 0x1aa   :  { %3667 = vmatpush.bf16.msrb.mxu3 %v5146_v32  ;;  %3658 = vmatpush.bf16.msrb.mxu1 %v4990_v33  ;;  %v5853_v32 = vld [vmem:[%s8869_s3 + $0x3d0] sm:$0xf0]  ;;  %v5970_v33 = vld [vmem:[%s8869_s3 + $0x778] sm:$0xf0] }
 0x1ab   :  { %v5530_v35 = vor.u32 %v5970_v33, %v5529_v41 }
 0x1ac   :  { %3687 = vmatpush.bf16.msra.mxu0 %v5170_v27  ;;  %v5856_v27 = vld [vmem:[%s8869_s3 + $0x3e8] sm:$0xf0] }
 0x1ad   :  { %3697 = vmatpush.bf16.msra.mxu2 %v5314_v36  ;;  %v5074_v31 = vor.u32 %v5856_v27, %v5073_v26  ;;  %v5374_v36 = vor.u32 %v5931_v28, %v5373_v10 }
 0x1ae   :  { %3668 = vmatpush.bf16.msrb.mxu3 %v5134_v58  ;;  %3659 = vmatpush.bf16.msrb.mxu1 %v4978_v43  ;;  %v5517_v58 = vld [vmem:[%s8869_s3 + $0x758] sm:$0xf]  ;;  %v5928_v43 = vld [vmem:[%s8869_s3 + $0x628] sm:$0xf0] }
 0x1af   :  { %v5518_v45 = vor.u32 %v5967_v38, %v5517_v58  ;;  %v5362_v46 = vor.u32 %v5928_v43, %v5361_v40 }
 0x1b0   :  { %3688 = vmatpush.bf16.msra.mxu0 %v5158_v39  ;;  %v5062_v39 = vor.u32 %v5853_v32, %v5061_v61 }
 0x1b1   :  { %3698 = vmatpush.bf16.msra.mxu2 %v5302_v49  ;;  %v3368_v49 = vpop.f32.mrf.mxu2 }
 0x1b2   :  { %3669 = vmatpush.bf16.msrb.mxu3 %v5122_v7  ;;  %3660 = vmatpush.bf16.msrb.mxu1 %v4966_v54  ;;  %v5506_v7 = vor.u32 %v5964_v48, %v5505_v47  ;;  %v3328_v54 = vpop.f32.mrf.mxu1 }
 0x1b3   :  { %3689 = vmatmul.bf16.vlgmr.msra.gmra.mxu0 %v8001_v2  ;;  %v5943_v2 = vld [vmem:[%s8869_s3 + $0x6a0] sm:$0xf0] }
 0x1b4   :  { %v5422_v13 = vor.u32 %v5943_v2, %v5421_v0 }
 0x1b5   :  { %3699 = vmatpush.bf16.msra.mxu2 %v5290_v57  ;;  %3661 = vmatmul.bf16.vlgmr.msrb.gmra.mxu1 %v7780_v42  ;;  %v5410_v42 = vor.u32 %v5940_v14, %v5409_v44  ;;  %v5958_v57 = vld [vmem:[%s8869_s3 + $0x718] sm:$0xf0]  ;;  %v8849_v14 = vld [vmem:[%s8870_s4] sm:$0x7] }
 0x1b6   :  { %3709 = vmatpush.bf16.msra.mxu1 %v5434_v62  ;;  %3670 = vmatpush.bf16.msrb.mxu3 %v5110_v23  ;;  %v5481_v62 = vld [vmem:[%s8869_s3 + $0x710] sm:$0xf]  ;;  %v2031_v18 = vperm.slane %v8849_v14, 0 }
 0x1b7   :  { %v5482_v23 = vor.u32 %v5958_v57, %v5481_v62 }
 0x1b8   :  { %v3327_v22 = vadd.f32 %v3326_v34, %v2031_v18 }
 0x1b9   :  { %3700 = vmatpush.bf16.msra.mxu2 %v5278_v60  ;;  %v3370_v2 = vpop.f32.mrf.mxu2  ;;  %v5457_v60 = vld [vmem:[%s8869_s3 + $0x6e0] sm:$0xf] }
 0x1ba   :  { %3710 = vmatpush.bf16.msra.mxu1 %v5422_v13  ;;  %3671 = vmatpush.bf16.msrb.mxu3 %v5098_v37  ;;  %v3382_v8 = vpop.f32.mrf.mxu1  ;;  %v3342_v13 = vpop.f32.mrf.mxu3 }
 0x1bd   :  { %3701 = vmatpush.bf16.msra.mxu2 %v5266_v19  ;;  %v5446_v19 = vor.u32 %v5949_v16, %v5445_v11 }
 0x1be   :  { %3711 = vmatpush.bf16.msra.mxu1 %v5410_v42  ;;  %3672 = vmatpush.bf16.msrb.mxu3 %v5086_v17  ;;  %v3341_v17 = vadd.f32 %v3340_v55, %v3327_v22 }
 0x1c1   :  { %3702 = vmatpush.bf16.msra.mxu2 %v5254_v59  ;;  %v3329_v59 = vadd.f32 %v3328_v54, %v2031_v18 }
 0x1c2   :  { %3712 = vmatpush.bf16.msra.mxu1 %v5398_v21  ;;  %3673 = vmatpush.bf16.msrb.mxu3 %v5074_v31  ;;  %v3384_v42 = vpop.f32.mrf.mxu1  ;;  %v3396_v20 = vpop.f32.mrf.mxu3 }
 0x1c3   :  { %v3343_v31 = vadd.f32 %v3342_v13, %v3329_v59  ;;  %v2033_v59 = vperm.slane %v8849_v14, 2 }
 0x1c4   :  { %3703 = vmatmul.bf16.vlgmr.msra.gmra.mxu2 %v8092_v56  ;;  %v3354_v56 = vpop.f32.mrf.mxu0 }
 0x1c5   :  { %v3355_v25 = vadd.f32 %v3354_v56, %v3341_v17 }
 0x1c6   :  { %3713 = vmatpush.bf16.msra.mxu1 %v5386_v6  ;;  %3674 = vmatpush.bf16.msrb.mxu3 %v5062_v39  ;;  %v3424_v37 = vpop.f32.mrf.mxu2 }
 0x1c7   :  { %v3369_v27 = vadd.f32 %v3368_v49, %v3355_v25  ;;  %v2032_v49 = vperm.slane %v8849_v14, 1 }
 0x1c9   :  { %3675 = vmatmul.bf16.vlgmr.msrb.gmra.mxu3 %v7910_v1  ;;  %v5961_v1 = vld [vmem:[%s8869_s3 + $0x730] sm:$0xf0]  ;;  %v3383_v29 = vadd.f32 %v3382_v8, %v3369_v27 }
 0x1ca   :  { %3723 = vmatpush.bf16.msra.mxu3 %v5530_v35  ;;  %3714 = vmatpush.bf16.msra.mxu1 %v5374_v36  ;;  %v5494_v52 = vor.u32 %v5961_v1, %v5493_v53  ;;  %v3398_v30 = vpop.f32.mrf.mxu3 }
 0x1cb   :  { %v3397_v61 = vadd.f32 %v3396_v20, %v3383_v29 }
 0x1cc   :  { %v3356_v0 = vpop.f32.mrf.mxu0 }
 0x1cd   :  { %v3357_v32 = vadd.f32 %v3356_v0, %v3343_v31 }
 0x1ce   :  { %3724 = vmatpush.bf16.msra.mxu3 %v5518_v45  ;;  %3715 = vmatpush.bf16.msra.mxu1 %v5362_v46  ;;  %v3426_v26 = vpop.f32.mrf.mxu2 }
 0x1cf   :  { %v3371_v33 = vadd.f32 %v3370_v2, %v3357_v32 }
 0x1d1   :  { %v3438_v21 = vpop.f32.mrf.mxu1  ;;  %v3385_v39 = vadd.f32 %v3384_v42, %v3371_v33 }
 0x1d2   :  { %3725 = vmatpush.bf16.msra.mxu3 %v5506_v7  ;;  %3716 = vmatpush.bf16.msra.mxu1 %v5350_v51 }
 0x1d3   :  { %v3399_v58 = vadd.f32 %v3398_v30, %v3385_v39 }
 0x1d4   :  { %v3410_v44 = vpop.f32.mrf.mxu0 }
 0x1d5   :  { %3717 = vmatmul.bf16.vlgmr.msra.gmra.mxu1 %v8171_v63  ;;  %v5952_v63 = vld [vmem:[%s8869_s3 + $0x6e8] sm:$0xf0]  ;;  %v3411_v6 = vadd.f32 %v3410_v44, %v3397_v61  ;;  %s6001_s3 = smov [#allocation2]  }
 0x1d6   :  { %3726 = vmatpush.bf16.msra.mxu3 %v5494_v52  ;;  %v5458_v15 = vor.u32 %v5952_v63, %v5457_v60  ;;  %v3480_v28 = vpop.f32.mrf.mxu2  ;;  %s3747_s4 = sshll.u32 %s6001_s3, 4  ;;  %s3748_s4 = int_to_ptr.vmem [resolvable:$true] %s3747_s4 }
 0x1d7   :  { %v3425_v10 = vadd.f32 %v3424_v37, %v3411_v6 }
 0x1d9   :  { %v3439_v34 = vadd.f32 %v3438_v21, %v3425_v10  ;;  %v3440_v35 = vpop.f32.mrf.mxu1 }
 0x1da   :  { %3727 = vmatpush.bf16.msra.mxu3 %v5482_v23 }
 0x1dc   :  { %v3412_v24 = vpop.f32.mrf.mxu0 }
 0x1de   :  { %3728 = vmatpush.bf16.msra.mxu3 %v5470_v9  ;;  %v3482_v45 = vpop.f32.mrf.mxu2 }
 0x1e2   :  { %3729 = vmatpush.bf16.msra.mxu3 %v5458_v15  ;;  %v3494_v47 = vpop.f32.mrf.mxu1 }
 0x1e4   :  { %v3466_v41 = vpop.f32.mrf.mxu0 }
 0x1e5   :  { %v3467_v50 = vadd.f32 %v3466_v41, %v2032_v49 }
 0x1e6   :  { %3730 = vmatpush.bf16.msra.mxu3 %v5446_v19 }
 0x1e7   :  { %v3481_v7 = vadd.f32 %v3480_v28, %v3467_v50  ;;  %v3536_v53 = vpop.f32.mrf.mxu2 }
 0x1e9   :  { %3731 = vmatmul.bf16.vlgmr.msra.gmra.mxu3 %v8277_v12  ;;  %v3413_v12 = vadd.f32 %v3412_v24, %v3399_v58  ;;  %v3495_v1 = vadd.f32 %v3494_v47, %v3481_v7 }
 0x1ea   :  { %v3496_v54 = vpop.f32.mrf.mxu1 }
 0x1eb   :  { %v3427_v43 = vadd.f32 %v3426_v26, %v3413_v12 }
 0x1ec   :  { %v3452_v36 = vpop.f32.mrf.mxu3  ;;  %v3468_v40 = vpop.f32.mrf.mxu0 }
 0x1ed   :  { %v3453_v38 = vadd.f32 %v3452_v36, %v3439_v34  ;;  %v3441_v56 = vadd.f32 %v3440_v35, %v3427_v43  ;;  %v3469_v52 = vadd.f32 %v3468_v40, %v2032_v49 }
 0x1ef   :  { %3737 = vst [vmem:[#allocation2] sm:$0xff] %v3453_v38  ;;  %v3483_v62 = vadd.f32 %v3482_v45, %v3469_v52  ;;  %v3538_v3 = vpop.f32.mrf.mxu2 }
 0x1f1   :  { %v3497_v23 = vadd.f32 %v3496_v54, %v3483_v62 }
 0x1f2   :  { %v3550_v9 = vpop.f32.mrf.mxu1 }
 0x1f4   :  { %v3454_v46 = vpop.f32.mrf.mxu3  ;;  %v3522_v4 = vpop.f32.mrf.mxu0 }
 0x1f5   :  { %v3455_v48 = vadd.f32 %v3454_v46, %v3441_v56 }
 0x1f7   :  { %3740 = vst [vmem:[#allocation2 + $0x18] sm:$0xff] %v3455_v48 }
 0x1fa   :  { %v3552_v42 = vpop.f32.mrf.mxu1 }
 0x1fc   :  { %v3508_v51 = vpop.f32.mrf.mxu3  ;;  %v3524_v2 = vpop.f32.mrf.mxu0 }
 0x1fd   :  { %v3509_v55 = vadd.f32 %v3508_v51, %v3495_v1 }
 0x1ff   :  { %v3523_v57 = vadd.f32 %v3522_v4, %v3509_v55 }
 0x201   :  { %v3537_v8 = vadd.f32 %v3536_v53, %v3523_v57 }
 0x203   :  { %v3551_v60 = vadd.f32 %v3550_v9, %v3537_v8 }
 0x204   :  { %v3510_v0 = vpop.f32.mrf.mxu3  ;;  %v3578_v63 = vpop.f32.mrf.mxu0 }
 0x205   :  { %v3511_v5 = vadd.f32 %v3510_v0, %v3497_v23 }
 0x207   :  { %v3525_v13 = vadd.f32 %v3524_v2, %v3511_v5  ;;  %v3592_v15 = vpop.f32.mrf.mxu2 }
 0x209   :  { %v3539_v16 = vadd.f32 %v3538_v3, %v3525_v13 }
 0x20b   :  { %v3553_v19 = vadd.f32 %v3552_v42, %v3539_v16 }
 0x20c   :  { %v3564_v44 = vpop.f32.mrf.mxu3  ;;  %v3580_v17 = vpop.f32.mrf.mxu0 }
 0x20d   :  { %v3565_v37 = vadd.f32 %v3564_v44, %v3551_v60 }
 0x20f   :  { %v3579_v11 = vadd.f32 %v3578_v63, %v3565_v37  ;;  %v3594_v25 = vpop.f32.mrf.mxu2 }
 0x211   :  { %v3593_v18 = vadd.f32 %v3592_v15, %v3579_v11 }
 0x212   :  { %v3606_v27 = vpop.f32.mrf.mxu1 }
 0x213   :  { %3738 = vst [vmem:[#allocation2 + $0x8] sm:$0xff] %v3593_v18  ;;  %v3607_v31 = vadd.f32 %v3606_v27, %v2033_v59 }
 0x214   :  { %v3566_v20 = vpop.f32.mrf.mxu3  ;;  %v3634_v29 = vpop.f32.mrf.mxu0 }
 0x215   :  { %v3567_v22 = vadd.f32 %v3566_v20, %v3553_v19 }
 0x217   :  { %v3581_v24 = vadd.f32 %v3580_v17, %v3567_v22 }
 0x219   :  { %v3595_v26 = vadd.f32 %v3594_v25, %v3581_v24 }
 0x21a   :  { %v3608_v30 = vpop.f32.mrf.mxu1 }
 0x21b   :  { %3741 = vst [vmem:[#allocation2 + $0x20] sm:$0xff] %v3595_v26  ;;  %v3609_v10 = vadd.f32 %v3608_v30, %v2033_v59 }
 0x21c   :  { %v3636_v28 = vpop.f32.mrf.mxu0 }
 0x227   :  { %v3648_v32 = vpop.f32.mrf.mxu2 }
 0x22c   :  { %v3620_v21 = vpop.f32.mrf.mxu3 }
 0x22d   :  { %v3621_v61 = vadd.f32 %v3620_v21, %v3607_v31 }
 0x22f   :  { %v3635_v41 = vadd.f32 %v3634_v29, %v3621_v61  ;;  %v3650_v36 = vpop.f32.mrf.mxu2 }
 0x230   :  { %v3690_v40 = vpop.f32.mrf.mxu0 }
 0x231   :  { %v3649_v39 = vadd.f32 %v3648_v32, %v3635_v41 }
 0x232   :  { %v3662_v33 = vpop.f32.mrf.mxu1 }
 0x233   :  { %v3663_v58 = vadd.f32 %v3662_v33, %v3649_v39 }
 0x234   :  { %v3622_v6 = vpop.f32.mrf.mxu3 }
 0x235   :  { %v3623_v34 = vadd.f32 %v3622_v6, %v3609_v10 }
 0x237   :  { %v3637_v38 = vadd.f32 %v3636_v28, %v3623_v34 }
 0x238   :  { %v3692_v4 = vpop.f32.mrf.mxu0 }
 0x239   :  { %v3651_v14 = vadd.f32 %v3650_v36, %v3637_v38 }
 0x23a   :  { %v3664_v43 = vpop.f32.mrf.mxu1 }
 0x23b   :  { %v3665_v47 = vadd.f32 %v3664_v43, %v3651_v14 }
 0x247   :  { %v3704_v45 = vpop.f32.mrf.mxu2 }
 0x24c   :  { %v3676_v35 = vpop.f32.mrf.mxu3 }
 0x24d   :  { %v3677_v12 = vadd.f32 %v3676_v35, %v3663_v58 }
 0x24f   :  { %v3691_v56 = vadd.f32 %v3690_v40, %v3677_v12  ;;  %v3706_v54 = vpop.f32.mrf.mxu2 }
 0x251   :  { %v3705_v48 = vadd.f32 %v3704_v45, %v3691_v56 }
 0x252   :  { %v3718_v50 = vpop.f32.mrf.mxu1 }
 0x253   :  { %v3719_v7 = vadd.f32 %v3718_v50, %v3705_v48 }
 0x254   :  { %v3678_v46 = vpop.f32.mrf.mxu3 }
 0x255   :  { %v3679_v49 = vadd.f32 %v3678_v46, %v3665_v47 }
 0x257   :  { %v3693_v51 = vadd.f32 %v3692_v4, %v3679_v49 }
 0x259   :  { %v3707_v55 = vadd.f32 %v3706_v54, %v3693_v51 }
 0x25a   :  { %v3720_v52 = vpop.f32.mrf.mxu1 }
 0x25b   :  { %v3721_v62 = vadd.f32 %v3720_v52, %v3707_v55 }
 0x26c   :  { %v3732_v53 = vpop.f32.mrf.mxu3 }
 0x26d   :  { %v3733_v1 = vadd.f32 %v3732_v53, %v3719_v7 }
 0x26f   :  { %3739 = vst.msk [vmem:[#allocation2 + $0x10] sm:$0xff] %vm1255_vm0, %v3733_v1 }
 0x274   :  { %v3734_v57 = vpop.f32.mrf.mxu3 }
 0x275   :  { %v3735_v0 = vadd.f32 %v3734_v57, %v3721_v62 }
 0x277   :  { %3742 = vst.msk [vmem:[#allocation2 + $0x28] sm:$0xff] %vm1255_vm0, %v3735_v0 }
 0x278   :  { %3755 = dma.vmem_to_hbm [thread:$0]  %s3748_s4, 768, %s3750_s1, [#allocation3], %s6002_s12, %s6002_s12, %s6003_s13  }
 0x279   :  { %5999 = dma.done.wait [#allocation3], 768  }
 0x27a   :  { %6000 = vsyncadd [#allocation3], 4294966528 }
 0x27b   :  { %3760 = vsyncpa [#allocation3], 1 }

</bundles_post_ra>
